<compile_context>
chip_gen: v6e
topology: v6e:2x2x1
jax: 0.10.0
libtpu: 0.0.40
codegen_flags: <defaults>
</compile_context>

<pallas_src>
import functools
import math

import jax
import jax.numpy as jnp
from jax import lax
from jax.experimental import pallas as pl
from jax.experimental.pallas import tpu as pltpu


# ----------------------------- kernel helpers --------------------------------

def _shift_rows(x, offset, row_idx):
    """result[t] = x[t + offset]; rows shifted past either edge are zero.

    `row_idx` is a precomputed (T, 1) iota (broadcast against channels)."""
    T = x.shape[0]
    assert abs(offset) < T, "dilation/shift must be smaller than the time tile"
    if offset == 0:
        return x
    if offset > 0:
        rolled = pltpu.roll(x, (T - offset) % T, axis=0)  # rolled[t] = x[(t+offset)%T]
        mask = row_idx < (T - offset)
    else:
        d = -offset
        rolled = pltpu.roll(x, d, axis=0)                 # rolled[t] = x[(t+offset)%T]
        mask = row_idx >= d
    return jnp.where(mask, rolled, 0.0)


def _shifted_signal(x, P, T0, delta, row_idx):
    """Shift the phase-blocked signal by `delta` samples (zero outside [0, P*T0)).

    x is (P*T0, C) with block p holding z[P*t + p]; the result has the same
    layout and holds z[P*t + p + delta]."""
    blocks = []
    for p in range(P):
        m = p + delta
        r = m % P            # source phase block
        q = m // P           # row shift inside that block (floor div, handles <0)
        src = x if P == 1 else x[r * T0:(r + 1) * T0]
        blocks.append(_shift_rows(src, q, row_idx))
    return blocks[0] if P == 1 else jnp.concatenate(blocks, axis=0)


def _highway_block(x, w_ref, b_ref, dilation, P, T0, row_idx):
    # HighwayConv1d: k=3 dilated "same" conv to 2C channels, split (a, g);
    # out = x + sigmoid(g) * (a - x).   w_ref is (3C, 2C) flattened (L|M|R taps).
    M, C = x.shape
    x_left = _shifted_signal(x, P, T0, -dilation, row_idx)    # z[s - d]
    x_right = _shifted_signal(x, P, T0, +dilation, row_idx)   # z[s + d]
    w = w_ref[...]
    if C % 128 == 0:
        # Lane-aligned channels (production): one wide im2col matmul (K = 3C).
        x_cat = jnp.concatenate([x_left, x, x_right], axis=1)        # (M, 3C)
        y = jnp.dot(x_cat, w, preferred_element_type=jnp.float32)
    else:
        # Small/unaligned channels: three accumulating MXU pushes, same math.
        y = jnp.dot(x_left, w[:C], preferred_element_type=jnp.float32)
        y = y + jnp.dot(x, w[C:2 * C], preferred_element_type=jnp.float32)
        y = y + jnp.dot(x_right, w[2 * C:], preferred_element_type=jnp.float32)
    y = y + b_ref[...]
    a = y[:, :C]
    gate = jax.nn.sigmoid(y[:, C:])
    return x + gate * (a - x)


def _upsample2x_block(x, w_ref, b_ref, P, T0):
    # ConvTranspose1d(k=2, stride=2, pad=0): z_out[2s + k] = z_in[s] @ W[k] + b.
    # In the phase-block layout this needs NO interleave: output phase block
    # p_out = (input phase block p_out//2) @ W[p_out % 2] + b.
    # w_ref is (2C, C) = [W0; W1].
    M, C = x.shape
    w = w_ref[...]
    b = b_ref[...]
    y0 = jnp.dot(x, w[:C], preferred_element_type=jnp.float32) + b   # W0 taps
    y1 = jnp.dot(x, w[C:], preferred_element_type=jnp.float32) + b   # W1 taps
    pieces = []
    for p in range(P):
        sl = slice(p * T0, (p + 1) * T0)
        pieces.append(y0[sl])
        pieces.append(y1[sl])
    return jnp.concatenate(pieces, axis=0)          # (2P*T0, C), phase count 2P


def _converter_kernel(x_ref, *refs, layer_spec, T0):
    o_ref = refs[-1]
    params = refs[:-1]
    row_idx = lax.broadcasted_iota(jnp.int32, (T0, 1), 0)   # hoisted shift mask iota
    x = x_ref[0]                       # (T0, in_dim), f32, phase count P = 1
    P = 1
    for idx, layer in enumerate(layer_spec):
        w_ref = params[2 * idx]
        b_ref = params[2 * idx + 1]
        kind = layer["kind"]
        if kind == "conv1x1":
            y = jnp.dot(x, w_ref[...], preferred_element_type=jnp.float32) + b_ref[...]
            act = layer["activation"]
            if act == "relu":
                y = jnp.maximum(y, 0.0)
            elif act == "sigmoid":
                y = jax.nn.sigmoid(y)
            x = y
        elif kind == "highway":
            x = _highway_block(x, w_ref, b_ref, layer["dilation"], P, T0, row_idx)
        else:  # convtr
            x = _upsample2x_block(x, w_ref, b_ref, P, T0)
            P *= 2
    # Single store of the (P*T0, Fd) phase-blocked result.
    # TODO(synk): repack 8 timesteps per 128-lane row for a lane-dense store.
    o_ref[0] = x.astype(o_ref.dtype)


# ------------------------------ fused wrapper ---------------------------------

def _vmem_limit_bytes():
    try:
        cap = pltpu.get_tpu_info().vmem_capacity_bytes
        return int(min(cap - (8 << 20), 100 << 20))   # ~56 MiB on v7x, 100 MiB on v5e/v6e
    except Exception:
        return None


def converter_forward(x, layers):
    """x: (B, T, in_dim) -> (B, 4*T, out_dim). One pallas_call for all 16 layers."""
    B, T, Fin = x.shape
    n_up = sum(1 for l in layers if l["kind"] == "convtr")
    P = 2 ** n_up
    Fd = layers[-1]["w"].shape[-1]

    # Pack every layer's params into 2-D slabs (host-side, one-time).
    flat_params = []
    layer_spec = []
    for l in layers:
        kind, w, b = l["kind"], l["w"], l["b"]
        if kind == "conv1x1":
            wk, bk = w, b                                        # (Cin, Cout), (1, Cout)
            layer_spec.append({"kind": kind, "activation": l["activation"]})
        elif kind == "highway":
            k, cin, cout2 = w.shape
            wk, bk = w.reshape(k * cin, cout2), b                # (3C, 2C), (1, 2C)
            layer_spec.append({"kind": kind, "dilation": l["dilation"]})
        else:  # convtr
            wk = jnp.concatenate([w[0], w[1]], axis=0)           # (2C, C) = [W0; W1]
            bk = b                                               # (1, C)
            layer_spec.append({"kind": kind})
        flat_params.extend([wk, bk])

    in_specs = [pl.BlockSpec((1, T, Fin), lambda i: (i, 0, 0))]
    # Whole-array VMEM operands: fetched once, single-buffered (no pipelining).
    in_specs += [pl.BlockSpec(memory_space=pltpu.MemorySpace.VMEM)
                 for _ in flat_params]

    kern = functools.partial(_converter_kernel, layer_spec=tuple(layer_spec), T0=T)
    out_block = pl.pallas_call(
        kern,
        out_shape=jax.ShapeDtypeStruct((B, P * T, Fd), x.dtype),
        grid=(B,),
        in_specs=in_specs,
        out_specs=pl.BlockSpec((1, P * T, Fd), lambda i: (i, 0, 0)),
        compiler_params=pltpu.CompilerParams(
            dimension_semantics=("parallel",),        # 2 TCs on v7x split the batch
            vmem_limit_bytes=_vmem_limit_bytes()),
    )(x, *flat_params)

    # De-block the phases outside the kernel (cheap layout plumbing in XLA):
    # out_block[b, p*T + t] = z[P*t + p]  ->  out[b, P*t + p] = z[P*t + p].
    out = out_block.reshape(B, P, T, Fd)
    out = jnp.transpose(out, (0, 2, 1, 3))
    return out.reshape(B, P * T, Fd)


# --------------------------- parameter setup ----------------------------------

def _conv_init(key, cin, cout, ksize, std_mul, dropout):
    std = math.sqrt((std_mul * (1.0 - dropout)) / (ksize * cin))
    w = jax.random.normal(key, (ksize, cin, cout), jnp.float32) * std
    b = jnp.zeros((1, cout), jnp.float32)
    return w, b


def make_converter_params(key, in_dim, out_dim, channels=32, dropout=0.1):
    """Mirrors Converter.__init__'s nn.Sequential layer-by-layer."""
    F, Fd, C = in_dim, out_dim, channels
    spec = [
        ("conv1x1", F, C, 1, 1.0, {"activation": None}),
        ("highway", C, C, 3, 1.0, {"dilation": 1}),
        ("highway", C, C, 3, 1.0, {"dilation": 3}),
        ("convtr", C, C, 2, 1.0, {}),
        ("highway", C, C, 3, 1.0, {"dilation": 1}),
        ("highway", C, C, 3, 1.0, {"dilation": 3}),
        ("convtr", C, C, 2, 1.0, {}),
        ("highway", C, C, 3, 1.0, {"dilation": 1}),
        ("highway", C, C, 3, 1.0, {"dilation": 3}),
        ("conv1x1", C, 2 * C, 1, 1.0, {"activation": None}),
        ("highway", 2 * C, 2 * C, 3, 1.0, {"dilation": 1}),
        ("highway", 2 * C, 2 * C, 3, 1.0, {"dilation": 1}),
        ("conv1x1", 2 * C, Fd, 1, 1.0, {"activation": None}),
        ("conv1x1", Fd, Fd, 1, 1.0, {"activation": "relu"}),     # + nn.ReLU
        ("conv1x1", Fd, Fd, 1, 2.0, {"activation": "relu"}),     # + nn.ReLU
        ("conv1x1", Fd, Fd, 1, 2.0, {"activation": "sigmoid"}),  # + nn.Sigmoid
    ]
    layers = []
    keys = jax.random.split(key, len(spec))
    for k, (kind, cin, cout, ksize, std_mul, extra) in zip(keys, spec):
        if kind == "highway":
            w, b = _conv_init(k, cin, 2 * cout, ksize, std_mul, dropout)
        else:
            w, b = _conv_init(k, cin, cout, ksize, std_mul, dropout)
        if kind == "conv1x1":
            w = w[0]  # (cin, cout)
        layers.append(dict(kind=kind, w=w, b=b, **extra))
    return layers


# ----------------------------- pure-JAX reference ------------------------------

def converter_reference(x, layers):
    """Same math, no Pallas, on the original (unflattened) params."""
    for layer in layers:
        kind, w, b = layer["kind"], layer["w"], layer["b"]
        if kind == "conv1x1":
            y = jnp.einsum("btc,cd->btd", x, w) + b
            act = layer["activation"]
            if act == "relu":
                y = jnp.maximum(y, 0.0)
            elif act == "sigmoid":
                y = jax.nn.sigmoid(y)
            x = y
        elif kind == "highway":
            d = layer["dilation"]
            B, T, C = x.shape
            xp = jnp.pad(x, ((0, 0), (d, d), (0, 0)))
            y = (jnp.einsum("btc,cd->btd", xp[:, 0:T], w[0])
                 + jnp.einsum("btc,cd->btd", xp[:, d:d + T], w[1])
                 + jnp.einsum("btc,cd->btd", xp[:, 2 * d:2 * d + T], w[2])
                 + b)
            a, g = y[..., :C], y[..., C:]
            gate = jax.nn.sigmoid(g)
            x = gate * a + (1.0 - gate) * x
        else:  # convtr
            B, T, C = x.shape
            y0 = jnp.einsum("btc,cd->btd", x, w[0]) + b
            y1 = jnp.einsum("btc,cd->btd", x, w[1]) + b
            x = jnp.stack([y0, y1], axis=2).reshape(B, 2 * T, C)
    return x


# ------------------------------------ main -------------------------------------

if __name__ == "__main__":
    key = jax.random.PRNGKey(0)
    k_param, k_x = jax.random.split(key)

    B, T = 2, 8
    in_dim, out_dim, channels = 16, 16, 32

    layers = make_converter_params(k_param, in_dim, out_dim, channels)
    x = jax.random.normal(k_x, (B, T, in_dim), jnp.float32)

    out = converter_forward(x, layers)
    out = jax.block_until_ready(out)

    assert out.shape == (B, 4 * T, out_dim), out.shape

    ref = converter_reference(x, layers)
    assert jnp.allclose(out, ref, atol=1e-4, rtol=1e-4), (
        float(jnp.max(jnp.abs(out - ref))))

    print("KERNEL_OK")
</pallas_src>

<mosaic_0001>
module attributes {stable_mosaic.version = 11 : i64} {
  func.func @_converter_kernel(%arg0: i32, %arg1: memref<1x8x16xf32, #tpu.memory_space<vmem>>, %arg2: memref<16x32xf32, #tpu.memory_space<vmem>>, %arg3: memref<1x32xf32, #tpu.memory_space<vmem>>, %arg4: memref<96x64xf32, #tpu.memory_space<vmem>>, %arg5: memref<1x64xf32, #tpu.memory_space<vmem>>, %arg6: memref<96x64xf32, #tpu.memory_space<vmem>>, %arg7: memref<1x64xf32, #tpu.memory_space<vmem>>, %arg8: memref<64x32xf32, #tpu.memory_space<vmem>>, %arg9: memref<1x32xf32, #tpu.memory_space<vmem>>, %arg10: memref<96x64xf32, #tpu.memory_space<vmem>>, %arg11: memref<1x64xf32, #tpu.memory_space<vmem>>, %arg12: memref<96x64xf32, #tpu.memory_space<vmem>>, %arg13: memref<1x64xf32, #tpu.memory_space<vmem>>, %arg14: memref<64x32xf32, #tpu.memory_space<vmem>>, %arg15: memref<1x32xf32, #tpu.memory_space<vmem>>, %arg16: memref<96x64xf32, #tpu.memory_space<vmem>>, %arg17: memref<1x64xf32, #tpu.memory_space<vmem>>, %arg18: memref<96x64xf32, #tpu.memory_space<vmem>>, %arg19: memref<1x64xf32, #tpu.memory_space<vmem>>, %arg20: memref<32x64xf32, #tpu.memory_space<vmem>>, %arg21: memref<1x64xf32, #tpu.memory_space<vmem>>, %arg22: memref<192x128xf32, #tpu.memory_space<vmem>>, %arg23: memref<1x128xf32, #tpu.memory_space<vmem>>, %arg24: memref<192x128xf32, #tpu.memory_space<vmem>>, %arg25: memref<1x128xf32, #tpu.memory_space<vmem>>, %arg26: memref<64x16xf32, #tpu.memory_space<vmem>>, %arg27: memref<1x16xf32, #tpu.memory_space<vmem>>, %arg28: memref<16x16xf32, #tpu.memory_space<vmem>>, %arg29: memref<1x16xf32, #tpu.memory_space<vmem>>, %arg30: memref<16x16xf32, #tpu.memory_space<vmem>>, %arg31: memref<1x16xf32, #tpu.memory_space<vmem>>, %arg32: memref<16x16xf32, #tpu.memory_space<vmem>>, %arg33: memref<1x16xf32, #tpu.memory_space<vmem>>, %arg34: memref<1x32x16xf32, #tpu.memory_space<vmem>>) attributes {dimension_semantics = [#tpu.dimension_semantics<parallel>], iteration_bounds = array<i64: 2>, scalar_prefetch = 0 : i64, scratch_operands = 0 : i64, tpu.core_type = #tpu.core_type<tc>, window_params = [{transform_indices = @transform_0, window_bounds = array<i64: 1, 8, 16>}, {pipeline_mode = #tpu.pipeline_mode<synchronous>, transform_indices = @transform_1, window_bounds = array<i64: 16, 32>}, {pipeline_mode = #tpu.pipeline_mode<synchronous>, transform_indices = @transform_2, window_bounds = array<i64: 1, 32>}, {pipeline_mode = #tpu.pipeline_mode<synchronous>, transform_indices = @transform_3, window_bounds = array<i64: 96, 64>}, {pipeline_mode = #tpu.pipeline_mode<synchronous>, transform_indices = @transform_4, window_bounds = array<i64: 1, 64>}, {pipeline_mode = #tpu.pipeline_mode<synchronous>, transform_indices = @transform_5, window_bounds = array<i64: 96, 64>}, {pipeline_mode = #tpu.pipeline_mode<synchronous>, transform_indices = @transform_6, window_bounds = array<i64: 1, 64>}, {pipeline_mode = #tpu.pipeline_mode<synchronous>, transform_indices = @transform_7, window_bounds = array<i64: 64, 32>}, {pipeline_mode = #tpu.pipeline_mode<synchronous>, transform_indices = @transform_8, window_bounds = array<i64: 1, 32>}, {pipeline_mode = #tpu.pipeline_mode<synchronous>, transform_indices = @transform_9, window_bounds = array<i64: 96, 64>}, {pipeline_mode = #tpu.pipeline_mode<synchronous>, transform_indices = @transform_10, window_bounds = array<i64: 1, 64>}, {pipeline_mode = #tpu.pipeline_mode<synchronous>, transform_indices = @transform_11, window_bounds = array<i64: 96, 64>}, {pipeline_mode = #tpu.pipeline_mode<synchronous>, transform_indices = @transform_12, window_bounds = array<i64: 1, 64>}, {pipeline_mode = #tpu.pipeline_mode<synchronous>, transform_indices = @transform_13, window_bounds = array<i64: 64, 32>}, {pipeline_mode = #tpu.pipeline_mode<synchronous>, transform_indices = @transform_14, window_bounds = array<i64: 1, 32>}, {pipeline_mode = #tpu.pipeline_mode<synchronous>, transform_indices = @transform_15, window_bounds = array<i64: 96, 64>}, {pipeline_mode = #tpu.pipeline_mode<synchronous>, transform_indices = @transform_16, window_bounds = array<i64: 1, 64>}, {pipeline_mode = #tpu.pipeline_mode<synchronous>, transform_indices = @transform_17, window_bounds = array<i64: 96, 64>}, {pipeline_mode = #tpu.pipeline_mode<synchronous>, transform_indices = @transform_18, window_bounds = array<i64: 1, 64>}, {pipeline_mode = #tpu.pipeline_mode<synchronous>, transform_indices = @transform_19, window_bounds = array<i64: 32, 64>}, {pipeline_mode = #tpu.pipeline_mode<synchronous>, transform_indices = @transform_20, window_bounds = array<i64: 1, 64>}, {pipeline_mode = #tpu.pipeline_mode<synchronous>, transform_indices = @transform_21, window_bounds = array<i64: 192, 128>}, {pipeline_mode = #tpu.pipeline_mode<synchronous>, transform_indices = @transform_22, window_bounds = array<i64: 1, 128>}, {pipeline_mode = #tpu.pipeline_mode<synchronous>, transform_indices = @transform_23, window_bounds = array<i64: 192, 128>}, {pipeline_mode = #tpu.pipeline_mode<synchronous>, transform_indices = @transform_24, window_bounds = array<i64: 1, 128>}, {pipeline_mode = #tpu.pipeline_mode<synchronous>, transform_indices = @transform_25, window_bounds = array<i64: 64, 16>}, {pipeline_mode = #tpu.pipeline_mode<synchronous>, transform_indices = @transform_26, window_bounds = array<i64: 1, 16>}, {pipeline_mode = #tpu.pipeline_mode<synchronous>, transform_indices = @transform_27, window_bounds = array<i64: 16, 16>}, {pipeline_mode = #tpu.pipeline_mode<synchronous>, transform_indices = @transform_28, window_bounds = array<i64: 1, 16>}, {pipeline_mode = #tpu.pipeline_mode<synchronous>, transform_indices = @transform_29, window_bounds = array<i64: 16, 16>}, {pipeline_mode = #tpu.pipeline_mode<synchronous>, transform_indices = @transform_30, window_bounds = array<i64: 1, 16>}, {pipeline_mode = #tpu.pipeline_mode<synchronous>, transform_indices = @transform_31, window_bounds = array<i64: 16, 16>}, {pipeline_mode = #tpu.pipeline_mode<synchronous>, transform_indices = @transform_32, window_bounds = array<i64: 1, 16>}, {transform_indices = @transform_33, window_bounds = array<i64: 1, 32, 16>}]} {
    %0 = tpu.iota {dimensions = array<i32: 0>} : vector<8x1xi32>
    %c0 = arith.constant 0 : index
    %c0_0 = arith.constant 0 : index
    %c0_1 = arith.constant 0 : index
    %1 = vector.load %arg1[%c0, %c0_0, %c0_1] : memref<1x8x16xf32, #tpu.memory_space<vmem>>, vector<1x8x16xf32>
    %2 = vector.shape_cast %1 : vector<1x8x16xf32> to vector<8x16xf32>
    %c0_2 = arith.constant 0 : index
    %c0_3 = arith.constant 0 : index
    %3 = vector.load %arg2[%c0_2, %c0_3] : memref<16x32xf32, #tpu.memory_space<vmem>>, vector<16x32xf32>
    %cst = arith.constant dense<0.000000e+00> : vector<8x32xf32>
    %4 = tpu.matmul %2, %3, %cst {dimension_numbers = #tpu.dot_dimension_numbers<[1], [0], [0], [1], [0, 0, 1, 1], [], []>} : vector<8x16xf32>, vector<16x32xf32>, vector<8x32xf32> -> vector<8x32xf32>
    %c0_4 = arith.constant 0 : index
    %c0_5 = arith.constant 0 : index
    %5 = vector.load %arg3[%c0_4, %c0_5] : memref<1x32xf32, #tpu.memory_space<vmem>>, vector<1x32xf32>
    %6 = vector.broadcast %5 : vector<1x32xf32> to vector<8x32xf32>
    %7 = arith.addf %4, %6 : vector<8x32xf32>
    %c1_i32 = arith.constant 1 : i32
    %8 = tpu.dynamic_rotate %7 by %c1_i32 dim 0 : vector<8x32xf32>, i32 -> vector<8x32xf32>
    %c1_i32_6 = arith.constant 1 : i32
    %9 = vector.broadcast %c1_i32_6 : i32 to vector<8x1xi32>
    %10 = arith.cmpi sge, %0, %9 : vector<8x1xi32>
    %cst_7 = arith.constant 0.000000e+00 : f32
    %11 = vector.shape_cast %10 : vector<8x1xi1> to vector<8x1xi1>
    %12 = vector.broadcast %11 : vector<8x1xi1> to vector<8x32xi1>
    %13 = vector.broadcast %cst_7 : f32 to vector<8x32xf32>
    %14 = arith.select %12, %8, %13 : vector<8x32xi1>, vector<8x32xf32>
    %c7_i32 = arith.constant 7 : i32
    %15 = tpu.dynamic_rotate %7 by %c7_i32 dim 0 : vector<8x32xf32>, i32 -> vector<8x32xf32>
    %c7_i32_8 = arith.constant 7 : i32
    %16 = vector.broadcast %c7_i32_8 : i32 to vector<8x1xi32>
    %17 = arith.cmpi slt, %0, %16 : vector<8x1xi32>
    %cst_9 = arith.constant 0.000000e+00 : f32
    %18 = vector.shape_cast %17 : vector<8x1xi1> to vector<8x1xi1>
    %19 = vector.broadcast %18 : vector<8x1xi1> to vector<8x32xi1>
    %20 = vector.broadcast %cst_9 : f32 to vector<8x32xf32>
    %21 = arith.select %19, %15, %20 : vector<8x32xi1>, vector<8x32xf32>
    %c0_10 = arith.constant 0 : index
    %c0_11 = arith.constant 0 : index
    %22 = vector.load %arg4[%c0_10, %c0_11] : memref<96x64xf32, #tpu.memory_space<vmem>>, vector<96x64xf32>
    %23 = vector.extract_strided_slice %22 {offsets = [0, 0], sizes = [32, 64], strides = [1, 1]} : vector<96x64xf32> to vector<32x64xf32>
    %cst_12 = arith.constant dense<0.000000e+00> : vector<8x64xf32>
    %24 = tpu.matmul %14, %23, %cst_12 {dimension_numbers = #tpu.dot_dimension_numbers<[1], [0], [0], [1], [0, 0, 1, 1], [], []>} : vector<8x32xf32>, vector<32x64xf32>, vector<8x64xf32> -> vector<8x64xf32>
    %25 = vector.extract_strided_slice %22 {offsets = [32, 0], sizes = [32, 64], strides = [1, 1]} : vector<96x64xf32> to vector<32x64xf32>
    %cst_13 = arith.constant dense<0.000000e+00> : vector<8x64xf32>
    %26 = tpu.matmul %7, %25, %cst_13 {dimension_numbers = #tpu.dot_dimension_numbers<[1], [0], [0], [1], [0, 0, 1, 1], [], []>} : vector<8x32xf32>, vector<32x64xf32>, vector<8x64xf32> -> vector<8x64xf32>
    %27 = arith.addf %24, %26 : vector<8x64xf32>
    %28 = vector.extract_strided_slice %22 {offsets = [64, 0], sizes = [32, 64], strides = [1, 1]} : vector<96x64xf32> to vector<32x64xf32>
    %cst_14 = arith.constant dense<0.000000e+00> : vector<8x64xf32>
    %29 = tpu.matmul %21, %28, %cst_14 {dimension_numbers = #tpu.dot_dimension_numbers<[1], [0], [0], [1], [0, 0, 1, 1], [], []>} : vector<8x32xf32>, vector<32x64xf32>, vector<8x64xf32> -> vector<8x64xf32>
    %30 = arith.addf %27, %29 : vector<8x64xf32>
    %c0_15 = arith.constant 0 : index
    %c0_16 = arith.constant 0 : index
    %31 = vector.load %arg5[%c0_15, %c0_16] : memref<1x64xf32, #tpu.memory_space<vmem>>, vector<1x64xf32>
    %32 = vector.broadcast %31 : vector<1x64xf32> to vector<8x64xf32>
    %33 = arith.addf %30, %32 : vector<8x64xf32>
    %34 = vector.extract_strided_slice %33 {offsets = [0, 0], sizes = [8, 32], strides = [1, 1]} : vector<8x64xf32> to vector<8x32xf32>
    %35 = vector.extract_strided_slice %33 {offsets = [0, 32], sizes = [8, 32], strides = [1, 1]} : vector<8x64xf32> to vector<8x32xf32>
    %36 = arith.negf %35 : vector<8x32xf32>
    %37 = math.exp %36 : vector<8x32xf32>
    %cst_17 = arith.constant 1.000000e+00 : f32
    %38 = vector.broadcast %cst_17 : f32 to vector<8x32xf32>
    %39 = arith.addf %38, %37 : vector<8x32xf32>
    %40 = arith.divf %38, %39 : vector<8x32xf32>
    %41 = arith.subf %34, %7 : vector<8x32xf32>
    %42 = arith.mulf %40, %41 : vector<8x32xf32>
    %43 = arith.addf %7, %42 : vector<8x32xf32>
    %c3_i32 = arith.constant 3 : i32
    %44 = tpu.dynamic_rotate %43 by %c3_i32 dim 0 : vector<8x32xf32>, i32 -> vector<8x32xf32>
    %c3_i32_18 = arith.constant 3 : i32
    %45 = vector.broadcast %c3_i32_18 : i32 to vector<8x1xi32>
    %46 = arith.cmpi sge, %0, %45 : vector<8x1xi32>
    %cst_19 = arith.constant 0.000000e+00 : f32
    %47 = vector.shape_cast %46 : vector<8x1xi1> to vector<8x1xi1>
    %48 = vector.broadcast %47 : vector<8x1xi1> to vector<8x32xi1>
    %49 = vector.broadcast %cst_19 : f32 to vector<8x32xf32>
    %50 = arith.select %48, %44, %49 : vector<8x32xi1>, vector<8x32xf32>
    %c5_i32 = arith.constant 5 : i32
    %51 = tpu.dynamic_rotate %43 by %c5_i32 dim 0 : vector<8x32xf32>, i32 -> vector<8x32xf32>
    %c5_i32_20 = arith.constant 5 : i32
    %52 = vector.broadcast %c5_i32_20 : i32 to vector<8x1xi32>
    %53 = arith.cmpi slt, %0, %52 : vector<8x1xi32>
    %cst_21 = arith.constant 0.000000e+00 : f32
    %54 = vector.shape_cast %53 : vector<8x1xi1> to vector<8x1xi1>
    %55 = vector.broadcast %54 : vector<8x1xi1> to vector<8x32xi1>
    %56 = vector.broadcast %cst_21 : f32 to vector<8x32xf32>
    %57 = arith.select %55, %51, %56 : vector<8x32xi1>, vector<8x32xf32>
    %c0_22 = arith.constant 0 : index
    %c0_23 = arith.constant 0 : index
    %58 = vector.load %arg6[%c0_22, %c0_23] : memref<96x64xf32, #tpu.memory_space<vmem>>, vector<96x64xf32>
    %59 = vector.extract_strided_slice %58 {offsets = [0, 0], sizes = [32, 64], strides = [1, 1]} : vector<96x64xf32> to vector<32x64xf32>
    %cst_24 = arith.constant dense<0.000000e+00> : vector<8x64xf32>
    %60 = tpu.matmul %50, %59, %cst_24 {dimension_numbers = #tpu.dot_dimension_numbers<[1], [0], [0], [1], [0, 0, 1, 1], [], []>} : vector<8x32xf32>, vector<32x64xf32>, vector<8x64xf32> -> vector<8x64xf32>
    %61 = vector.extract_strided_slice %58 {offsets = [32, 0], sizes = [32, 64], strides = [1, 1]} : vector<96x64xf32> to vector<32x64xf32>
    %cst_25 = arith.constant dense<0.000000e+00> : vector<8x64xf32>
    %62 = tpu.matmul %43, %61, %cst_25 {dimension_numbers = #tpu.dot_dimension_numbers<[1], [0], [0], [1], [0, 0, 1, 1], [], []>} : vector<8x32xf32>, vector<32x64xf32>, vector<8x64xf32> -> vector<8x64xf32>
    %63 = arith.addf %60, %62 : vector<8x64xf32>
    %64 = vector.extract_strided_slice %58 {offsets = [64, 0], sizes = [32, 64], strides = [1, 1]} : vector<96x64xf32> to vector<32x64xf32>
    %cst_26 = arith.constant dense<0.000000e+00> : vector<8x64xf32>
    %65 = tpu.matmul %57, %64, %cst_26 {dimension_numbers = #tpu.dot_dimension_numbers<[1], [0], [0], [1], [0, 0, 1, 1], [], []>} : vector<8x32xf32>, vector<32x64xf32>, vector<8x64xf32> -> vector<8x64xf32>
    %66 = arith.addf %63, %65 : vector<8x64xf32>
    %c0_27 = arith.constant 0 : index
    %c0_28 = arith.constant 0 : index
    %67 = vector.load %arg7[%c0_27, %c0_28] : memref<1x64xf32, #tpu.memory_space<vmem>>, vector<1x64xf32>
    %68 = vector.broadcast %67 : vector<1x64xf32> to vector<8x64xf32>
    %69 = arith.addf %66, %68 : vector<8x64xf32>
    %70 = vector.extract_strided_slice %69 {offsets = [0, 0], sizes = [8, 32], strides = [1, 1]} : vector<8x64xf32> to vector<8x32xf32>
    %71 = vector.extract_strided_slice %69 {offsets = [0, 32], sizes = [8, 32], strides = [1, 1]} : vector<8x64xf32> to vector<8x32xf32>
    %72 = arith.negf %71 : vector<8x32xf32>
    %73 = math.exp %72 : vector<8x32xf32>
    %cst_29 = arith.constant 1.000000e+00 : f32
    %74 = vector.broadcast %cst_29 : f32 to vector<8x32xf32>
    %75 = arith.addf %74, %73 : vector<8x32xf32>
    %76 = arith.divf %74, %75 : vector<8x32xf32>
    %77 = arith.subf %70, %43 : vector<8x32xf32>
    %78 = arith.mulf %76, %77 : vector<8x32xf32>
    %79 = arith.addf %43, %78 : vector<8x32xf32>
    %c0_30 = arith.constant 0 : index
    %c0_31 = arith.constant 0 : index
    %80 = vector.load %arg8[%c0_30, %c0_31] : memref<64x32xf32, #tpu.memory_space<vmem>>, vector<64x32xf32>
    %c0_32 = arith.constant 0 : index
    %c0_33 = arith.constant 0 : index
    %81 = vector.load %arg9[%c0_32, %c0_33] : memref<1x32xf32, #tpu.memory_space<vmem>>, vector<1x32xf32>
    %82 = vector.extract_strided_slice %80 {offsets = [0, 0], sizes = [32, 32], strides = [1, 1]} : vector<64x32xf32> to vector<32x32xf32>
    %cst_34 = arith.constant dense<0.000000e+00> : vector<8x32xf32>
    %83 = tpu.matmul %79, %82, %cst_34 {dimension_numbers = #tpu.dot_dimension_numbers<[1], [0], [0], [1], [0, 0, 1, 1], [], []>} : vector<8x32xf32>, vector<32x32xf32>, vector<8x32xf32> -> vector<8x32xf32>
    %84 = vector.broadcast %81 : vector<1x32xf32> to vector<8x32xf32>
    %85 = arith.addf %83, %84 : vector<8x32xf32>
    %86 = vector.extract_strided_slice %80 {offsets = [32, 0], sizes = [32, 32], strides = [1, 1]} : vector<64x32xf32> to vector<32x32xf32>
    %cst_35 = arith.constant dense<0.000000e+00> : vector<8x32xf32>
    %87 = tpu.matmul %79, %86, %cst_35 {dimension_numbers = #tpu.dot_dimension_numbers<[1], [0], [0], [1], [0, 0, 1, 1], [], []>} : vector<8x32xf32>, vector<32x32xf32>, vector<8x32xf32> -> vector<8x32xf32>
    %88 = vector.broadcast %81 : vector<1x32xf32> to vector<8x32xf32>
    %89 = arith.addf %87, %88 : vector<8x32xf32>
    %90 = tpu.concatenate %85, %89 in 0 : vector<8x32xf32>, vector<8x32xf32> -> vector<16x32xf32>
    %91 = vector.extract_strided_slice %90 {offsets = [8, 0], sizes = [8, 32], strides = [1, 1]} : vector<16x32xf32> to vector<8x32xf32>
    %c1_i32_36 = arith.constant 1 : i32
    %92 = tpu.dynamic_rotate %91 by %c1_i32_36 dim 0 : vector<8x32xf32>, i32 -> vector<8x32xf32>
    %c1_i32_37 = arith.constant 1 : i32
    %93 = vector.broadcast %c1_i32_37 : i32 to vector<8x1xi32>
    %94 = arith.cmpi sge, %0, %93 : vector<8x1xi32>
    %cst_38 = arith.constant 0.000000e+00 : f32
    %95 = vector.shape_cast %94 : vector<8x1xi1> to vector<8x1xi1>
    %96 = vector.broadcast %95 : vector<8x1xi1> to vector<8x32xi1>
    %97 = vector.broadcast %cst_38 : f32 to vector<8x32xf32>
    %98 = arith.select %96, %92, %97 : vector<8x32xi1>, vector<8x32xf32>
    %99 = vector.extract_strided_slice %90 {offsets = [0, 0], sizes = [8, 32], strides = [1, 1]} : vector<16x32xf32> to vector<8x32xf32>
    %100 = tpu.concatenate %98, %99 in 0 : vector<8x32xf32>, vector<8x32xf32> -> vector<16x32xf32>
    %101 = vector.extract_strided_slice %90 {offsets = [8, 0], sizes = [8, 32], strides = [1, 1]} : vector<16x32xf32> to vector<8x32xf32>
    %102 = vector.extract_strided_slice %90 {offsets = [0, 0], sizes = [8, 32], strides = [1, 1]} : vector<16x32xf32> to vector<8x32xf32>
    %c7_i32_39 = arith.constant 7 : i32
    %103 = tpu.dynamic_rotate %102 by %c7_i32_39 dim 0 : vector<8x32xf32>, i32 -> vector<8x32xf32>
    %c7_i32_40 = arith.constant 7 : i32
    %104 = vector.broadcast %c7_i32_40 : i32 to vector<8x1xi32>
    %105 = arith.cmpi slt, %0, %104 : vector<8x1xi32>
    %cst_41 = arith.constant 0.000000e+00 : f32
    %106 = vector.shape_cast %105 : vector<8x1xi1> to vector<8x1xi1>
    %107 = vector.broadcast %106 : vector<8x1xi1> to vector<8x32xi1>
    %108 = vector.broadcast %cst_41 : f32 to vector<8x32xf32>
    %109 = arith.select %107, %103, %108 : vector<8x32xi1>, vector<8x32xf32>
    %110 = tpu.concatenate %101, %109 in 0 : vector<8x32xf32>, vector<8x32xf32> -> vector<16x32xf32>
    %c0_42 = arith.constant 0 : index
    %c0_43 = arith.constant 0 : index
    %111 = vector.load %arg10[%c0_42, %c0_43] : memref<96x64xf32, #tpu.memory_space<vmem>>, vector<96x64xf32>
    %112 = vector.extract_strided_slice %111 {offsets = [0, 0], sizes = [32, 64], strides = [1, 1]} : vector<96x64xf32> to vector<32x64xf32>
    %cst_44 = arith.constant dense<0.000000e+00> : vector<16x64xf32>
    %113 = tpu.matmul %100, %112, %cst_44 {dimension_numbers = #tpu.dot_dimension_numbers<[1], [0], [0], [1], [0, 0, 1, 1], [], []>} : vector<16x32xf32>, vector<32x64xf32>, vector<16x64xf32> -> vector<16x64xf32>
    %114 = vector.extract_strided_slice %111 {offsets = [32, 0], sizes = [32, 64], strides = [1, 1]} : vector<96x64xf32> to vector<32x64xf32>
    %cst_45 = arith.constant dense<0.000000e+00> : vector<16x64xf32>
    %115 = tpu.matmul %90, %114, %cst_45 {dimension_numbers = #tpu.dot_dimension_numbers<[1], [0], [0], [1], [0, 0, 1, 1], [], []>} : vector<16x32xf32>, vector<32x64xf32>, vector<16x64xf32> -> vector<16x64xf32>
    %116 = arith.addf %113, %115 : vector<16x64xf32>
    %117 = vector.extract_strided_slice %111 {offsets = [64, 0], sizes = [32, 64], strides = [1, 1]} : vector<96x64xf32> to vector<32x64xf32>
    %cst_46 = arith.constant dense<0.000000e+00> : vector<16x64xf32>
    %118 = tpu.matmul %110, %117, %cst_46 {dimension_numbers = #tpu.dot_dimension_numbers<[1], [0], [0], [1], [0, 0, 1, 1], [], []>} : vector<16x32xf32>, vector<32x64xf32>, vector<16x64xf32> -> vector<16x64xf32>
    %119 = arith.addf %116, %118 : vector<16x64xf32>
    %c0_47 = arith.constant 0 : index
    %c0_48 = arith.constant 0 : index
    %120 = vector.load %arg11[%c0_47, %c0_48] : memref<1x64xf32, #tpu.memory_space<vmem>>, vector<1x64xf32>
    %121 = vector.broadcast %120 : vector<1x64xf32> to vector<16x64xf32>
    %122 = arith.addf %119, %121 : vector<16x64xf32>
    %123 = vector.extract_strided_slice %122 {offsets = [0, 0], sizes = [16, 32], strides = [1, 1]} : vector<16x64xf32> to vector<16x32xf32>
    %124 = vector.extract_strided_slice %122 {offsets = [0, 32], sizes = [16, 32], strides = [1, 1]} : vector<16x64xf32> to vector<16x32xf32>
    %125 = arith.negf %124 : vector<16x32xf32>
    %126 = math.exp %125 : vector<16x32xf32>
    %cst_49 = arith.constant 1.000000e+00 : f32
    %127 = vector.broadcast %cst_49 : f32 to vector<16x32xf32>
    %128 = arith.addf %127, %126 : vector<16x32xf32>
    %129 = arith.divf %127, %128 : vector<16x32xf32>
    %130 = arith.subf %123, %90 : vector<16x32xf32>
    %131 = arith.mulf %129, %130 : vector<16x32xf32>
    %132 = arith.addf %90, %131 : vector<16x32xf32>
    %133 = vector.extract_strided_slice %132 {offsets = [8, 0], sizes = [8, 32], strides = [1, 1]} : vector<16x32xf32> to vector<8x32xf32>
    %c2_i32 = arith.constant 2 : i32
    %134 = tpu.dynamic_rotate %133 by %c2_i32 dim 0 : vector<8x32xf32>, i32 -> vector<8x32xf32>
    %c2_i32_50 = arith.constant 2 : i32
    %135 = vector.broadcast %c2_i32_50 : i32 to vector<8x1xi32>
    %136 = arith.cmpi sge, %0, %135 : vector<8x1xi32>
    %cst_51 = arith.constant 0.000000e+00 : f32
    %137 = vector.shape_cast %136 : vector<8x1xi1> to vector<8x1xi1>
    %138 = vector.broadcast %137 : vector<8x1xi1> to vector<8x32xi1>
    %139 = vector.broadcast %cst_51 : f32 to vector<8x32xf32>
    %140 = arith.select %138, %134, %139 : vector<8x32xi1>, vector<8x32xf32>
    %141 = vector.extract_strided_slice %132 {offsets = [0, 0], sizes = [8, 32], strides = [1, 1]} : vector<16x32xf32> to vector<8x32xf32>
    %c1_i32_52 = arith.constant 1 : i32
    %142 = tpu.dynamic_rotate %141 by %c1_i32_52 dim 0 : vector<8x32xf32>, i32 -> vector<8x32xf32>
    %c1_i32_53 = arith.constant 1 : i32
    %143 = vector.broadcast %c1_i32_53 : i32 to vector<8x1xi32>
    %144 = arith.cmpi sge, %0, %143 : vector<8x1xi32>
    %cst_54 = arith.constant 0.000000e+00 : f32
    %145 = vector.shape_cast %144 : vector<8x1xi1> to vector<8x1xi1>
    %146 = vector.broadcast %145 : vector<8x1xi1> to vector<8x32xi1>
    %147 = vector.broadcast %cst_54 : f32 to vector<8x32xf32>
    %148 = arith.select %146, %142, %147 : vector<8x32xi1>, vector<8x32xf32>
    %149 = tpu.concatenate %140, %148 in 0 : vector<8x32xf32>, vector<8x32xf32> -> vector<16x32xf32>
    %150 = vector.extract_strided_slice %132 {offsets = [8, 0], sizes = [8, 32], strides = [1, 1]} : vector<16x32xf32> to vector<8x32xf32>
    %c7_i32_55 = arith.constant 7 : i32
    %151 = tpu.dynamic_rotate %150 by %c7_i32_55 dim 0 : vector<8x32xf32>, i32 -> vector<8x32xf32>
    %c7_i32_56 = arith.constant 7 : i32
    %152 = vector.broadcast %c7_i32_56 : i32 to vector<8x1xi32>
    %153 = arith.cmpi slt, %0, %152 : vector<8x1xi32>
    %cst_57 = arith.constant 0.000000e+00 : f32
    %154 = vector.shape_cast %153 : vector<8x1xi1> to vector<8x1xi1>
    %155 = vector.broadcast %154 : vector<8x1xi1> to vector<8x32xi1>
    %156 = vector.broadcast %cst_57 : f32 to vector<8x32xf32>
    %157 = arith.select %155, %151, %156 : vector<8x32xi1>, vector<8x32xf32>
    %158 = vector.extract_strided_slice %132 {offsets = [0, 0], sizes = [8, 32], strides = [1, 1]} : vector<16x32xf32> to vector<8x32xf32>
    %c6_i32 = arith.constant 6 : i32
    %159 = tpu.dynamic_rotate %158 by %c6_i32 dim 0 : vector<8x32xf32>, i32 -> vector<8x32xf32>
    %c6_i32_58 = arith.constant 6 : i32
    %160 = vector.broadcast %c6_i32_58 : i32 to vector<8x1xi32>
    %161 = arith.cmpi slt, %0, %160 : vector<8x1xi32>
    %cst_59 = arith.constant 0.000000e+00 : f32
    %162 = vector.shape_cast %161 : vector<8x1xi1> to vector<8x1xi1>
    %163 = vector.broadcast %162 : vector<8x1xi1> to vector<8x32xi1>
    %164 = vector.broadcast %cst_59 : f32 to vector<8x32xf32>
    %165 = arith.select %163, %159, %164 : vector<8x32xi1>, vector<8x32xf32>
    %166 = tpu.concatenate %157, %165 in 0 : vector<8x32xf32>, vector<8x32xf32> -> vector<16x32xf32>
    %c0_60 = arith.constant 0 : index
    %c0_61 = arith.constant 0 : index
    %167 = vector.load %arg12[%c0_60, %c0_61] : memref<96x64xf32, #tpu.memory_space<vmem>>, vector<96x64xf32>
    %168 = vector.extract_strided_slice %167 {offsets = [0, 0], sizes = [32, 64], strides = [1, 1]} : vector<96x64xf32> to vector<32x64xf32>
    %cst_62 = arith.constant dense<0.000000e+00> : vector<16x64xf32>
    %169 = tpu.matmul %149, %168, %cst_62 {dimension_numbers = #tpu.dot_dimension_numbers<[1], [0], [0], [1], [0, 0, 1, 1], [], []>} : vector<16x32xf32>, vector<32x64xf32>, vector<16x64xf32> -> vector<16x64xf32>
    %170 = vector.extract_strided_slice %167 {offsets = [32, 0], sizes = [32, 64], strides = [1, 1]} : vector<96x64xf32> to vector<32x64xf32>
    %cst_63 = arith.constant dense<0.000000e+00> : vector<16x64xf32>
    %171 = tpu.matmul %132, %170, %cst_63 {dimension_numbers = #tpu.dot_dimension_numbers<[1], [0], [0], [1], [0, 0, 1, 1], [], []>} : vector<16x32xf32>, vector<32x64xf32>, vector<16x64xf32> -> vector<16x64xf32>
    %172 = arith.addf %169, %171 : vector<16x64xf32>
    %173 = vector.extract_strided_slice %167 {offsets = [64, 0], sizes = [32, 64], strides = [1, 1]} : vector<96x64xf32> to vector<32x64xf32>
    %cst_64 = arith.constant dense<0.000000e+00> : vector<16x64xf32>
    %174 = tpu.matmul %166, %173, %cst_64 {dimension_numbers = #tpu.dot_dimension_numbers<[1], [0], [0], [1], [0, 0, 1, 1], [], []>} : vector<16x32xf32>, vector<32x64xf32>, vector<16x64xf32> -> vector<16x64xf32>
    %175 = arith.addf %172, %174 : vector<16x64xf32>
    %c0_65 = arith.constant 0 : index
    %c0_66 = arith.constant 0 : index
    %176 = vector.load %arg13[%c0_65, %c0_66] : memref<1x64xf32, #tpu.memory_space<vmem>>, vector<1x64xf32>
    %177 = vector.broadcast %176 : vector<1x64xf32> to vector<16x64xf32>
    %178 = arith.addf %175, %177 : vector<16x64xf32>
    %179 = vector.extract_strided_slice %178 {offsets = [0, 0], sizes = [16, 32], strides = [1, 1]} : vector<16x64xf32> to vector<16x32xf32>
    %180 = vector.extract_strided_slice %178 {offsets = [0, 32], sizes = [16, 32], strides = [1, 1]} : vector<16x64xf32> to vector<16x32xf32>
    %181 = arith.negf %180 : vector<16x32xf32>
    %182 = math.exp %181 : vector<16x32xf32>
    %cst_67 = arith.constant 1.000000e+00 : f32
    %183 = vector.broadcast %cst_67 : f32 to vector<16x32xf32>
    %184 = arith.addf %183, %182 : vector<16x32xf32>
    %185 = arith.divf %183, %184 : vector<16x32xf32>
    %186 = arith.subf %179, %132 : vector<16x32xf32>
    %187 = arith.mulf %185, %186 : vector<16x32xf32>
    %188 = arith.addf %132, %187 : vector<16x32xf32>
    %c0_68 = arith.constant 0 : index
    %c0_69 = arith.constant 0 : index
    %189 = vector.load %arg14[%c0_68, %c0_69] : memref<64x32xf32, #tpu.memory_space<vmem>>, vector<64x32xf32>
    %c0_70 = arith.constant 0 : index
    %c0_71 = arith.constant 0 : index
    %190 = vector.load %arg15[%c0_70, %c0_71] : memref<1x32xf32, #tpu.memory_space<vmem>>, vector<1x32xf32>
    %191 = vector.extract_strided_slice %189 {offsets = [0, 0], sizes = [32, 32], strides = [1, 1]} : vector<64x32xf32> to vector<32x32xf32>
    %cst_72 = arith.constant dense<0.000000e+00> : vector<16x32xf32>
    %192 = tpu.matmul %188, %191, %cst_72 {dimension_numbers = #tpu.dot_dimension_numbers<[1], [0], [0], [1], [0, 0, 1, 1], [], []>} : vector<16x32xf32>, vector<32x32xf32>, vector<16x32xf32> -> vector<16x32xf32>
    %193 = vector.broadcast %190 : vector<1x32xf32> to vector<16x32xf32>
    %194 = arith.addf %192, %193 : vector<16x32xf32>
    %195 = vector.extract_strided_slice %189 {offsets = [32, 0], sizes = [32, 32], strides = [1, 1]} : vector<64x32xf32> to vector<32x32xf32>
    %cst_73 = arith.constant dense<0.000000e+00> : vector<16x32xf32>
    %196 = tpu.matmul %188, %195, %cst_73 {dimension_numbers = #tpu.dot_dimension_numbers<[1], [0], [0], [1], [0, 0, 1, 1], [], []>} : vector<16x32xf32>, vector<32x32xf32>, vector<16x32xf32> -> vector<16x32xf32>
    %197 = vector.broadcast %190 : vector<1x32xf32> to vector<16x32xf32>
    %198 = arith.addf %196, %197 : vector<16x32xf32>
    %199 = vector.extract_strided_slice %194 {offsets = [0, 0], sizes = [8, 32], strides = [1, 1]} : vector<16x32xf32> to vector<8x32xf32>
    %200 = vector.extract_strided_slice %198 {offsets = [0, 0], sizes = [8, 32], strides = [1, 1]} : vector<16x32xf32> to vector<8x32xf32>
    %201 = vector.extract_strided_slice %194 {offsets = [8, 0], sizes = [8, 32], strides = [1, 1]} : vector<16x32xf32> to vector<8x32xf32>
    %202 = vector.extract_strided_slice %198 {offsets = [8, 0], sizes = [8, 32], strides = [1, 1]} : vector<16x32xf32> to vector<8x32xf32>
    %203 = tpu.concatenate %199, %200, %201, %202 in 0 : vector<8x32xf32>, vector<8x32xf32>, vector<8x32xf32>, vector<8x32xf32> -> vector<32x32xf32>
    %204 = vector.extract_strided_slice %203 {offsets = [24, 0], sizes = [8, 32], strides = [1, 1]} : vector<32x32xf32> to vector<8x32xf32>
    %c1_i32_74 = arith.constant 1 : i32
    %205 = tpu.dynamic_rotate %204 by %c1_i32_74 dim 0 : vector<8x32xf32>, i32 -> vector<8x32xf32>
    %c1_i32_75 = arith.constant 1 : i32
    %206 = vector.broadcast %c1_i32_75 : i32 to vector<8x1xi32>
    %207 = arith.cmpi sge, %0, %206 : vector<8x1xi32>
    %cst_76 = arith.constant 0.000000e+00 : f32
    %208 = vector.shape_cast %207 : vector<8x1xi1> to vector<8x1xi1>
    %209 = vector.broadcast %208 : vector<8x1xi1> to vector<8x32xi1>
    %210 = vector.broadcast %cst_76 : f32 to vector<8x32xf32>
    %211 = arith.select %209, %205, %210 : vector<8x32xi1>, vector<8x32xf32>
    %212 = vector.extract_strided_slice %203 {offsets = [0, 0], sizes = [8, 32], strides = [1, 1]} : vector<32x32xf32> to vector<8x32xf32>
    %213 = vector.extract_strided_slice %203 {offsets = [8, 0], sizes = [8, 32], strides = [1, 1]} : vector<32x32xf32> to vector<8x32xf32>
    %214 = vector.extract_strided_slice %203 {offsets = [16, 0], sizes = [8, 32], strides = [1, 1]} : vector<32x32xf32> to vector<8x32xf32>
    %215 = tpu.concatenate %211, %212, %213, %214 in 0 : vector<8x32xf32>, vector<8x32xf32>, vector<8x32xf32>, vector<8x32xf32> -> vector<32x32xf32>
    %216 = vector.extract_strided_slice %203 {offsets = [8, 0], sizes = [8, 32], strides = [1, 1]} : vector<32x32xf32> to vector<8x32xf32>
    %217 = vector.extract_strided_slice %203 {offsets = [16, 0], sizes = [8, 32], strides = [1, 1]} : vector<32x32xf32> to vector<8x32xf32>
    %218 = vector.extract_strided_slice %203 {offsets = [24, 0], sizes = [8, 32], strides = [1, 1]} : vector<32x32xf32> to vector<8x32xf32>
    %219 = vector.extract_strided_slice %203 {offsets = [0, 0], sizes = [8, 32], strides = [1, 1]} : vector<32x32xf32> to vector<8x32xf32>
    %c7_i32_77 = arith.constant 7 : i32
    %220 = tpu.dynamic_rotate %219 by %c7_i32_77 dim 0 : vector<8x32xf32>, i32 -> vector<8x32xf32>
    %c7_i32_78 = arith.constant 7 : i32
    %221 = vector.broadcast %c7_i32_78 : i32 to vector<8x1xi32>
    %222 = arith.cmpi slt, %0, %221 : vector<8x1xi32>
    %cst_79 = arith.constant 0.000000e+00 : f32
    %223 = vector.shape_cast %222 : vector<8x1xi1> to vector<8x1xi1>
    %224 = vector.broadcast %223 : vector<8x1xi1> to vector<8x32xi1>
    %225 = vector.broadcast %cst_79 : f32 to vector<8x32xf32>
    %226 = arith.select %224, %220, %225 : vector<8x32xi1>, vector<8x32xf32>
    %227 = tpu.concatenate %216, %217, %218, %226 in 0 : vector<8x32xf32>, vector<8x32xf32>, vector<8x32xf32>, vector<8x32xf32> -> vector<32x32xf32>
    %c0_80 = arith.constant 0 : index
    %c0_81 = arith.constant 0 : index
    %228 = vector.load %arg16[%c0_80, %c0_81] : memref<96x64xf32, #tpu.memory_space<vmem>>, vector<96x64xf32>
    %229 = vector.extract_strided_slice %228 {offsets = [0, 0], sizes = [32, 64], strides = [1, 1]} : vector<96x64xf32> to vector<32x64xf32>
    %cst_82 = arith.constant dense<0.000000e+00> : vector<32x64xf32>
    %230 = tpu.matmul %215, %229, %cst_82 {dimension_numbers = #tpu.dot_dimension_numbers<[1], [0], [0], [1], [0, 0, 1, 1], [], []>} : vector<32x32xf32>, vector<32x64xf32>, vector<32x64xf32> -> vector<32x64xf32>
    %231 = vector.extract_strided_slice %228 {offsets = [32, 0], sizes = [32, 64], strides = [1, 1]} : vector<96x64xf32> to vector<32x64xf32>
    %cst_83 = arith.constant dense<0.000000e+00> : vector<32x64xf32>
    %232 = tpu.matmul %203, %231, %cst_83 {dimension_numbers = #tpu.dot_dimension_numbers<[1], [0], [0], [1], [0, 0, 1, 1], [], []>} : vector<32x32xf32>, vector<32x64xf32>, vector<32x64xf32> -> vector<32x64xf32>
    %233 = arith.addf %230, %232 : vector<32x64xf32>
    %234 = vector.extract_strided_slice %228 {offsets = [64, 0], sizes = [32, 64], strides = [1, 1]} : vector<96x64xf32> to vector<32x64xf32>
    %cst_84 = arith.constant dense<0.000000e+00> : vector<32x64xf32>
    %235 = tpu.matmul %227, %234, %cst_84 {dimension_numbers = #tpu.dot_dimension_numbers<[1], [0], [0], [1], [0, 0, 1, 1], [], []>} : vector<32x32xf32>, vector<32x64xf32>, vector<32x64xf32> -> vector<32x64xf32>
    %236 = arith.addf %233, %235 : vector<32x64xf32>
    %c0_85 = arith.constant 0 : index
    %c0_86 = arith.constant 0 : index
    %237 = vector.load %arg17[%c0_85, %c0_86] : memref<1x64xf32, #tpu.memory_space<vmem>>, vector<1x64xf32>
    %238 = vector.broadcast %237 : vector<1x64xf32> to vector<32x64xf32>
    %239 = arith.addf %236, %238 : vector<32x64xf32>
    %240 = vector.extract_strided_slice %239 {offsets = [0, 0], sizes = [32, 32], strides = [1, 1]} : vector<32x64xf32> to vector<32x32xf32>
    %241 = vector.extract_strided_slice %239 {offsets = [0, 32], sizes = [32, 32], strides = [1, 1]} : vector<32x64xf32> to vector<32x32xf32>
    %242 = arith.negf %241 : vector<32x32xf32>
    %243 = math.exp %242 : vector<32x32xf32>
    %cst_87 = arith.constant 1.000000e+00 : f32
    %244 = vector.broadcast %cst_87 : f32 to vector<32x32xf32>
    %245 = arith.addf %244, %243 : vector<32x32xf32>
    %246 = arith.divf %244, %245 : vector<32x32xf32>
    %247 = arith.subf %240, %203 : vector<32x32xf32>
    %248 = arith.mulf %246, %247 : vector<32x32xf32>
    %249 = arith.addf %203, %248 : vector<32x32xf32>
    %250 = vector.extract_strided_slice %249 {offsets = [8, 0], sizes = [8, 32], strides = [1, 1]} : vector<32x32xf32> to vector<8x32xf32>
    %c1_i32_88 = arith.constant 1 : i32
    %251 = tpu.dynamic_rotate %250 by %c1_i32_88 dim 0 : vector<8x32xf32>, i32 -> vector<8x32xf32>
    %c1_i32_89 = arith.constant 1 : i32
    %252 = vector.broadcast %c1_i32_89 : i32 to vector<8x1xi32>
    %253 = arith.cmpi sge, %0, %252 : vector<8x1xi32>
    %cst_90 = arith.constant 0.000000e+00 : f32
    %254 = vector.shape_cast %253 : vector<8x1xi1> to vector<8x1xi1>
    %255 = vector.broadcast %254 : vector<8x1xi1> to vector<8x32xi1>
    %256 = vector.broadcast %cst_90 : f32 to vector<8x32xf32>
    %257 = arith.select %255, %251, %256 : vector<8x32xi1>, vector<8x32xf32>
    %258 = vector.extract_strided_slice %249 {offsets = [16, 0], sizes = [8, 32], strides = [1, 1]} : vector<32x32xf32> to vector<8x32xf32>
    %c1_i32_91 = arith.constant 1 : i32
    %259 = tpu.dynamic_rotate %258 by %c1_i32_91 dim 0 : vector<8x32xf32>, i32 -> vector<8x32xf32>
    %c1_i32_92 = arith.constant 1 : i32
    %260 = vector.broadcast %c1_i32_92 : i32 to vector<8x1xi32>
    %261 = arith.cmpi sge, %0, %260 : vector<8x1xi32>
    %cst_93 = arith.constant 0.000000e+00 : f32
    %262 = vector.shape_cast %261 : vector<8x1xi1> to vector<8x1xi1>
    %263 = vector.broadcast %262 : vector<8x1xi1> to vector<8x32xi1>
    %264 = vector.broadcast %cst_93 : f32 to vector<8x32xf32>
    %265 = arith.select %263, %259, %264 : vector<8x32xi1>, vector<8x32xf32>
    %266 = vector.extract_strided_slice %249 {offsets = [24, 0], sizes = [8, 32], strides = [1, 1]} : vector<32x32xf32> to vector<8x32xf32>
    %c1_i32_94 = arith.constant 1 : i32
    %267 = tpu.dynamic_rotate %266 by %c1_i32_94 dim 0 : vector<8x32xf32>, i32 -> vector<8x32xf32>
    %c1_i32_95 = arith.constant 1 : i32
    %268 = vector.broadcast %c1_i32_95 : i32 to vector<8x1xi32>
    %269 = arith.cmpi sge, %0, %268 : vector<8x1xi32>
    %cst_96 = arith.constant 0.000000e+00 : f32
    %270 = vector.shape_cast %269 : vector<8x1xi1> to vector<8x1xi1>
    %271 = vector.broadcast %270 : vector<8x1xi1> to vector<8x32xi1>
    %272 = vector.broadcast %cst_96 : f32 to vector<8x32xf32>
    %273 = arith.select %271, %267, %272 : vector<8x32xi1>, vector<8x32xf32>
    %274 = vector.extract_strided_slice %249 {offsets = [0, 0], sizes = [8, 32], strides = [1, 1]} : vector<32x32xf32> to vector<8x32xf32>
    %275 = tpu.concatenate %257, %265, %273, %274 in 0 : vector<8x32xf32>, vector<8x32xf32>, vector<8x32xf32>, vector<8x32xf32> -> vector<32x32xf32>
    %276 = vector.extract_strided_slice %249 {offsets = [24, 0], sizes = [8, 32], strides = [1, 1]} : vector<32x32xf32> to vector<8x32xf32>
    %277 = vector.extract_strided_slice %249 {offsets = [0, 0], sizes = [8, 32], strides = [1, 1]} : vector<32x32xf32> to vector<8x32xf32>
    %c7_i32_97 = arith.constant 7 : i32
    %278 = tpu.dynamic_rotate %277 by %c7_i32_97 dim 0 : vector<8x32xf32>, i32 -> vector<8x32xf32>
    %c7_i32_98 = arith.constant 7 : i32
    %279 = vector.broadcast %c7_i32_98 : i32 to vector<8x1xi32>
    %280 = arith.cmpi slt, %0, %279 : vector<8x1xi32>
    %cst_99 = arith.constant 0.000000e+00 : f32
    %281 = vector.shape_cast %280 : vector<8x1xi1> to vector<8x1xi1>
    %282 = vector.broadcast %281 : vector<8x1xi1> to vector<8x32xi1>
    %283 = vector.broadcast %cst_99 : f32 to vector<8x32xf32>
    %284 = arith.select %282, %278, %283 : vector<8x32xi1>, vector<8x32xf32>
    %285 = vector.extract_strided_slice %249 {offsets = [8, 0], sizes = [8, 32], strides = [1, 1]} : vector<32x32xf32> to vector<8x32xf32>
    %c7_i32_100 = arith.constant 7 : i32
    %286 = tpu.dynamic_rotate %285 by %c7_i32_100 dim 0 : vector<8x32xf32>, i32 -> vector<8x32xf32>
    %c7_i32_101 = arith.constant 7 : i32
    %287 = vector.broadcast %c7_i32_101 : i32 to vector<8x1xi32>
    %288 = arith.cmpi slt, %0, %287 : vector<8x1xi32>
    %cst_102 = arith.constant 0.000000e+00 : f32
    %289 = vector.shape_cast %288 : vector<8x1xi1> to vector<8x1xi1>
    %290 = vector.broadcast %289 : vector<8x1xi1> to vector<8x32xi1>
    %291 = vector.broadcast %cst_102 : f32 to vector<8x32xf32>
    %292 = arith.select %290, %286, %291 : vector<8x32xi1>, vector<8x32xf32>
    %293 = vector.extract_strided_slice %249 {offsets = [16, 0], sizes = [8, 32], strides = [1, 1]} : vector<32x32xf32> to vector<8x32xf32>
    %c7_i32_103 = arith.constant 7 : i32
    %294 = tpu.dynamic_rotate %293 by %c7_i32_103 dim 0 : vector<8x32xf32>, i32 -> vector<8x32xf32>
    %c7_i32_104 = arith.constant 7 : i32
    %295 = vector.broadcast %c7_i32_104 : i32 to vector<8x1xi32>
    %296 = arith.cmpi slt, %0, %295 : vector<8x1xi32>
    %cst_105 = arith.constant 0.000000e+00 : f32
    %297 = vector.shape_cast %296 : vector<8x1xi1> to vector<8x1xi1>
    %298 = vector.broadcast %297 : vector<8x1xi1> to vector<8x32xi1>
    %299 = vector.broadcast %cst_105 : f32 to vector<8x32xf32>
    %300 = arith.select %298, %294, %299 : vector<8x32xi1>, vector<8x32xf32>
    %301 = tpu.concatenate %276, %284, %292, %300 in 0 : vector<8x32xf32>, vector<8x32xf32>, vector<8x32xf32>, vector<8x32xf32> -> vector<32x32xf32>
    %c0_106 = arith.constant 0 : index
    %c0_107 = arith.constant 0 : index
    %302 = vector.load %arg18[%c0_106, %c0_107] : memref<96x64xf32, #tpu.memory_space<vmem>>, vector<96x64xf32>
    %303 = vector.extract_strided_slice %302 {offsets = [0, 0], sizes = [32, 64], strides = [1, 1]} : vector<96x64xf32> to vector<32x64xf32>
    %cst_108 = arith.constant dense<0.000000e+00> : vector<32x64xf32>
    %304 = tpu.matmul %275, %303, %cst_108 {dimension_numbers = #tpu.dot_dimension_numbers<[1], [0], [0], [1], [0, 0, 1, 1], [], []>} : vector<32x32xf32>, vector<32x64xf32>, vector<32x64xf32> -> vector<32x64xf32>
    %305 = vector.extract_strided_slice %302 {offsets = [32, 0], sizes = [32, 64], strides = [1, 1]} : vector<96x64xf32> to vector<32x64xf32>
    %cst_109 = arith.constant dense<0.000000e+00> : vector<32x64xf32>
    %306 = tpu.matmul %249, %305, %cst_109 {dimension_numbers = #tpu.dot_dimension_numbers<[1], [0], [0], [1], [0, 0, 1, 1], [], []>} : vector<32x32xf32>, vector<32x64xf32>, vector<32x64xf32> -> vector<32x64xf32>
    %307 = arith.addf %304, %306 : vector<32x64xf32>
    %308 = vector.extract_strided_slice %302 {offsets = [64, 0], sizes = [32, 64], strides = [1, 1]} : vector<96x64xf32> to vector<32x64xf32>
    %cst_110 = arith.constant dense<0.000000e+00> : vector<32x64xf32>
    %309 = tpu.matmul %301, %308, %cst_110 {dimension_numbers = #tpu.dot_dimension_numbers<[1], [0], [0], [1], [0, 0, 1, 1], [], []>} : vector<32x32xf32>, vector<32x64xf32>, vector<32x64xf32> -> vector<32x64xf32>
    %310 = arith.addf %307, %309 : vector<32x64xf32>
    %c0_111 = arith.constant 0 : index
    %c0_112 = arith.constant 0 : index
    %311 = vector.load %arg19[%c0_111, %c0_112] : memref<1x64xf32, #tpu.memory_space<vmem>>, vector<1x64xf32>
    %312 = vector.broadcast %311 : vector<1x64xf32> to vector<32x64xf32>
    %313 = arith.addf %310, %312 : vector<32x64xf32>
    %314 = vector.extract_strided_slice %313 {offsets = [0, 0], sizes = [32, 32], strides = [1, 1]} : vector<32x64xf32> to vector<32x32xf32>
    %315 = vector.extract_strided_slice %313 {offsets = [0, 32], sizes = [32, 32], strides = [1, 1]} : vector<32x64xf32> to vector<32x32xf32>
    %316 = arith.negf %315 : vector<32x32xf32>
    %317 = math.exp %316 : vector<32x32xf32>
    %cst_113 = arith.constant 1.000000e+00 : f32
    %318 = vector.broadcast %cst_113 : f32 to vector<32x32xf32>
    %319 = arith.addf %318, %317 : vector<32x32xf32>
    %320 = arith.divf %318, %319 : vector<32x32xf32>
    %321 = arith.subf %314, %249 : vector<32x32xf32>
    %322 = arith.mulf %320, %321 : vector<32x32xf32>
    %323 = arith.addf %249, %322 : vector<32x32xf32>
    %c0_114 = arith.constant 0 : index
    %c0_115 = arith.constant 0 : index
    %324 = vector.load %arg20[%c0_114, %c0_115] : memref<32x64xf32, #tpu.memory_space<vmem>>, vector<32x64xf32>
    %cst_116 = arith.constant dense<0.000000e+00> : vector<32x64xf32>
    %325 = tpu.matmul %323, %324, %cst_116 {dimension_numbers = #tpu.dot_dimension_numbers<[1], [0], [0], [1], [0, 0, 1, 1], [], []>} : vector<32x32xf32>, vector<32x64xf32>, vector<32x64xf32> -> vector<32x64xf32>
    %c0_117 = arith.constant 0 : index
    %c0_118 = arith.constant 0 : index
    %326 = vector.load %arg21[%c0_117, %c0_118] : memref<1x64xf32, #tpu.memory_space<vmem>>, vector<1x64xf32>
    %327 = vector.broadcast %326 : vector<1x64xf32> to vector<32x64xf32>
    %328 = arith.addf %325, %327 : vector<32x64xf32>
    %329 = vector.extract_strided_slice %328 {offsets = [24, 0], sizes = [8, 64], strides = [1, 1]} : vector<32x64xf32> to vector<8x64xf32>
    %c1_i32_119 = arith.constant 1 : i32
    %330 = tpu.dynamic_rotate %329 by %c1_i32_119 dim 0 : vector<8x64xf32>, i32 -> vector<8x64xf32>
    %c1_i32_120 = arith.constant 1 : i32
    %331 = vector.broadcast %c1_i32_120 : i32 to vector<8x1xi32>
    %332 = arith.cmpi sge, %0, %331 : vector<8x1xi32>
    %cst_121 = arith.constant 0.000000e+00 : f32
    %333 = vector.shape_cast %332 : vector<8x1xi1> to vector<8x1xi1>
    %334 = vector.broadcast %333 : vector<8x1xi1> to vector<8x64xi1>
    %335 = vector.broadcast %cst_121 : f32 to vector<8x64xf32>
    %336 = arith.select %334, %330, %335 : vector<8x64xi1>, vector<8x64xf32>
    %337 = vector.extract_strided_slice %328 {offsets = [0, 0], sizes = [8, 64], strides = [1, 1]} : vector<32x64xf32> to vector<8x64xf32>
    %338 = vector.extract_strided_slice %328 {offsets = [8, 0], sizes = [8, 64], strides = [1, 1]} : vector<32x64xf32> to vector<8x64xf32>
    %339 = vector.extract_strided_slice %328 {offsets = [16, 0], sizes = [8, 64], strides = [1, 1]} : vector<32x64xf32> to vector<8x64xf32>
    %340 = tpu.concatenate %336, %337, %338, %339 in 0 : vector<8x64xf32>, vector<8x64xf32>, vector<8x64xf32>, vector<8x64xf32> -> vector<32x64xf32>
    %341 = vector.extract_strided_slice %328 {offsets = [8, 0], sizes = [8, 64], strides = [1, 1]} : vector<32x64xf32> to vector<8x64xf32>
    %342 = vector.extract_strided_slice %328 {offsets = [16, 0], sizes = [8, 64], strides = [1, 1]} : vector<32x64xf32> to vector<8x64xf32>
    %343 = vector.extract_strided_slice %328 {offsets = [24, 0], sizes = [8, 64], strides = [1, 1]} : vector<32x64xf32> to vector<8x64xf32>
    %344 = vector.extract_strided_slice %328 {offsets = [0, 0], sizes = [8, 64], strides = [1, 1]} : vector<32x64xf32> to vector<8x64xf32>
    %c7_i32_122 = arith.constant 7 : i32
    %345 = tpu.dynamic_rotate %344 by %c7_i32_122 dim 0 : vector<8x64xf32>, i32 -> vector<8x64xf32>
    %c7_i32_123 = arith.constant 7 : i32
    %346 = vector.broadcast %c7_i32_123 : i32 to vector<8x1xi32>
    %347 = arith.cmpi slt, %0, %346 : vector<8x1xi32>
    %cst_124 = arith.constant 0.000000e+00 : f32
    %348 = vector.shape_cast %347 : vector<8x1xi1> to vector<8x1xi1>
    %349 = vector.broadcast %348 : vector<8x1xi1> to vector<8x64xi1>
    %350 = vector.broadcast %cst_124 : f32 to vector<8x64xf32>
    %351 = arith.select %349, %345, %350 : vector<8x64xi1>, vector<8x64xf32>
    %352 = tpu.concatenate %341, %342, %343, %351 in 0 : vector<8x64xf32>, vector<8x64xf32>, vector<8x64xf32>, vector<8x64xf32> -> vector<32x64xf32>
    %c0_125 = arith.constant 0 : index
    %c0_126 = arith.constant 0 : index
    %353 = vector.load %arg22[%c0_125, %c0_126] : memref<192x128xf32, #tpu.memory_space<vmem>>, vector<192x128xf32>
    %354 = vector.extract_strided_slice %353 {offsets = [0, 0], sizes = [64, 128], strides = [1, 1]} : vector<192x128xf32> to vector<64x128xf32>
    %cst_127 = arith.constant dense<0.000000e+00> : vector<32x128xf32>
    %355 = tpu.matmul %340, %354, %cst_127 {dimension_numbers = #tpu.dot_dimension_numbers<[1], [0], [0], [1], [0, 0, 1, 1], [], []>} : vector<32x64xf32>, vector<64x128xf32>, vector<32x128xf32> -> vector<32x128xf32>
    %356 = vector.extract_strided_slice %353 {offsets = [64, 0], sizes = [64, 128], strides = [1, 1]} : vector<192x128xf32> to vector<64x128xf32>
    %cst_128 = arith.constant dense<0.000000e+00> : vector<32x128xf32>
    %357 = tpu.matmul %328, %356, %cst_128 {dimension_numbers = #tpu.dot_dimension_numbers<[1], [0], [0], [1], [0, 0, 1, 1], [], []>} : vector<32x64xf32>, vector<64x128xf32>, vector<32x128xf32> -> vector<32x128xf32>
    %358 = arith.addf %355, %357 : vector<32x128xf32>
    %359 = vector.extract_strided_slice %353 {offsets = [128, 0], sizes = [64, 128], strides = [1, 1]} : vector<192x128xf32> to vector<64x128xf32>
    %cst_129 = arith.constant dense<0.000000e+00> : vector<32x128xf32>
    %360 = tpu.matmul %352, %359, %cst_129 {dimension_numbers = #tpu.dot_dimension_numbers<[1], [0], [0], [1], [0, 0, 1, 1], [], []>} : vector<32x64xf32>, vector<64x128xf32>, vector<32x128xf32> -> vector<32x128xf32>
    %361 = arith.addf %358, %360 : vector<32x128xf32>
    %c0_130 = arith.constant 0 : index
    %c0_131 = arith.constant 0 : index
    %362 = vector.load %arg23[%c0_130, %c0_131] : memref<1x128xf32, #tpu.memory_space<vmem>>, vector<1x128xf32>
    %363 = vector.broadcast %362 : vector<1x128xf32> to vector<32x128xf32>
    %364 = arith.addf %361, %363 : vector<32x128xf32>
    %365 = vector.extract_strided_slice %364 {offsets = [0, 0], sizes = [32, 64], strides = [1, 1]} : vector<32x128xf32> to vector<32x64xf32>
    %366 = vector.extract_strided_slice %364 {offsets = [0, 64], sizes = [32, 64], strides = [1, 1]} : vector<32x128xf32> to vector<32x64xf32>
    %367 = arith.negf %366 : vector<32x64xf32>
    %368 = math.exp %367 : vector<32x64xf32>
    %cst_132 = arith.constant 1.000000e+00 : f32
    %369 = vector.broadcast %cst_132 : f32 to vector<32x64xf32>
    %370 = arith.addf %369, %368 : vector<32x64xf32>
    %371 = arith.divf %369, %370 : vector<32x64xf32>
    %372 = arith.subf %365, %328 : vector<32x64xf32>
    %373 = arith.mulf %371, %372 : vector<32x64xf32>
    %374 = arith.addf %328, %373 : vector<32x64xf32>
    %375 = vector.extract_strided_slice %374 {offsets = [24, 0], sizes = [8, 64], strides = [1, 1]} : vector<32x64xf32> to vector<8x64xf32>
    %c1_i32_133 = arith.constant 1 : i32
    %376 = tpu.dynamic_rotate %375 by %c1_i32_133 dim 0 : vector<8x64xf32>, i32 -> vector<8x64xf32>
    %c1_i32_134 = arith.constant 1 : i32
    %377 = vector.broadcast %c1_i32_134 : i32 to vector<8x1xi32>
    %378 = arith.cmpi sge, %0, %377 : vector<8x1xi32>
    %cst_135 = arith.constant 0.000000e+00 : f32
    %379 = vector.shape_cast %378 : vector<8x1xi1> to vector<8x1xi1>
    %380 = vector.broadcast %379 : vector<8x1xi1> to vector<8x64xi1>
    %381 = vector.broadcast %cst_135 : f32 to vector<8x64xf32>
    %382 = arith.select %380, %376, %381 : vector<8x64xi1>, vector<8x64xf32>
    %383 = vector.extract_strided_slice %374 {offsets = [0, 0], sizes = [8, 64], strides = [1, 1]} : vector<32x64xf32> to vector<8x64xf32>
    %384 = vector.extract_strided_slice %374 {offsets = [8, 0], sizes = [8, 64], strides = [1, 1]} : vector<32x64xf32> to vector<8x64xf32>
    %385 = vector.extract_strided_slice %374 {offsets = [16, 0], sizes = [8, 64], strides = [1, 1]} : vector<32x64xf32> to vector<8x64xf32>
    %386 = tpu.concatenate %382, %383, %384, %385 in 0 : vector<8x64xf32>, vector<8x64xf32>, vector<8x64xf32>, vector<8x64xf32> -> vector<32x64xf32>
    %387 = vector.extract_strided_slice %374 {offsets = [8, 0], sizes = [8, 64], strides = [1, 1]} : vector<32x64xf32> to vector<8x64xf32>
    %388 = vector.extract_strided_slice %374 {offsets = [16, 0], sizes = [8, 64], strides = [1, 1]} : vector<32x64xf32> to vector<8x64xf32>
    %389 = vector.extract_strided_slice %374 {offsets = [24, 0], sizes = [8, 64], strides = [1, 1]} : vector<32x64xf32> to vector<8x64xf32>
    %390 = vector.extract_strided_slice %374 {offsets = [0, 0], sizes = [8, 64], strides = [1, 1]} : vector<32x64xf32> to vector<8x64xf32>
    %c7_i32_136 = arith.constant 7 : i32
    %391 = tpu.dynamic_rotate %390 by %c7_i32_136 dim 0 : vector<8x64xf32>, i32 -> vector<8x64xf32>
    %c7_i32_137 = arith.constant 7 : i32
    %392 = vector.broadcast %c7_i32_137 : i32 to vector<8x1xi32>
    %393 = arith.cmpi slt, %0, %392 : vector<8x1xi32>
    %cst_138 = arith.constant 0.000000e+00 : f32
    %394 = vector.shape_cast %393 : vector<8x1xi1> to vector<8x1xi1>
    %395 = vector.broadcast %394 : vector<8x1xi1> to vector<8x64xi1>
    %396 = vector.broadcast %cst_138 : f32 to vector<8x64xf32>
    %397 = arith.select %395, %391, %396 : vector<8x64xi1>, vector<8x64xf32>
    %398 = tpu.concatenate %387, %388, %389, %397 in 0 : vector<8x64xf32>, vector<8x64xf32>, vector<8x64xf32>, vector<8x64xf32> -> vector<32x64xf32>
    %c0_139 = arith.constant 0 : index
    %c0_140 = arith.constant 0 : index
    %399 = vector.load %arg24[%c0_139, %c0_140] : memref<192x128xf32, #tpu.memory_space<vmem>>, vector<192x128xf32>
    %400 = vector.extract_strided_slice %399 {offsets = [0, 0], sizes = [64, 128], strides = [1, 1]} : vector<192x128xf32> to vector<64x128xf32>
    %cst_141 = arith.constant dense<0.000000e+00> : vector<32x128xf32>
    %401 = tpu.matmul %386, %400, %cst_141 {dimension_numbers = #tpu.dot_dimension_numbers<[1], [0], [0], [1], [0, 0, 1, 1], [], []>} : vector<32x64xf32>, vector<64x128xf32>, vector<32x128xf32> -> vector<32x128xf32>
    %402 = vector.extract_strided_slice %399 {offsets = [64, 0], sizes = [64, 128], strides = [1, 1]} : vector<192x128xf32> to vector<64x128xf32>
    %cst_142 = arith.constant dense<0.000000e+00> : vector<32x128xf32>
    %403 = tpu.matmul %374, %402, %cst_142 {dimension_numbers = #tpu.dot_dimension_numbers<[1], [0], [0], [1], [0, 0, 1, 1], [], []>} : vector<32x64xf32>, vector<64x128xf32>, vector<32x128xf32> -> vector<32x128xf32>
    %404 = arith.addf %401, %403 : vector<32x128xf32>
    %405 = vector.extract_strided_slice %399 {offsets = [128, 0], sizes = [64, 128], strides = [1, 1]} : vector<192x128xf32> to vector<64x128xf32>
    %cst_143 = arith.constant dense<0.000000e+00> : vector<32x128xf32>
    %406 = tpu.matmul %398, %405, %cst_143 {dimension_numbers = #tpu.dot_dimension_numbers<[1], [0], [0], [1], [0, 0, 1, 1], [], []>} : vector<32x64xf32>, vector<64x128xf32>, vector<32x128xf32> -> vector<32x128xf32>
    %407 = arith.addf %404, %406 : vector<32x128xf32>
    %c0_144 = arith.constant 0 : index
    %c0_145 = arith.constant 0 : index
    %408 = vector.load %arg25[%c0_144, %c0_145] : memref<1x128xf32, #tpu.memory_space<vmem>>, vector<1x128xf32>
    %409 = vector.broadcast %408 : vector<1x128xf32> to vector<32x128xf32>
    %410 = arith.addf %407, %409 : vector<32x128xf32>
    %411 = vector.extract_strided_slice %410 {offsets = [0, 0], sizes = [32, 64], strides = [1, 1]} : vector<32x128xf32> to vector<32x64xf32>
    %412 = vector.extract_strided_slice %410 {offsets = [0, 64], sizes = [32, 64], strides = [1, 1]} : vector<32x128xf32> to vector<32x64xf32>
    %413 = arith.negf %412 : vector<32x64xf32>
    %414 = math.exp %413 : vector<32x64xf32>
    %cst_146 = arith.constant 1.000000e+00 : f32
    %415 = vector.broadcast %cst_146 : f32 to vector<32x64xf32>
    %416 = arith.addf %415, %414 : vector<32x64xf32>
    %417 = arith.divf %415, %416 : vector<32x64xf32>
    %418 = arith.subf %411, %374 : vector<32x64xf32>
    %419 = arith.mulf %417, %418 : vector<32x64xf32>
    %420 = arith.addf %374, %419 : vector<32x64xf32>
    %c0_147 = arith.constant 0 : index
    %c0_148 = arith.constant 0 : index
    %421 = vector.load %arg26[%c0_147, %c0_148] : memref<64x16xf32, #tpu.memory_space<vmem>>, vector<64x16xf32>
    %cst_149 = arith.constant dense<0.000000e+00> : vector<32x16xf32>
    %422 = tpu.matmul %420, %421, %cst_149 {dimension_numbers = #tpu.dot_dimension_numbers<[1], [0], [0], [1], [0, 0, 1, 1], [], []>} : vector<32x64xf32>, vector<64x16xf32>, vector<32x16xf32> -> vector<32x16xf32>
    %c0_150 = arith.constant 0 : index
    %c0_151 = arith.constant 0 : index
    %423 = vector.load %arg27[%c0_150, %c0_151] : memref<1x16xf32, #tpu.memory_space<vmem>>, vector<1x16xf32>
    %424 = vector.broadcast %423 : vector<1x16xf32> to vector<32x16xf32>
    %425 = arith.addf %422, %424 : vector<32x16xf32>
    %c0_152 = arith.constant 0 : index
    %c0_153 = arith.constant 0 : index
    %426 = vector.load %arg28[%c0_152, %c0_153] : memref<16x16xf32, #tpu.memory_space<vmem>>, vector<16x16xf32>
    %cst_154 = arith.constant dense<0.000000e+00> : vector<32x16xf32>
    %427 = tpu.matmul %425, %426, %cst_154 {dimension_numbers = #tpu.dot_dimension_numbers<[1], [0], [0], [1], [0, 0, 1, 1], [], []>} : vector<32x16xf32>, vector<16x16xf32>, vector<32x16xf32> -> vector<32x16xf32>
    %c0_155 = arith.constant 0 : index
    %c0_156 = arith.constant 0 : index
    %428 = vector.load %arg29[%c0_155, %c0_156] : memref<1x16xf32, #tpu.memory_space<vmem>>, vector<1x16xf32>
    %429 = vector.broadcast %428 : vector<1x16xf32> to vector<32x16xf32>
    %430 = arith.addf %427, %429 : vector<32x16xf32>
    %cst_157 = arith.constant 0.000000e+00 : f32
    %431 = vector.broadcast %cst_157 : f32 to vector<32x16xf32>
    %432 = arith.maximumf %430, %431 : vector<32x16xf32>
    %c0_158 = arith.constant 0 : index
    %c0_159 = arith.constant 0 : index
    %433 = vector.load %arg30[%c0_158, %c0_159] : memref<16x16xf32, #tpu.memory_space<vmem>>, vector<16x16xf32>
    %cst_160 = arith.constant dense<0.000000e+00> : vector<32x16xf32>
    %434 = tpu.matmul %432, %433, %cst_160 {dimension_numbers = #tpu.dot_dimension_numbers<[1], [0], [0], [1], [0, 0, 1, 1], [], []>} : vector<32x16xf32>, vector<16x16xf32>, vector<32x16xf32> -> vector<32x16xf32>
    %c0_161 = arith.constant 0 : index
    %c0_162 = arith.constant 0 : index
    %435 = vector.load %arg31[%c0_161, %c0_162] : memref<1x16xf32, #tpu.memory_space<vmem>>, vector<1x16xf32>
    %436 = vector.broadcast %435 : vector<1x16xf32> to vector<32x16xf32>
    %437 = arith.addf %434, %436 : vector<32x16xf32>
    %cst_163 = arith.constant 0.000000e+00 : f32
    %438 = vector.broadcast %cst_163 : f32 to vector<32x16xf32>
    %439 = arith.maximumf %437, %438 : vector<32x16xf32>
    %c0_164 = arith.constant 0 : index
    %c0_165 = arith.constant 0 : index
    %440 = vector.load %arg32[%c0_164, %c0_165] : memref<16x16xf32, #tpu.memory_space<vmem>>, vector<16x16xf32>
    %cst_166 = arith.constant dense<0.000000e+00> : vector<32x16xf32>
    %441 = tpu.matmul %439, %440, %cst_166 {dimension_numbers = #tpu.dot_dimension_numbers<[1], [0], [0], [1], [0, 0, 1, 1], [], []>} : vector<32x16xf32>, vector<16x16xf32>, vector<32x16xf32> -> vector<32x16xf32>
    %c0_167 = arith.constant 0 : index
    %c0_168 = arith.constant 0 : index
    %442 = vector.load %arg33[%c0_167, %c0_168] : memref<1x16xf32, #tpu.memory_space<vmem>>, vector<1x16xf32>
    %443 = vector.broadcast %442 : vector<1x16xf32> to vector<32x16xf32>
    %444 = arith.addf %441, %443 : vector<32x16xf32>
    %445 = arith.negf %444 : vector<32x16xf32>
    %446 = math.exp %445 : vector<32x16xf32>
    %cst_169 = arith.constant 1.000000e+00 : f32
    %447 = vector.broadcast %cst_169 : f32 to vector<32x16xf32>
    %448 = arith.addf %447, %446 : vector<32x16xf32>
    %449 = arith.divf %447, %448 : vector<32x16xf32>
    %c0_170 = arith.constant 0 : index
    %c0_171 = arith.constant 0 : index
    %c0_172 = arith.constant 0 : index
    %450 = vector.load %arg34[%c0_170, %c0_171, %c0_172] : memref<1x32x16xf32, #tpu.memory_space<vmem>>, vector<1x32x16xf32>
    %451 = vector.shape_cast %450 : vector<1x32x16xf32> to vector<32x16xf32>
    %452 = vector.shape_cast %449 : vector<32x16xf32> to vector<1x32x16xf32>
    tpu.vector_store %arg34[%c0_170, %c0_171, %c0_172], %452 {strides = array<i32>} : memref<1x32x16xf32, #tpu.memory_space<vmem>>, vector<1x32x16xf32>,
    return
  }
  func.func @transform_0(%arg0: i32) -> (i32, i32, i32) {
    %c0_i32 = arith.constant 0 : i32
    %c0_i32_0 = arith.constant 0 : i32
    %c0_i32_1 = arith.constant 0 : i32
    return %arg0, %c0_i32, %c0_i32_0 : i32, i32, i32
  }
  func.func @transform_1(%arg0: i32) -> (i32, i32) {
    %c0_i32 = arith.constant 0 : i32
    %c0_i32_0 = arith.constant 0 : i32
    %c0_i32_1 = arith.constant 0 : i32
    return %c0_i32, %c0_i32_0 : i32, i32
  }
  func.func @transform_2(%arg0: i32) -> (i32, i32) {
    %c0_i32 = arith.constant 0 : i32
    %c0_i32_0 = arith.constant 0 : i32
    %c0_i32_1 = arith.constant 0 : i32
    return %c0_i32, %c0_i32_0 : i32, i32
  }
  func.func @transform_3(%arg0: i32) -> (i32, i32) {
    %c0_i32 = arith.constant 0 : i32
    %c0_i32_0 = arith.constant 0 : i32
    %c0_i32_1 = arith.constant 0 : i32
    return %c0_i32, %c0_i32_0 : i32, i32
  }
  func.func @transform_4(%arg0: i32) -> (i32, i32) {
    %c0_i32 = arith.constant 0 : i32
    %c0_i32_0 = arith.constant 0 : i32
    %c0_i32_1 = arith.constant 0 : i32
    return %c0_i32, %c0_i32_0 : i32, i32
  }
  func.func @transform_5(%arg0: i32) -> (i32, i32) {
    %c0_i32 = arith.constant 0 : i32
    %c0_i32_0 = arith.constant 0 : i32
    %c0_i32_1 = arith.constant 0 : i32
    return %c0_i32, %c0_i32_0 : i32, i32
  }
  func.func @transform_6(%arg0: i32) -> (i32, i32) {
    %c0_i32 = arith.constant 0 : i32
    %c0_i32_0 = arith.constant 0 : i32
    %c0_i32_1 = arith.constant 0 : i32
    return %c0_i32, %c0_i32_0 : i32, i32
  }
  func.func @transform_7(%arg0: i32) -> (i32, i32) {
    %c0_i32 = arith.constant 0 : i32
    %c0_i32_0 = arith.constant 0 : i32
    %c0_i32_1 = arith.constant 0 : i32
    return %c0_i32, %c0_i32_0 : i32, i32
  }
  func.func @transform_8(%arg0: i32) -> (i32, i32) {
    %c0_i32 = arith.constant 0 : i32
    %c0_i32_0 = arith.constant 0 : i32
    %c0_i32_1 = arith.constant 0 : i32
    return %c0_i32, %c0_i32_0 : i32, i32
  }
  func.func @transform_9(%arg0: i32) -> (i32, i32) {
    %c0_i32 = arith.constant 0 : i32
    %c0_i32_0 = arith.constant 0 : i32
    %c0_i32_1 = arith.constant 0 : i32
    return %c0_i32, %c0_i32_0 : i32, i32
  }
  func.func @transform_10(%arg0: i32) -> (i32, i32) {
    %c0_i32 = arith.constant 0 : i32
    %c0_i32_0 = arith.constant 0 : i32
    %c0_i32_1 = arith.constant 0 : i32
    return %c0_i32, %c0_i32_0 : i32, i32
  }
  func.func @transform_11(%arg0: i32) -> (i32, i32) {
    %c0_i32 = arith.constant 0 : i32
    %c0_i32_0 = arith.constant 0 : i32
    %c0_i32_1 = arith.constant 0 : i32
    return %c0_i32, %c0_i32_0 : i32, i32
  }
  func.func @transform_12(%arg0: i32) -> (i32, i32) {
    %c0_i32 = arith.constant 0 : i32
    %c0_i32_0 = arith.constant 0 : i32
    %c0_i32_1 = arith.constant 0 : i32
    return %c0_i32, %c0_i32_0 : i32, i32
  }
  func.func @transform_13(%arg0: i32) -> (i32, i32) {
    %c0_i32 = arith.constant 0 : i32
    %c0_i32_0 = arith.constant 0 : i32
    %c0_i32_1 = arith.constant 0 : i32
    return %c0_i32, %c0_i32_0 : i32, i32
  }
  func.func @transform_14(%arg0: i32) -> (i32, i32) {
    %c0_i32 = arith.constant 0 : i32
    %c0_i32_0 = arith.constant 0 : i32
    %c0_i32_1 = arith.constant 0 : i32
    return %c0_i32, %c0_i32_0 : i32, i32
  }
  func.func @transform_15(%arg0: i32) -> (i32, i32) {
    %c0_i32 = arith.constant 0 : i32
    %c0_i32_0 = arith.constant 0 : i32
    %c0_i32_1 = arith.constant 0 : i32
    return %c0_i32, %c0_i32_0 : i32, i32
  }
  func.func @transform_16(%arg0: i32) -> (i32, i32) {
    %c0_i32 = arith.constant 0 : i32
    %c0_i32_0 = arith.constant 0 : i32
    %c0_i32_1 = arith.constant 0 : i32
    return %c0_i32, %c0_i32_0 : i32, i32
  }
  func.func @transform_17(%arg0: i32) -> (i32, i32) {
    %c0_i32 = arith.constant 0 : i32
    %c0_i32_0 = arith.constant 0 : i32
    %c0_i32_1 = arith.constant 0 : i32
    return %c0_i32, %c0_i32_0 : i32, i32
  }
  func.func @transform_18(%arg0: i32) -> (i32, i32) {
    %c0_i32 = arith.constant 0 : i32
    %c0_i32_0 = arith.constant 0 : i32
    %c0_i32_1 = arith.constant 0 : i32
    return %c0_i32, %c0_i32_0 : i32, i32
  }
  func.func @transform_19(%arg0: i32) -> (i32, i32) {
    %c0_i32 = arith.constant 0 : i32
    %c0_i32_0 = arith.constant 0 : i32
    %c0_i32_1 = arith.constant 0 : i32
    return %c0_i32, %c0_i32_0 : i32, i32
  }
  func.func @transform_20(%arg0: i32) -> (i32, i32) {
    %c0_i32 = arith.constant 0 : i32
    %c0_i32_0 = arith.constant 0 : i32
    %c0_i32_1 = arith.constant 0 : i32
    return %c0_i32, %c0_i32_0 : i32, i32
  }
  func.func @transform_21(%arg0: i32) -> (i32, i32) {
    %c0_i32 = arith.constant 0 : i32
    %c0_i32_0 = arith.constant 0 : i32
    %c0_i32_1 = arith.constant 0 : i32
    return %c0_i32, %c0_i32_0 : i32, i32
  }
  func.func @transform_22(%arg0: i32) -> (i32, i32) {
    %c0_i32 = arith.constant 0 : i32
    %c0_i32_0 = arith.constant 0 : i32
    %c0_i32_1 = arith.constant 0 : i32
    return %c0_i32, %c0_i32_0 : i32, i32
  }
  func.func @transform_23(%arg0: i32) -> (i32, i32) {
    %c0_i32 = arith.constant 0 : i32
    %c0_i32_0 = arith.constant 0 : i32
    %c0_i32_1 = arith.constant 0 : i32
    return %c0_i32, %c0_i32_0 : i32, i32
  }
  func.func @transform_24(%arg0: i32) -> (i32, i32) {
    %c0_i32 = arith.constant 0 : i32
    %c0_i32_0 = arith.constant 0 : i32
    %c0_i32_1 = arith.constant 0 : i32
    return %c0_i32, %c0_i32_0 : i32, i32
  }
  func.func @transform_25(%arg0: i32) -> (i32, i32) {
    %c0_i32 = arith.constant 0 : i32
    %c0_i32_0 = arith.constant 0 : i32
    %c0_i32_1 = arith.constant 0 : i32
    return %c0_i32, %c0_i32_0 : i32, i32
  }
  func.func @transform_26(%arg0: i32) -> (i32, i32) {
    %c0_i32 = arith.constant 0 : i32
    %c0_i32_0 = arith.constant 0 : i32
    %c0_i32_1 = arith.constant 0 : i32
    return %c0_i32, %c0_i32_0 : i32, i32
  }
  func.func @transform_27(%arg0: i32) -> (i32, i32) {
    %c0_i32 = arith.constant 0 : i32
    %c0_i32_0 = arith.constant 0 : i32
    %c0_i32_1 = arith.constant 0 : i32
    return %c0_i32, %c0_i32_0 : i32, i32
  }
  func.func @transform_28(%arg0: i32) -> (i32, i32) {
    %c0_i32 = arith.constant 0 : i32
    %c0_i32_0 = arith.constant 0 : i32
    %c0_i32_1 = arith.constant 0 : i32
    return %c0_i32, %c0_i32_0 : i32, i32
  }
  func.func @transform_29(%arg0: i32) -> (i32, i32) {
    %c0_i32 = arith.constant 0 : i32
    %c0_i32_0 = arith.constant 0 : i32
    %c0_i32_1 = arith.constant 0 : i32
    return %c0_i32, %c0_i32_0 : i32, i32
  }
  func.func @transform_30(%arg0: i32) -> (i32, i32) {
    %c0_i32 = arith.constant 0 : i32
    %c0_i32_0 = arith.constant 0 : i32
    %c0_i32_1 = arith.constant 0 : i32
    return %c0_i32, %c0_i32_0 : i32, i32
  }
  func.func @transform_31(%arg0: i32) -> (i32, i32) {
    %c0_i32 = arith.constant 0 : i32
    %c0_i32_0 = arith.constant 0 : i32
    %c0_i32_1 = arith.constant 0 : i32
    return %c0_i32, %c0_i32_0 : i32, i32
  }
  func.func @transform_32(%arg0: i32) -> (i32, i32) {
    %c0_i32 = arith.constant 0 : i32
    %c0_i32_0 = arith.constant 0 : i32
    %c0_i32_1 = arith.constant 0 : i32
    return %c0_i32, %c0_i32_0 : i32, i32
  }
  func.func @transform_33(%arg0: i32) -> (i32, i32, i32) {
    %c0_i32 = arith.constant 0 : i32
    %c0_i32_0 = arith.constant 0 : i32
    %c0_i32_1 = arith.constant 0 : i32
    return %arg0, %c0_i32, %c0_i32_0 : i32, i32, i32
  }
}

</mosaic_0001>

<bundles_post_ra>
// kernel: tpu_custom_call.1
= control target key start
LH: loop header
LB: loop body
LE: loop exit
PB: predicated region body
PF: predicated region fallthrough
CT: control target
= control target key end

     0   :  { %s5787_s6 = smov 1   ;;  %s5788_s10 = smov 2   ;;  %s6580_s0 = inlined_call_operand.smem [shape: u32[34], index: -1, kind: input, shape index: {}] }
   0x1   :  { %s5833_s5 = sld [smem:[%s6580_s0]]   ;;  %s5789_s14 = smov 3  }
   0x2   :  { %s5838_s9 = sld [smem:[%s6580_s0 + %s5787_s6]]   ;;  %s5790_s18 = smov 4  }
   0x3   :  { %s5843_s13 = sld [smem:[%s6580_s0 + %s5788_s10]]   ;;  %s5791_s22 = smov 5  }
   0x4   :  { %s5848_s17 = sld [smem:[%s6580_s0 + %s5789_s14]]   ;;  %s5792_s26 = smov 6  }
   0x5   :  { %s5853_s21 = sld [smem:[%s6580_s0 + %s5790_s18]]   ;;  %s5793_s30 = smov 7  }
   0x6   :  { %s5858_s25 = sld [smem:[%s6580_s0 + %s5791_s22]]   ;;  %s5794_s4 = smov 8  }
   0x7   :  { %s5863_s29 = sld [smem:[%s6580_s0 + %s5792_s26]]   ;;  %s5795_s10 = smov 9  }
   0x8   :  { %s5868_s3 = sld [smem:[%s6580_s0 + %s5793_s30]]   ;;  %s5796_s15 = smov 10  }
   0x9   :  { %s5873_s8 = sld [smem:[%s6580_s0 + %s5794_s4]]   ;;  %s5797_s20 = smov 11  }
   0xa   :  { %s5878_s14 = sld [smem:[%s6580_s0 + %s5795_s10]]   ;;  %s5798_s26 = smov 12  }
   0xb   :  { %s5883_s19 = sld [smem:[%s6580_s0 + %s5796_s15]]   ;;  %s5799_s1 = smov 13  }
   0xc   :  { %s5888_s24 = sld [smem:[%s6580_s0 + %s5797_s20]]   ;;  %s5800_s7 = smov 14  }
   0xd   :  { %s5893_s30 = sld [smem:[%s6580_s0 + %s5798_s26]]   ;;  %s5801_s15 = smov 15  }
   0xe   :  { %s5898_s6 = sld [smem:[%s6580_s0 + %s5799_s1]]   ;;  %s5802_s22 = smov 16  }
   0xf   :  { %s5903_s12 = sld [smem:[%s6580_s0 + %s5800_s7]]   ;;  %s5803_s28 = smov 17  }
  0x10   :  { %s5908_s20 = sld [smem:[%s6580_s0 + %s5801_s15]]   ;;  %s5804_s7 = smov 18  }
  0x11   :  { %s5913_s27 = sld [smem:[%s6580_s0 + %s5802_s22]]   ;;  %s5805_s15 = smov 19  }
  0x12   :  { %s5918_s4 = sld [smem:[%s6580_s0 + %s5803_s28]]   ;;  %s5806_s22 = smov 20  }
  0x13   :  { %s5807_s28 = smov 21  }
  0x15   :  { %6589 = sst [smem:[#allocation2_spill]] %s5903_s12 }
  0x16   :  { %6590 = sst [smem:[#allocation3_spill]] %s5908_s20 }
  0x17   :  { %6591 = sst [smem:[#allocation4_spill]] %s5913_s27 }
  0x18   :  { %6592 = sst [smem:[#allocation5_spill]] %s5918_s4 }
  0x19   :  { %s5923_s12 = sld [smem:[%s6580_s0 + %s5804_s7]]   ;;  %s5808_s7 = smov 22  }
  0x1a   :  { %s5928_s20 = sld [smem:[%s6580_s0 + %s5805_s15]]   ;;  %s5809_s15 = smov 23  }
  0x1b   :  { %s5933_s27 = sld [smem:[%s6580_s0 + %s5806_s22]]   ;;  %s5810_s22 = smov 24  }
  0x1c   :  { %s5938_s4 = sld [smem:[%s6580_s0 + %s5807_s28]]   ;;  %s5811_s28 = smov 25  }
  0x1f   :  { %6593 = sst [smem:[#allocation6_spill]] %s5923_s12 }
  0x20   :  { %6594 = sst [smem:[#allocation7_spill]] %s5928_s20 }
  0x21   :  { %6595 = sst [smem:[#allocation8_spill]] %s5933_s27 }
  0x22   :  { %6596 = sst [smem:[#allocation9_spill]] %s5938_s4 }
  0x23   :  { %s5943_s12 = sld [smem:[%s6580_s0 + %s5808_s7]]   ;;  %s5812_s7 = smov 26  }
  0x24   :  { %s5948_s20 = sld [smem:[%s6580_s0 + %s5809_s15]]   ;;  %s5813_s15 = smov 27  }
  0x25   :  { %s5953_s27 = sld [smem:[%s6580_s0 + %s5810_s22]]   ;;  %s5814_s22 = smov 28  }
  0x26   :  { %s5958_s4 = sld [smem:[%s6580_s0 + %s5811_s28]]   ;;  %s5815_s28 = smov 29  }
  0x29   :  { %6597 = sst [smem:[#allocation10_spill]] %s5943_s12 }
  0x2a   :  { %6598 = sst [smem:[#allocation11_spill]] %s5948_s20 }
  0x2b   :  { %6599 = sst [smem:[#allocation12_spill]] %s5953_s27 }
  0x2c   :  { %6600 = sst [smem:[#allocation13_spill]] %s5958_s4 }
  0x2d   :  { %s5963_s12 = sld [smem:[%s6580_s0 + %s5812_s7]]   ;;  %s5816_s7 = smov 30  }
  0x2e   :  { %s5968_s20 = sld [smem:[%s6580_s0 + %s5813_s15]]   ;;  %s5817_s15 = smov 31  }
  0x2f   :  { %s5973_s27 = sld [smem:[%s6580_s0 + %s5814_s22]]   ;;  %s5818_s22 = smov 32  }
  0x30   :  { %s5978_s4 = sld [smem:[%s6580_s0 + %s5815_s28]]   ;;  %s5819_s28 = smov 33  }
  0x33   :  { %6601 = sst [smem:[#allocation14_spill]] %s5963_s12 }
  0x34   :  { %6602 = sst [smem:[#allocation15_spill]] %s5968_s20 }
  0x35   :  { %6603 = sst [smem:[#allocation16_spill]] %s5973_s27 }
  0x36   :  { %6604 = sst [smem:[#allocation17_spill]] %s5978_s4 }
  0x37   :  { %s5983_s12 = sld [smem:[%s6580_s0 + %s5816_s7]]   ;;  %s6000_s7 = smov 0  }
  0x38   :  { %s5988_s20 = sld [smem:[%s6580_s0 + %s5817_s15]]  }
  0x39   :  { %s5993_s27 = sld [smem:[%s6580_s0 + %s5818_s22]]  }
  0x3a   :  { %s5998_s4 = sld [smem:[%s6580_s0 + %s5819_s28]]  }
  0x3b LB: > { %s4769_s10 = sadd.s32 4294967295, %s5785_s7   ;;  %p4773_p0 = scmp.ge.s32.totalorder %s5785_s7, 1  ;;  %s5785_s7 = sphi %s6000_s7, %s77_s7  }
  0x3c   : > { %p920_p1 = scmp.lt.s32.totalorder %s5785_s7, 3 }
  0x3e   : > { %p921_p2 = pnand %p4773_p0, %p920_p1 }
  0x3f   : > { %p1003_p3 = scmp.lt.s32.totalorder (!%p921_p2), %s4769_s10, 1  ;;  %s5822_s15 = smov (!%p921_p2), 32  }
  0x40   : > { %924 = sbr.rel (%p921_p2) target bundleno = 5258 (0x148a), region = 152  ;;  %s5823_s16 = smov (!%p921_p2), 96  }
  0x41   : > { %s6605_s18 = sld [smem:[#allocation3_spill]] (!%p921_p2) }
  0x42   : > { %s6606_s22 = sld [smem:[#allocation2_spill]] (!%p921_p2) }
  0x43   : > { %s6607_s23 = sld [smem:[#allocation4_spill]] (!%p921_p2) }
  0x44   : > { %s6608_s26 = sld [smem:[#allocation5_spill]] (!%p921_p2) }
  0x45   : > { %v1016_v0 = vld [vmem:[%s5838_s9 + $0x8] sm:$0xff]  ;;  %v5820_v1 = vmov 0.0   ;;  %v1015_v2 = vld [vmem:[%s5838_s9] sm:$0xff]  ;;  %vm5821_vm0 = vmmov 0   ;;  %v1115_v3 = vld [vmem:[%s5848_s17 + $0x38] sm:$0xff]  ;;  %s6622_s10 = smov (!%p1003_p3, %s4769_s10), 1  ;;  %v1012_v12 = vlaneseq }
  0x46   : > { %5164 = vmatprep.subr.mxu0 %v5820_v1  ;;  %5168 = vmatprep.mubr.msk.f32.mxu0 %vm5821_vm0, %v5820_v1  ;;  %v1114_v4 = vld [vmem:[%s5848_s17 + $0x30] sm:$0xff]  ;;  %s4774_s0 = sshll.u32 %s6622_s10, 3  ;;  %vm1024_vm1 = vcmask 130048   ;;  %v1113_v5 = vld [vmem:[%s5848_s17 + $0x28] sm:$0xff]  ;;  %v1111_v6 = vld [vmem:[%s5848_s17 + $0x18] sm:$0xff]  ;;  %vm1120_vm2 = vcmask 261120  }
  0x47   : > { %5165 = vmatpush3.msra.mxu0 %v1016_v0  ;;  %5171 = vmatprep.subr.mxu1 %v5820_v1  ;;  %s1006_s11 = scalar_lea.vmem %s5833_s5, %s4774_s0  ;;  %v1112_v8 = vld [vmem:[%s5848_s17 + $0x20] sm:$0xff]  ;;  %v1110_v9 = vld [vmem:[%s5848_s17 + $0x10] sm:$0xff]  ;;  %v1109_v10 = vld [vmem:[%s5848_s17 + $0x8] sm:$0xff]  ;;  %v6042_v14 = vshrl.u32 %v1012_v12, 7  ;;  %s6609_s28 = sld [smem:[#allocation6_spill]]  ;;  %vm3474_vm9 = vcmask 523264  }
  0x48   : > { %5166 = vmatprep.subr.mxu0 %v5820_v1  ;;  %5172 = vmatpush3.msra.mxu1 %v1115_v3  ;;  %v1014_v7 = vld [vmem:[%s1006_s11] sm:$0xff]  ;;  %v1119_v17 = vld [vmem:[%s5848_s17 + $0x58] sm:$0xff]  ;;  %v1118_v19 = vld [vmem:[%s5848_s17 + $0x50] sm:$0xff]  ;;  %s6610_s1 = sld [smem:[#allocation7_spill]] }
  0x49   : > { %5167 = vmatpush3.msra.mxu0 %v1015_v2  ;;  %5173 = vmatprep.subr.mxu1 %v5820_v1  ;;  %v1108_v11 = vld [vmem:[%s5848_s17] sm:$0xff]  ;;  %vm1099_vm3 = vcmp.ge.s32.totalorder %v6042_v14, 1  ;;  %v1117_v22 = vld [vmem:[%s5848_s17 + $0x48] sm:$0xff]  ;;  %vm1104_vm4 = vcmp.lt.s32.totalorder %v6042_v14, 7  ;;  %v1383_v29 = vld [vmem:[%s5858_s25 + $0x38] sm:$0xff]  ;;  %vm1367_vm5 = vcmp.ge.s32.totalorder %v6042_v14, 3 }
  0x4a   : > { %5174 = vmatpush3.msra.mxu1 %v1114_v4  ;;  %5182 = vmatprep.subr.mxu0 %v5820_v1  ;;  %v4777_v13 = vld [vmem:[%s5843_s13] ss:$0 sm:$0xff]  ;;  %v1382_v30 = vld [vmem:[%s5858_s25 + $0x30] sm:$0xff]  ;;  %v1379_v32 = vld [vmem:[%s5858_s25 + $0x18] sm:$0xff]  ;;  %vm1372_vm6 = vcmp.lt.s32.totalorder %v6042_v14, 5  ;;  %vm2090_vm7 = vcmp.ge.s32.totalorder %v6042_v14, 2 }
  0x4b   : > { %5175 = vmatprep.subr.mxu1 %v5820_v1  ;;  %5179 = vmatprep.mubr.msk.f32.mxu1 %vm5821_vm0, %v5820_v1  ;;  %v1116_v24 = vld [vmem:[%s5848_s17 + $0x40] sm:$0xff]  ;;  %v1381_v33 = vld [vmem:[%s5858_s25 + $0x28] sm:$0xff]  ;;  %v1378_v45 = vld [vmem:[%s5858_s25 + $0x10] sm:$0xff]  ;;  %vm2099_vm8 = vcmp.lt.s32.totalorder %v6042_v14, 6  ;;  %s6611_s2 = sld [smem:[#allocation9_spill]] }
  0x4c   : > { %5169 = vmatmul.mubr.msk.f32.vlgmr.msra.gmra.mxu0 %vm1024_vm1, %v1014_v7  ;;  %5176 = vmatpush3.msra.mxu1 %v1113_v5  ;;  %v4782_v36 = vld [vmem:[%s5853_s21] ss:$0 sm:$0xff]  ;;  %v1377_v46 = vld [vmem:[%s5858_s25 + $0x8] sm:$0xff]  ;;  %v1387_v53 = vld [vmem:[%s5858_s25 + $0x58] sm:$0xff]  ;;  %s6612_s0 = sld [smem:[#allocation8_spill]] }
  0x4d   : > { %5183 = vmatpush3.msra.mxu0 %v1111_v6  ;;  %5177 = vmatprep.subr.mxu1 %v5820_v1  ;;  %v1380_v44 = vld [vmem:[%s5858_s25 + $0x20] sm:$0xff]  ;;  %v1386_v54 = vld [vmem:[%s5858_s25 + $0x50] sm:$0xff]  ;;  %v1385_v57 = vld [vmem:[%s5858_s25 + $0x48] sm:$0xff]  ;;  %s6613_s11 = sld [smem:[#allocation10_spill]] }
  0x4e   : > { %5184 = vmatprep.subr.mxu0 %v5820_v1  ;;  %5190 = vmatprep.mubr.msk.f32.mxu0 %vm5821_vm0, %v5820_v1  ;;  %v1376_v47 = vld [vmem:[%s5858_s25] sm:$0xff]  ;;  %v1636_v0 = vld [vmem:[%s5868_s3 + $0x18] sm:$0xff]  ;;  %v1635_v3 = vld [vmem:[%s5868_s3 + $0x10] sm:$0xff] }
  0x4f   : > { %5178 = vmatpush3.msra.mxu1 %v1112_v8  ;;  %5185 = vmatpush3.msra.mxu0 %v1110_v9  ;;  %v1384_v59 = vld [vmem:[%s5858_s25 + $0x40] sm:$0xff]  ;;  %v1640_v2 = vld [vmem:[%s5868_s3 + $0x38] sm:$0xff]  ;;  %v1639_v5 = vld [vmem:[%s5868_s3 + $0x30] sm:$0xff] }
  0x50   : > { %5186 = vmatprep.subr.mxu0 %v5820_v1  ;;  %5193 = vmatprep.subr.mxu1 %v5820_v1  ;;  %v1634_v6 = vld [vmem:[%s5868_s3 + $0x8] sm:$0xff] }
  0x51   : > { %5187 = vmatpush3.msra.mxu0 %v1109_v10  ;;  %v1638_v7 = vld [vmem:[%s5868_s3 + $0x28] sm:$0xff]  ;;  %v4787_v10 = vld [vmem:[%s5863_s29] ss:$0 sm:$0xff] }
  0x52   : > { %5188 = vmatprep.subr.mxu0 %v5820_v1 }
  0x53   : > { %5189 = vmatpush3.msra.mxu0 %v1108_v11 }
  0x54   : > { %5204 = vmatprep.subr.mxu0 %v5820_v1 }
 0x10c   : > { %v1094_v15 = vpop.f32.mrf.mxu0 }
 0x10d   : > { %v6044_v16 = vadd.f32 %v4777_v13, %v1094_v15 }
 0x10e   : > { %v5170_v18 = vpop.f32.mrf.mxu0 }
 0x10f   : > { %5180 = vmatmul.mubr.msk.f32.vlgmr.msra.gmra.mxu1 %vm1120_vm2, %v6044_v16  ;;  %v1098_v20 = vrot.slane %v6044_v16, 7  ;;  %v1103_v23 = vrot.slane %v6044_v16, 1 }
 0x110   : > { %5194 = vmatpush3.msra.mxu1 %v1119_v17  ;;  %5201 = vmatprep.mubr.msk.f32.mxu1 %vm5821_vm0, %v5820_v1 }
 0x111   : > { %5195 = vmatprep.subr.mxu1 %v5820_v1  ;;  %v1102_v21 = vsel %vm1099_vm3, %v1098_v20, 0.0  ;;  %v1107_v25 = vsel %vm1104_vm4, %v1103_v23, 0.0  ;;  %v1637_v20 = vld [vmem:[%s5868_s3 + $0x20] sm:$0xff] }
 0x112   : > { %5196 = vmatpush3.msra.mxu1 %v1118_v19  ;;  %5191 = vmatmul.mubr.msk.f32.vlgmr.msra.gmra.mxu0 %vm1120_vm2, %v1102_v21  ;;  %v1633_v19 = vld [vmem:[%s5868_s3] sm:$0xff]  ;;  %v1802_v21 = vld [vmem:[%s5878_s14 + $0x38] sm:$0xff] }
 0x113   : > { %5197 = vmatprep.subr.mxu1 %v5820_v1  ;;  %5212 = vmatprep.mubr.msk.f32.mxu0 %vm5821_vm0, %v5820_v1 }
 0x114   : > { %5198 = vmatpush3.msra.mxu1 %v1117_v22  ;;  %5205 = vmatpush3.msra.mxu0 %v1383_v29  ;;  %v1798_v22 = vld [vmem:[%s5878_s14 + $0x18] sm:$0xff]  ;;  %v1799_v29 = vld [vmem:[%s5878_s14 + $0x20] sm:$0xff] }
 0x115   : > { %5199 = vmatprep.subr.mxu1 %v5820_v1  ;;  %5206 = vmatprep.subr.mxu0 %v5820_v1 }
 0x116   : > { %5200 = vmatpush3.msra.mxu1 %v1116_v24  ;;  %5207 = vmatpush3.msra.mxu0 %v1382_v30  ;;  %v1797_v30 = vld [vmem:[%s5878_s14 + $0x10] sm:$0xff] }
 0x117   : > { %5202 = vmatmul.mubr.msk.f32.vlgmr.msra.gmra.mxu1 %vm1120_vm2, %v1107_v25  ;;  %5215 = vmatprep.subr.mxu1 %v5820_v1 }
 0x118   : > { %5223 = vmatprep.mubr.msk.f32.mxu1 %vm5821_vm0, %v5820_v1  ;;  %5216 = vmatpush3.msra.mxu1 %v1379_v32  ;;  %v1806_v32 = vld [vmem:[%s5878_s14 + $0x58] sm:$0xff] }
 0x119   : > { %5217 = vmatprep.subr.mxu1 %v5820_v1  ;;  %5208 = vmatprep.subr.mxu0 %v5820_v1 }
 0x11a   : > { %5209 = vmatpush3.msra.mxu0 %v1381_v33  ;;  %5218 = vmatpush3.msra.mxu1 %v1378_v45  ;;  %v1795_v33 = vld [vmem:[%s5878_s14] sm:$0xff] }
 0x11b   : > { %5210 = vmatprep.subr.mxu0 %v5820_v1  ;;  %5219 = vmatprep.subr.mxu1 %v5820_v1  ;;  %v1803_v45 = vld [vmem:[%s5878_s14 + $0x40] sm:$0xff] }
 0x11c   : > { %5211 = vmatpush3.msra.mxu0 %v1380_v44  ;;  %5220 = vmatpush3.msra.mxu1 %v1377_v46  ;;  %v1804_v44 = vld [vmem:[%s5878_s14 + $0x48] sm:$0xff] }
 0x11d   : > { %5226 = vmatprep.subr.mxu0 %v5820_v1  ;;  %5221 = vmatprep.subr.mxu1 %v5820_v1 }
 0x11e   : > { %5222 = vmatpush3.msra.mxu1 %v1376_v47 }
 0x11f   : > { %5237 = vmatprep.subr.mxu1 %v5820_v1 }
 0x1cf   : > { %v1190_v26 = vpop.f32.mrf.mxu1 }
 0x1d1   : > { %v5181_v27 = vpop.f32.mrf.mxu1 }
 0x1d2   : > { %v1263_v28 = vpop.f32.mrf.mxu0  ;;  %v1801_v27 = vld [vmem:[%s5878_s14 + $0x30] sm:$0xff] }
 0x1d3   : > { %v1264_v34 = vadd.f32 %v1263_v28, %v1190_v26  ;;  %v1800_v28 = vld [vmem:[%s5878_s14 + $0x28] sm:$0xff] }
 0x1d4   : > { %v5192_v31 = vpop.f32.mrf.mxu0 }
 0x1d5   : > { %v1796_v31 = vld [vmem:[%s5878_s14 + $0x8] sm:$0xff] }
 0x1d7   : > { %v1336_v35 = vpop.f32.mrf.mxu1 }
 0x1d8   : > { %v1340_v37 = vadd.f32 %v1336_v35, %v1264_v34  ;;  %v4789_v34 = vld [vmem:[%s5873_s8] ss:$0 sm:$0xff] }
 0x1d9   : > { %v5203_v38 = vpop.f32.mrf.mxu1 }
 0x1da   : > { %v1348_v39 = vadd.f32 %v4782_v36, %v1340_v37 }
 0x1dc   : > { %v1355_v40 = vsub.f32 %v1348_v39, %v6044_v16  ;;  %v4783_v41 = vmul.f32 -1.442695, %v1348_v39 }
 0x1de   : > { %1357 = vrot.lane.b32.xlu0 %v1355_v40, %s5822_s15  ;;  %5675 = vpow2.f32 %v4783_v41  ;;  %v1805_v41 = vld [vmem:[%s5878_s14 + $0x50] sm:$0xff] }
 0x1eb   : > { %v5676_v42 = vpop.eup %5675 }
 0x1ec   : > { %v1352_v43 = vadd.f32 1.0, %v5676_v42 }
 0x1ee   : > { %5677 = vrcp.f32 %v1352_v43 }
 0x1fb   : > { %v5678_v48 = vpop.eup %5677 }
 0x250   : > { %v1358_v49 = vpop.permute.xlu0 %1357 }
 0x251   : > { %v1360_v50 = vmul.f32 %v5678_v48, %v1358_v49 }
 0x253   : > { %1362 = vrot.lane.b32.xlu0 %v1360_v50, %s5823_s16 }
 0x2c5   : > { %v1363_v51 = vpop.permute.xlu0 %1362 }
 0x2c6   : > { %v6093_v52 = vadd.f32 %v1363_v51, %v6044_v16 }
 0x2c8   : > { %5213 = vmatmul.mubr.msk.f32.vlgmr.msra.gmra.mxu0 %vm1120_vm2, %v6093_v52  ;;  %v1366_v55 = vrot.slane %v6093_v52, 5  ;;  %v1371_v58 = vrot.slane %v6093_v52, 3 }
 0x2c9   : > { %5227 = vmatpush3.msra.mxu0 %v1387_v53  ;;  %5234 = vmatprep.mubr.msk.f32.mxu0 %vm5821_vm0, %v5820_v1  ;;  %v2109_v53 = vld [vmem:[%s5888_s24 + $0x30] sm:$0xff] }
 0x2ca   : > { %5228 = vmatprep.subr.mxu0 %v5820_v1  ;;  %v1370_v56 = vsel %vm1367_vm5, %v1366_v55, 0.0  ;;  %v1375_v60 = vsel %vm1372_vm6, %v1371_v58, 0.0 }
 0x2cb   : > { %5229 = vmatpush3.msra.mxu0 %v1386_v54  ;;  %5224 = vmatmul.mubr.msk.f32.vlgmr.msra.gmra.mxu1 %vm1120_vm2, %v1370_v56  ;;  %v2106_v54 = vld [vmem:[%s5888_s24 + $0x18] sm:$0xff] }
 0x2cc   : > { %5230 = vmatprep.subr.mxu0 %v5820_v1  ;;  %5245 = vmatprep.mubr.msk.f32.mxu1 %vm5821_vm0, %v5820_v1 }
 0x2cd   : > { %5231 = vmatpush3.msra.mxu0 %v1385_v57  ;;  %5238 = vmatpush3.msra.mxu1 %v1636_v0  ;;  %v4798_v57 = vld [vmem:[%s5883_s19] ss:$0 sm:$0xff] }
 0x2ce   : > { %5232 = vmatprep.subr.mxu0 %v5820_v1  ;;  %5239 = vmatprep.subr.mxu1 %v5820_v1 }
 0x2cf   : > { %5233 = vmatpush3.msra.mxu0 %v1384_v59  ;;  %5240 = vmatpush3.msra.mxu1 %v1635_v3 }
 0x2d0   : > { %5235 = vmatmul.mubr.msk.f32.vlgmr.msra.gmra.mxu0 %vm1120_vm2, %v1375_v60  ;;  %5248 = vmatprep.subr.mxu0 %v5820_v1 }
 0x2d1   : > { %5256 = vmatprep.mubr.msk.f32.mxu0 %vm5821_vm0, %v5820_v1  ;;  %5249 = vmatpush3.msra.mxu0 %v1640_v2 }
 0x2d2   : > { %5250 = vmatprep.subr.mxu0 %v5820_v1  ;;  %5241 = vmatprep.subr.mxu1 %v5820_v1 }
 0x2d3   : > { %5251 = vmatpush3.msra.mxu0 %v1639_v5  ;;  %5242 = vmatpush3.msra.mxu1 %v1634_v6 }
 0x2d4   : > { %5252 = vmatprep.subr.mxu0 %v5820_v1  ;;  %5243 = vmatprep.subr.mxu1 %v5820_v1 }
 0x2d5   : > { %5253 = vmatpush3.msra.mxu0 %v1638_v7  ;;  %5244 = vmatpush3.msra.mxu1 %v1633_v19 }
 0x2d6   : > { %5254 = vmatprep.subr.mxu0 %v5820_v1  ;;  %5259 = vmatprep.subr.mxu1 %v1802_v21 }
 0x2d7   : > { %5255 = vmatpush3.msra.mxu0 %v1637_v20 }
 0x2d8   : > { %5270 = vmatprep.subr.mxu0 %v1798_v22 }
 0x388   : > { %v1457_v61 = vpop.f32.mrf.mxu0 }
 0x38a   : > { %v5214_v62 = vpop.f32.mrf.mxu0 }
 0x38b   : > { %v1530_v63 = vpop.f32.mrf.mxu1 }
 0x38c   : > { %v1531_v8 = vadd.f32 %v1530_v63, %v1457_v61 }
 0x38d   : > { %v5225_v4 = vpop.f32.mrf.mxu1 }
 0x390   : > { %v1603_v9 = vpop.f32.mrf.mxu0 }
 0x391   : > { %v1607_v11 = vadd.f32 %v1603_v9, %v1531_v8  ;;  %v2108_v9 = vld [vmem:[%s5888_s24 + $0x28] sm:$0xff] }
 0x392   : > { %v5236_v12 = vpop.f32.mrf.mxu0 }
 0x393   : > { %v1615_v13 = vadd.f32 %v4787_v10, %v1607_v11  ;;  %v2105_v10 = vld [vmem:[%s5888_s24 + $0x10] sm:$0xff]  ;;  %v2107_v11 = vld [vmem:[%s5888_s24 + $0x20] sm:$0xff]  ;;  %v2104_v12 = vld [vmem:[%s5888_s24 + $0x8] sm:$0xff] }
 0x395   : > { %v1622_v15 = vsub.f32 %v1615_v13, %v6093_v52  ;;  %v4788_v16 = vmul.f32 -1.442695, %v1615_v13  ;;  %v2114_v13 = vld [vmem:[%s5888_s24 + $0x58] sm:$0xff] }
 0x397   : > { %1624 = vrot.lane.b32.xlu1 %v1622_v15, %s5822_s15  ;;  %5679 = vpow2.f32 %v4788_v16  ;;  %v2103_v15 = vld [vmem:[%s5888_s24] sm:$0xff] }
 0x3a4   : > { %v5680_v17 = vpop.eup %5679 }
 0x3a5   : > { %v1619_v18 = vadd.f32 1.0, %v5680_v17 }
 0x3a7   : > { %5681 = vrcp.f32 %v1619_v18 }
 0x3b4   : > { %v5682_v1 = vpop.eup %5681 }
 0x409   : > { %v1625_v23 = vpop.permute.xlu1 %1624 }
 0x40a   : > { %v1627_v24 = vmul.f32 %v5682_v1, %v1625_v23 }
 0x40c   : > { %1629 = vrot.lane.b32.xlu1 %v1627_v24, %s5823_s16 }
 0x47e   : > { %v1630_v25 = vpop.permute.xlu1 %1629 }
 0x47f   : > { %v1632_v26 = vadd.f32 %v1630_v25, %v6093_v52  ;;  %v2110_v52 = vld [vmem:[%s5888_s24 + $0x38] sm:$0xff] }
 0x481   : > { %5246 = vmatmul.mubr.msk.f32.vlgmr.msra.gmra.mxu1 %vm1120_vm2, %v1632_v26  ;;  %5257 = vmatmul.mubr.msk.f32.vlgmr.msra.gmra.mxu0 %vm1120_vm2, %v1632_v26 }
 0x482   : > { %5260 = vmatpush3.msra.mxu1 %v1802_v21  ;;  %5271 = vmatpush3.msra.mxu0 %v1798_v22 }
 0x483   : > { %5261 = vmatprep.subr.mxu1 %v1801_v27  ;;  %5272 = vmatprep.subr.mxu0 %v1797_v30 }
 0x484   : > { %5262 = vmatpush3.msra.mxu1 %v1801_v27  ;;  %5273 = vmatpush3.msra.mxu0 %v1797_v30 }
 0x485   : > { %5263 = vmatprep.subr.mxu1 %v1800_v28  ;;  %5274 = vmatprep.subr.mxu0 %v1796_v31 }
 0x486   : > { %5264 = vmatpush3.msra.mxu1 %v1800_v28  ;;  %5275 = vmatpush3.msra.mxu0 %v1796_v31  ;;  %v2113_v28 = vld [vmem:[%s5888_s24 + $0x50] sm:$0xff] }
 0x487   : > { %5265 = vmatprep.subr.mxu1 %v1799_v29  ;;  %5276 = vmatprep.subr.mxu0 %v1795_v33 }
 0x488   : > { %5266 = vmatpush3.msra.mxu1 %v1799_v29  ;;  %5277 = vmatpush3.msra.mxu0 %v1795_v33  ;;  %v2111_v33 = vld [vmem:[%s5888_s24 + $0x40] sm:$0xff] }
 0x489   : > { %5281 = vmatprep.subr.mxu1 %v1806_v32  ;;  %5292 = vmatprep.subr.mxu0 %v2110_v52 }
 0x541   : > { %v1717_v35 = vpop.f32.mrf.mxu1  ;;  %v1787_v36 = vpop.f32.mrf.mxu0 }
 0x542   : > { %v6148_v37 = vadd.f32 %v4789_v34, %v1717_v35  ;;  %v6150_v38 = vadd.f32 %v4789_v34, %v1787_v36 }
 0x543   : > { %v5247_v39 = vpop.f32.mrf.mxu1  ;;  %v5258_v40 = vpop.f32.mrf.mxu0 }
 0x544   : > { %5267 = vmatprep.mubr.msk.f32.mxu1 %vm1120_vm2, %v6148_v37  ;;  %v1791_v42 = vrot.slane %v6150_v38, 7  ;;  %v1793_v46 = vrot.slane %v6148_v37, 1  ;;  %v2406_v40 = vld [vmem:[%s5898_s6 + $0x18] sm:$0xff] }
 0x545   : > { %5268 = vmatmul.mubr.msk.f32.vlgmr.msra.gmra.mxu1 %vm1120_vm2, %v6150_v38 }
 0x546   : > { %5282 = vmatpush3.msra.mxu1 %v1806_v32  ;;  %5289 = vmatprep.mubr.msk.f32.mxu1 %vm1120_vm2, %v6150_v38  ;;  %v1792_v43 = vsel %vm1099_vm3, %v1791_v42, 0.0  ;;  %v1794_v47 = vsel %vm1104_vm4, %v1793_v46, 0.0  ;;  %v2112_v32 = vld [vmem:[%s5888_s24 + $0x48] sm:$0xff]  ;;  %v2405_v42 = vld [vmem:[%s5898_s6 + $0x10] sm:$0xff]  ;;  %v4807_v46 = vld [vmem:[%s5893_s30] ss:$0 sm:$0xff] }
 0x547   : > { %5283 = vmatprep.subr.mxu1 %v1805_v41  ;;  %5278 = vmatprep.mubr.msk.f32.mxu0 %vm1120_vm2, %v1792_v43 }
 0x548   : > { %5284 = vmatpush3.msra.mxu1 %v1805_v41  ;;  %5279 = vmatmul.mubr.msk.f32.vlgmr.msra.gmra.mxu0 %vm1120_vm2, %v6148_v37  ;;  %v2410_v41 = vld [vmem:[%s5898_s6 + $0x38] sm:$0xff] }
 0x549   : > { %5285 = vmatprep.subr.mxu1 %v1804_v44  ;;  %5293 = vmatpush3.msra.mxu0 %v2110_v52 }
 0x54a   : > { %5286 = vmatpush3.msra.mxu1 %v1804_v44  ;;  %5294 = vmatprep.subr.mxu0 %v2109_v53  ;;  %v2409_v44 = vld [vmem:[%s5898_s6 + $0x30] sm:$0xff] }
 0x54b   : > { %5287 = vmatprep.subr.mxu1 %v1803_v45  ;;  %5295 = vmatpush3.msra.mxu0 %v2109_v53 }
 0x54c   : > { %5288 = vmatpush3.msra.mxu1 %v1803_v45  ;;  %5296 = vmatprep.subr.mxu0 %v2108_v9 }
 0x54d   : > { %5290 = vmatmul.mubr.msk.f32.vlgmr.msra.gmra.mxu1 %vm1120_vm2, %v1794_v47  ;;  %5303 = vmatprep.subr.mxu1 %v2106_v54 }
 0x54e   : > { %5304 = vmatpush3.msra.mxu1 %v2106_v54  ;;  %5297 = vmatpush3.msra.mxu0 %v2108_v9 }
 0x54f   : > { %5305 = vmatprep.subr.mxu1 %v2105_v10  ;;  %5298 = vmatprep.subr.mxu0 %v2107_v11 }
 0x550   : > { %5306 = vmatpush3.msra.mxu1 %v2105_v10  ;;  %5299 = vmatpush3.msra.mxu0 %v2107_v11 }
 0x551   : > { %5307 = vmatprep.subr.mxu1 %v2104_v12  ;;  %5314 = vmatprep.subr.mxu0 %v2114_v13 }
 0x552   : > { %5308 = vmatpush3.msra.mxu1 %v2104_v12 }
 0x553   : > { %5309 = vmatprep.subr.mxu1 %v2103_v15 }
 0x554   : > { %5310 = vmatpush3.msra.mxu1 %v2103_v15  ;;  %v2584_v15 = vld [vmem:[%s6605_s18 + $0x30] sm:$0xff] }
 0x555   : > { %5325 = vmatprep.subr.mxu1 %v2406_v40 }
 0x605   : > { %v5269_v48 = vpop.f32.mrf.mxu1 }
 0x607   : > { %v1879_v50 = vpop.f32.mrf.mxu1 }
 0x608   : > { %v5280_v49 = vpop.f32.mrf.mxu0 }
 0x609   : > { %v1963_v55 = vadd.f32 %v5280_v49, %v5269_v48 }
 0x60a   : > { %v1957_v51 = vpop.f32.mrf.mxu0 }
 0x60b   : > { %v1958_v58 = vadd.f32 %v1957_v51, %v1879_v50 }
 0x60d   : > { %v5291_v56 = vpop.f32.mrf.mxu1 }
 0x60e   : > { %v2045_v59 = vadd.f32 %v5291_v56, %v1963_v55 }
 0x60f   : > { %v2035_v60 = vpop.f32.mrf.mxu1 }
 0x610   : > { %v2054_v61 = vadd.f32 %v4798_v57, %v2045_v59  ;;  %v2044_v62 = vadd.f32 %v2035_v60, %v1958_v58 }
 0x612   : > { %v2053_v63 = vadd.f32 %v4798_v57, %v2044_v62  ;;  %v2068_v0 = vsub.f32 %v2054_v61, %v6150_v38  ;;  %v4800_v3 = vmul.f32 -1.442695, %v2054_v61  ;;  %v2404_v61 = vld [vmem:[%s5898_s6 + $0x8] sm:$0xff] }
 0x613   : > { %v2408_v62 = vld [vmem:[%s5898_s6 + $0x28] sm:$0xff] }
 0x614   : > { %2073 = vrot.lane.b32.xlu1 %v2068_v0, %s5822_s15  ;;  %v2067_v2 = vsub.f32 %v2053_v63, %v6148_v37  ;;  %v4799_v4 = vmul.f32 -1.442695, %v2053_v63  ;;  %5683 = vpow2.f32 %v4800_v3  ;;  %v2403_v63 = vld [vmem:[%s5898_s6] sm:$0xff]  ;;  %v2581_v3 = vld [vmem:[%s6605_s18 + $0x18] sm:$0xff] }
 0x615   : > { %v2407_v0 = vld [vmem:[%s5898_s6 + $0x20] sm:$0xff] }
 0x616   : > { %2071 = vrot.lane.b32.xlu0 %v2067_v2, %s5822_s15  ;;  %5685 = vpow2.f32 %v4799_v4  ;;  %v2585_v2 = vld [vmem:[%s6605_s18 + $0x38] sm:$0xff] }
 0x621   : > { %v5684_v5 = vpop.eup %5683 }
 0x622   : > { %v2062_v7 = vadd.f32 1.0, %v5684_v5 }
 0x623   : > { %v5686_v6 = vpop.eup %5685 }
 0x624   : > { %v2061_v8 = vadd.f32 1.0, %v5686_v6  ;;  %5687 = vrcp.f32 %v2062_v7 }
 0x626   : > { %5689 = vrcp.f32 %v2061_v8 }
 0x631   : > { %v5688_v16 = vpop.eup %5687 }
 0x633   : > { %v5690_v19 = vpop.eup %5689 }
 0x686   : > { %v2074_v17 = vpop.permute.xlu1 %2073 }
 0x687   : > { %v2078_v18 = vmul.f32 %v5688_v16, %v2074_v17  ;;  %v2580_v16 = vld [vmem:[%s6605_s18 + $0x10] sm:$0xff]  ;;  %v2583_v17 = vld [vmem:[%s6605_s18 + $0x28] sm:$0xff] }
 0x688   : > { %v2072_v20 = vpop.permute.xlu0 %2071 }
 0x689   : > { %v2077_v21 = vmul.f32 %v5690_v19, %v2072_v20  ;;  %2083 = vrot.lane.b32.xlu1 %v2078_v18, %s5823_s16  ;;  %v2579_v18 = vld [vmem:[%s6605_s18 + $0x8] sm:$0xff]  ;;  %v2582_v19 = vld [vmem:[%s6605_s18 + $0x20] sm:$0xff] }
 0x68a   : > { %v2578_v20 = vld [vmem:[%s6605_s18] sm:$0xff] }
 0x68b   : > { %2081 = vrot.lane.b32.xlu0 %v2077_v21, %s5823_s16  ;;  %v2589_v21 = vld [vmem:[%s6605_s18 + $0x58] sm:$0xff] }
 0x6fb   : > { %v2084_v22 = vpop.permute.xlu1 %2083 }
 0x6fc   : > { %v6188_v1 = vadd.f32 %v2084_v22, %v6150_v38  ;;  %v4810_v22 = vld [vmem:[%s6606_s22] ss:$0 sm:$0xff]  ;;  %s6615_s22 = sld [smem:[#allocation12_spill]] }
 0x6fd   : > { %v2082_v23 = vpop.permute.xlu0 %2081 }
 0x6fe   : > { %v6192_v24 = vadd.f32 %v2082_v23, %v6148_v37  ;;  %v2089_v25 = vrot.slane %v6188_v1, 6  ;;  %v2096_v26 = vrot.slane %v6188_v1, 1 }
 0x700   : > { %5300 = vmatprep.mubr.msk.f32.mxu0 %vm1120_vm2, %v6192_v24  ;;  %v2093_v27 = vsel %vm2090_vm7, %v2089_v25, 0.0  ;;  %v2097_v29 = vsel %vm1104_vm4, %v2096_v26, 0.0  ;;  %v2094_v30 = vrot.slane %v6192_v24, 7  ;;  %v2098_v34 = vrot.slane %v6192_v24, 2 }
 0x701   : > { %5301 = vmatmul.mubr.msk.f32.vlgmr.msra.gmra.mxu0 %vm1120_vm2, %v6188_v1  ;;  %5311 = vmatprep.mubr.msk.f32.mxu1 %vm1120_vm2, %v2093_v27 }
 0x702   : > { %5315 = vmatpush3.msra.mxu0 %v2114_v13  ;;  %5322 = vmatprep.mubr.msk.f32.mxu0 %vm1120_vm2, %v2097_v29  ;;  %v2095_v31 = vsel %vm1099_vm3, %v2094_v30, 0.0  ;;  %v2102_v35 = vsel %vm2099_vm8, %v2098_v34, 0.0  ;;  %v2586_v34 = vld [vmem:[%s6605_s18 + $0x40] sm:$0xff] }
 0x703   : > { %5316 = vmatprep.subr.mxu0 %v2113_v28  ;;  %5312 = vmatmul.mubr.msk.f32.vlgmr.msra.gmra.mxu1 %vm1120_vm2, %v2095_v31 }
 0x704   : > { %5317 = vmatpush3.msra.mxu0 %v2113_v28  ;;  %5326 = vmatpush3.msra.mxu1 %v2406_v40 }
 0x705   : > { %5318 = vmatprep.subr.mxu0 %v2112_v32  ;;  %5327 = vmatprep.subr.mxu1 %v2405_v42 }
 0x706   : > { %5319 = vmatpush3.msra.mxu0 %v2112_v32  ;;  %5328 = vmatpush3.msra.mxu1 %v2405_v42  ;;  %v2588_v32 = vld [vmem:[%s6605_s18 + $0x50] sm:$0xff] }
 0x707   : > { %5320 = vmatprep.subr.mxu0 %v2111_v33  ;;  %5329 = vmatprep.subr.mxu1 %v2404_v61 }
 0x708   : > { %5321 = vmatpush3.msra.mxu0 %v2111_v33  ;;  %5330 = vmatpush3.msra.mxu1 %v2404_v61  ;;  %v2587_v33 = vld [vmem:[%s6605_s18 + $0x48] sm:$0xff] }
 0x709   : > { %5323 = vmatmul.mubr.msk.f32.vlgmr.msra.gmra.mxu0 %vm1120_vm2, %v2102_v35  ;;  %5336 = vmatprep.subr.mxu0 %v2410_v41 }
 0x70a   : > { %5337 = vmatpush3.msra.mxu0 %v2410_v41  ;;  %5331 = vmatprep.subr.mxu1 %v2403_v63 }
 0x70b   : > { %5338 = vmatprep.subr.mxu0 %v2409_v44  ;;  %5332 = vmatpush3.msra.mxu1 %v2403_v63 }
 0x70c   : > { %5339 = vmatpush3.msra.mxu0 %v2409_v44  ;;  %5347 = vmatprep.subr.mxu1 %v2585_v2 }
 0x70d   : > { %5340 = vmatprep.subr.mxu0 %v2408_v62 }
 0x70e   : > { %5341 = vmatpush3.msra.mxu0 %v2408_v62 }
 0x70f   : > { %5342 = vmatprep.subr.mxu0 %v2407_v0 }
 0x710   : > { %5343 = vmatpush3.msra.mxu0 %v2407_v0 }
 0x711   : > { %5361 = vmatprep.subr.mxu0 %v2581_v3 }
 0x7c1   : > { %v5302_v36 = vpop.f32.mrf.mxu0 }
 0x7c3   : > { %v5313_v37 = vpop.f32.mrf.mxu1  ;;  %v2187_v38 = vpop.f32.mrf.mxu0 }
 0x7c4   : > { %v2274_v43 = vadd.f32 %v5313_v37, %v5302_v36 }
 0x7c5   : > { %v2268_v39 = vpop.f32.mrf.mxu1 }
 0x7c6   : > { %v2269_v47 = vadd.f32 %v2268_v39, %v2187_v38 }
 0x7c9   : > { %v5324_v45 = vpop.f32.mrf.mxu0 }
 0x7ca   : > { %v2359_v48 = vadd.f32 %v5324_v45, %v2274_v43 }
 0x7cb   : > { %v2349_v49 = vpop.f32.mrf.mxu0 }
 0x7cc   : > { %v2368_v50 = vadd.f32 %v4807_v46, %v2359_v48  ;;  %v2358_v51 = vadd.f32 %v2349_v49, %v2269_v47 }
 0x7ce   : > { %v2367_v52 = vadd.f32 %v4807_v46, %v2358_v51  ;;  %v2382_v53 = vsub.f32 %v2368_v50, %v6188_v1  ;;  %v4809_v55 = vmul.f32 -1.442695, %v2368_v50  ;;  %v4827_v46 = vld [vmem:[%s6607_s23] ss:$0 sm:$0xff]  ;;  %s6616_s23 = sld [smem:[#allocation13_spill]] }
 0x7d0   : > { %2387 = vrot.lane.b32.xlu1 %v2382_v53, %s5822_s15  ;;  %v2381_v54 = vsub.f32 %v2367_v52, %v6192_v24  ;;  %v4808_v56 = vmul.f32 -1.442695, %v2367_v52  ;;  %5691 = vpow2.f32 %v4809_v55  ;;  %v2964_v55 = vld [vmem:[%s6608_s26 + $0x30] sm:$0xff] }
 0x7d2   : > { %2385 = vrot.lane.b32.xlu0 %v2381_v54, %s5822_s15  ;;  %5693 = vpow2.f32 %v4808_v56  ;;  %v2965_v54 = vld [vmem:[%s6608_s26 + $0x38] sm:$0xff] }
 0x7dd   : > { %v5692_v57 = vpop.eup %5691 }
 0x7de   : > { %v2376_v59 = vadd.f32 1.0, %v5692_v57 }
 0x7df   : > { %v5694_v58 = vpop.eup %5693 }
 0x7e0   : > { %v2375_v60 = vadd.f32 1.0, %v5694_v58  ;;  %5695 = vrcp.f32 %v2376_v59 }
 0x7e2   : > { %5697 = vrcp.f32 %v2375_v60 }
 0x7ed   : > { %v5696_v4 = vpop.eup %5695 }
 0x7ef   : > { %v5698_v7 = vpop.eup %5697 }
 0x842   : > { %v2388_v5 = vpop.permute.xlu1 %2387 }
 0x843   : > { %v2392_v6 = vmul.f32 %v5696_v4, %v2388_v5 }
 0x844   : > { %v2386_v8 = vpop.permute.xlu0 %2385 }
 0x845   : > { %v2391_v9 = vmul.f32 %v5698_v7, %v2386_v8  ;;  %2397 = vrot.lane.b32.xlu1 %v2392_v6, %s5823_s16 }
 0x847   : > { %2395 = vrot.lane.b32.xlu0 %v2391_v9, %s5823_s16 }
 0x8b7   : > { %v2398_v10 = vpop.permute.xlu1 %2397 }
 0x8b8   : > { %v2402_v13 = vadd.f32 %v2398_v10, %v6188_v1 }
 0x8b9   : > { %v2396_v11 = vpop.permute.xlu0 %2395 }
 0x8ba   : > { %v2401_v12 = vadd.f32 %v2396_v11, %v6192_v24 }
 0x8bc   : > { %5333 = vmatprep.mubr.msk.f32.mxu1 %vm1120_vm2, %v2401_v12  ;;  %5344 = vmatprep.mubr.msk.f32.mxu0 %vm1120_vm2, %v2401_v12 }
 0x8bd   : > { %5334 = vmatmul.mubr.msk.f32.vlgmr.msra.gmra.mxu1 %vm1120_vm2, %v2402_v13  ;;  %5345 = vmatmul.mubr.msk.f32.vlgmr.msra.gmra.mxu0 %vm1120_vm2, %v2402_v13 }
 0x8be   : > { %5348 = vmatpush3.msra.mxu1 %v2585_v2  ;;  %5362 = vmatpush3.msra.mxu0 %v2581_v3 }
 0x8bf   : > { %5349 = vmatprep.subr.mxu1 %v2584_v15  ;;  %5363 = vmatprep.subr.mxu0 %v2580_v16 }
 0x8c0   : > { %5350 = vmatpush3.msra.mxu1 %v2584_v15  ;;  %5364 = vmatpush3.msra.mxu0 %v2580_v16 }
 0x8c1   : > { %5351 = vmatprep.subr.mxu1 %v2583_v17  ;;  %5365 = vmatprep.subr.mxu0 %v2579_v18 }
 0x8c2   : > { %5352 = vmatpush3.msra.mxu1 %v2583_v17  ;;  %5366 = vmatpush3.msra.mxu0 %v2579_v18  ;;  %v2963_v18 = vld [vmem:[%s6608_s26 + $0x28] sm:$0xff] }
 0x8c3   : > { %5353 = vmatprep.subr.mxu1 %v2582_v19  ;;  %5367 = vmatprep.subr.mxu0 %v2578_v20 }
 0x8c4   : > { %5354 = vmatpush3.msra.mxu1 %v2582_v19  ;;  %5368 = vmatpush3.msra.mxu0 %v2578_v20  ;;  %v2962_v19 = vld [vmem:[%s6608_s26 + $0x20] sm:$0xff]  ;;  %v2961_v20 = vld [vmem:[%s6608_s26 + $0x18] sm:$0xff] }
 0x8c5   : > { %5375 = vmatprep.subr.mxu1 %v2589_v21  ;;  %5389 = vmatprep.subr.mxu0 %v2965_v54 }
 0x97d   : > { %v5335_v1 = vpop.f32.mrf.mxu1  ;;  %v5346_v23 = vpop.f32.mrf.mxu0 }
 0x97e   : > { %v6245_v24 = vadd.f32 %v5346_v23, %v4810_v22  ;;  %v6252_v30 = vadd.f32 %v5335_v1, %v4810_v22  ;;  %v2959_v1 = vld [vmem:[%s6608_s26 + $0x8] sm:$0xff]  ;;  %v2958_v23 = vld [vmem:[%s6608_s26] sm:$0xff] }
 0x97f   : > { %v2490_v25 = vpop.f32.mrf.mxu1  ;;  %v2565_v26 = vpop.f32.mrf.mxu0 }
 0x980   : > { %v6247_v27 = vadd.f32 %v4810_v22, %v2490_v25  ;;  %v6249_v28 = vadd.f32 %v4810_v22, %v2565_v26  ;;  %v2574_v29 = vrot.slane %v6245_v24, 7  ;;  %v2969_v22 = vld [vmem:[%s6608_s26 + $0x58] sm:$0xff] }
 0x982   : > { %5355 = vmatprep.mubr.msk.f32.mxu1 %vm1120_vm2, %v6247_v27  ;;  %v2575_v31 = vsel %vm1099_vm3, %v2574_v29, 0.0  ;;  %v2576_v35 = vrot.slane %v6247_v27, 1 }
 0x983   : > { %5356 = vmatmul.mubr.msk.f32.vlgmr.msra.gmra.mxu1 %vm1120_vm2, %v6249_v28  ;;  %5369 = vmatprep.mubr.msk.f32.mxu0 %vm1120_vm2, %v2575_v31 }
 0x984   : > { %5376 = vmatpush3.msra.mxu1 %v2589_v21  ;;  %5358 = vmatprep.mubr.msk.f32.mxu1 %vm1120_vm2, %v6252_v30  ;;  %v2577_v36 = vsel %vm1104_vm4, %v2576_v35, 0.0  ;;  %v2960_v21 = vld [vmem:[%s6608_s26 + $0x10] sm:$0xff] }
 0x985   : > { %5370 = vmatmul.mubr.msk.f32.vlgmr.msra.gmra.mxu0 %vm1120_vm2, %v6247_v27  ;;  %5377 = vmatprep.subr.mxu1 %v2588_v32 }
 0x986   : > { %5372 = vmatprep.mubr.msk.f32.mxu0 %vm1120_vm2, %v6249_v28  ;;  %5378 = vmatpush3.msra.mxu1 %v2588_v32 }
 0x987   : > { %5379 = vmatprep.subr.mxu1 %v2587_v33  ;;  %5359 = vmatmul.mubr.msk.f32.gmra.mxu1 %vm1120_vm2, %v6245_v24 }
 0x988   : > { %5380 = vmatpush3.msra.mxu1 %v2587_v33  ;;  %5383 = vmatprep.mubr.msk.f32.mxu1 %vm1120_vm2, %v6249_v28 }
 0x989   : > { %5373 = vmatmul.mubr.msk.f32.gmra.mxu0 %vm1120_vm2, %v6252_v30  ;;  %5381 = vmatprep.subr.mxu1 %v2586_v34 }
 0x98a   : > { %5382 = vmatpush3.msra.mxu1 %v2586_v34  ;;  %5390 = vmatpush3.msra.mxu0 %v2965_v54 }
 0x98b   : > { %5384 = vmatmul.mubr.msk.f32.vlgmr.msra.gmra.mxu1 %vm1120_vm2, %v6252_v30  ;;  %5391 = vmatprep.subr.mxu0 %v2964_v55 }
 0x98c   : > { %5386 = vmatprep.mubr.msk.f32.mxu1 %vm1120_vm2, %v6245_v24  ;;  %5392 = vmatpush3.msra.mxu0 %v2964_v55 }
 0x98d   : > { %5393 = vmatprep.subr.mxu0 %v2963_v18  ;;  %5403 = vmatprep.subr.mxu1 %v2961_v20 }
 0x98e   : > { %5394 = vmatpush3.msra.mxu0 %v2963_v18  ;;  %5404 = vmatpush3.msra.mxu1 %v2961_v20 }
 0x98f   : > { %5387 = vmatmul.mubr.msk.f32.gmra.mxu1 %vm1120_vm2, %v2577_v36  ;;  %5395 = vmatprep.subr.mxu0 %v2962_v19 }
 0x990   : > { %5396 = vmatpush3.msra.mxu0 %v2962_v19  ;;  %5405 = vmatprep.subr.mxu1 %v2960_v21 }
 0x991   : > { %5417 = vmatprep.subr.mxu0 %v2969_v22  ;;  %5406 = vmatpush3.msra.mxu1 %v2960_v21 }
 0x992   : > { %5407 = vmatprep.subr.mxu1 %v2959_v1 }
 0x993   : > { %5408 = vmatpush3.msra.mxu1 %v2959_v1 }
 0x994   : > { %5409 = vmatprep.subr.mxu1 %v2958_v23 }
 0x995   : > { %5410 = vmatpush3.msra.mxu1 %v2958_v23 }
 0xa43   : > { %v5357_v37 = vpop.f32.mrf.mxu1 }
 0xa45   : > { %v5371_v38 = vpop.f32.mrf.mxu0  ;;  %v2668_v39 = vpop.f32.mrf.mxu1 }
 0xa46   : > { %v2762_v44 = vadd.f32 %v5371_v38, %v5357_v37 }
 0xa47   : > { %v2756_v40 = vpop.f32.mrf.mxu0  ;;  %v5360_v41 = vpop.f32.mrf.mxu1 }
 0xa48   : > { %v2757_v47 = vadd.f32 %v2756_v40, %v2668_v39 }
 0xa49   : > { %v5374_v42 = vpop.f32.mrf.mxu0  ;;  %v2678_v43 = vpop.f32.mrf.mxu1 }
 0xa4a   : > { %v2772_v51 = vadd.f32 %v5374_v42, %v5360_v41 }
 0xa4b   : > { %v5385_v45 = vpop.f32.mrf.mxu1  ;;  %v2766_v49 = vpop.f32.mrf.mxu0 }
 0xa4c   : > { %v2864_v48 = vadd.f32 %v5385_v45, %v2762_v44  ;;  %v2767_v57 = vadd.f32 %v2766_v49, %v2678_v43  ;;  %v2967_v49 = vld [vmem:[%s6608_s26 + $0x48] sm:$0xff] }
 0xa4d   : > { %v2844_v50 = vpop.f32.mrf.mxu1 }
 0xa4e   : > { %v2875_v52 = vadd.f32 %v4827_v46, %v2864_v48  ;;  %v2863_v53 = vadd.f32 %v2844_v50, %v2757_v47  ;;  %v2966_v50 = vld [vmem:[%s6608_s26 + $0x40] sm:$0xff] }
 0xa4f   : > { %v5388_v56 = vpop.f32.mrf.mxu1 }
 0xa50   : > { %v2874_v58 = vadd.f32 %v4827_v46, %v2863_v53  ;;  %v2866_v59 = vadd.f32 %v5388_v56, %v2772_v51  ;;  %v2903_v60 = vsub.f32 %v2875_v52, %v6249_v28  ;;  %v4829_v5 = vmul.f32 -1.442695, %v2875_v52 }
 0xa51   : > { %v2854_v61 = vpop.f32.mrf.mxu1 }
 0xa52   : > { %v2877_v62 = vadd.f32 %v4827_v46, %v2866_v59  ;;  %v2865_v63 = vadd.f32 %v2854_v61, %v2767_v57  ;;  %2912 = vrot.lane.b32.xlu1 %v2903_v60, %s5822_s15  ;;  %v2902_v0 = vsub.f32 %v2874_v58, %v6247_v27  ;;  %v4828_v6 = vmul.f32 -1.442695, %v2874_v58 }
 0xa53   : > { %5699 = vpow2.f32 %v4829_v5 }
 0xa54   : > { %v2876_v2 = vadd.f32 %v4827_v46, %v2865_v63  ;;  %v2905_v3 = vsub.f32 %v2877_v62, %v6245_v24  ;;  %2910 = vrot.lane.b32.xlu0 %v2902_v0, %s5822_s15  ;;  %v4831_v7 = vmul.f32 -1.442695, %v2877_v62  ;;  %5701 = vpow2.f32 %v4828_v6 }
 0xa56   : > { %2916 = vrot.lane.b32.xlu1 %v2905_v3, %s5822_s15  ;;  %v2904_v4 = vsub.f32 %v2876_v2, %v6252_v30  ;;  %v4830_v8 = vmul.f32 -1.442695, %v2876_v2  ;;  %5703 = vpow2.f32 %v4831_v7 }
 0xa58   : > { %2914 = vrot.lane.b32.xlu0 %v2904_v4, %s5822_s15  ;;  %5705 = vpow2.f32 %v4830_v8  ;;  %v4844_v4 = vld [vmem:[%s6609_s28] ss:$0 sm:$0xff]  ;;  %s6617_s28 = sld [smem:[#allocation15_spill]] }
 0xa60   : > { %v5700_v9 = vpop.eup %5699 }
 0xa61   : > { %v5702_v10 = vpop.eup %5701  ;;  %v2891_v11 = vadd.f32 1.0, %v5700_v9 }
 0xa62   : > { %v2890_v13 = vadd.f32 1.0, %v5702_v10 }
 0xa63   : > { %v5704_v12 = vpop.eup %5703  ;;  %5707 = vrcp.f32 %v2891_v11 }
 0xa64   : > { %v2893_v16 = vadd.f32 1.0, %v5704_v12  ;;  %5709 = vrcp.f32 %v2890_v13  ;;  %v3341_v12 = vld [vmem:[%s6610_s1 + $0x18] sm:$0xff]  ;;  %v3340_v13 = vld [vmem:[%s6610_s1 + $0x10] sm:$0xff] }
 0xa65   : > { %v5706_v15 = vpop.eup %5705  ;;  %5431 = vmatprep.subr.mxu1 %v3341_v12 }
 0xa66   : > { %v2892_v17 = vadd.f32 1.0, %v5706_v15  ;;  %5711 = vrcp.f32 %v2893_v16 }
 0xa68   : > { %5713 = vrcp.f32 %v2892_v17 }
 0xa70   : > { %v5708_v25 = vpop.eup %5707 }
 0xa71   : > { %v5710_v31 = vpop.eup %5709 }
 0xa73   : > { %v5712_v33 = vpop.eup %5711 }
 0xa75   : > { %v5714_v37 = vpop.eup %5713 }
 0xac4   : > { %v2913_v26 = vpop.permute.xlu1 %2912 }
 0xac5   : > { %v2923_v29 = vmul.f32 %v5708_v25, %v2913_v26 }
 0xac6   : > { %v2911_v32 = vpop.permute.xlu0 %2910 }
 0xac7   : > { %2932 = vrot.lane.b32.xlu1 %v2923_v29, %s5823_s16  ;;  %v2922_v34 = vmul.f32 %v5710_v31, %v2911_v32 }
 0xac8   : > { %v2917_v35 = vpop.permute.xlu1 %2916 }
 0xac9   : > { %v2925_v36 = vmul.f32 %v5712_v33, %v2917_v35  ;;  %2930 = vrot.lane.b32.xlu0 %v2922_v34, %s5823_s16 }
 0xaca   : > { %v2915_v38 = vpop.permute.xlu0 %2914 }
 0xacb   : > { %2936 = vrot.lane.b32.xlu1 %v2925_v36, %s5823_s16  ;;  %v2924_v39 = vmul.f32 %v5714_v37, %v2915_v38 }
 0xacd   : > { %2934 = vrot.lane.b32.xlu0 %v2924_v39, %s5823_s16 }
 0xb39   : > { %v2933_v40 = vpop.permute.xlu1 %2932 }
 0xb3a   : > { %v6307_v41 = vadd.f32 %v2933_v40, %v6249_v28  ;;  %v2968_v28 = vld [vmem:[%s6608_s26 + $0x50] sm:$0xff] }
 0xb3b   : > { %v2931_v42 = vpop.permute.xlu0 %2930 }
 0xb3c   : > { %v2946_v43 = vrot.slane %v6307_v41, 7  ;;  %v6311_v44 = vadd.f32 %v2931_v42, %v6247_v27 }
 0xb3d   : > { %v2937_v45 = vpop.permute.xlu1 %2936 }
 0xb3e   : > { %v6314_v46 = vadd.f32 %v2937_v45, %v6245_v24  ;;  %v2947_v47 = vsel %vm1099_vm3, %v2946_v43, 0.0  ;;  %5397 = vmatprep.mubr.msk.f32.mxu0 %vm1120_vm2, %v6311_v44  ;;  %v2952_v52 = vrot.slane %v6311_v44, 1  ;;  %v3339_v45 = vld [vmem:[%s6610_s1 + $0x8] sm:$0xff] }
 0xb3f   : > { %5411 = vmatprep.mubr.msk.f32.mxu1 %vm1120_vm2, %v2947_v47  ;;  %5398 = vmatmul.mubr.msk.f32.vlgmr.msra.gmra.mxu0 %vm1120_vm2, %v6307_v41  ;;  %v2935_v48 = vpop.permute.xlu0 %2934  ;;  %v3338_v47 = vld [vmem:[%s6610_s1] sm:$0xff] }
 0xb40   : > { %5418 = vmatpush3.msra.mxu0 %v2969_v22  ;;  %v6325_v27 = vadd.f32 %v2935_v48, %v6252_v30  ;;  %v2950_v24 = vrot.slane %v6314_v46, 7  ;;  %v2954_v30 = vrot.slane %v6307_v41, 1  ;;  %v2953_v55 = vsel %vm1104_vm4, %v2952_v52, 0.0  ;;  %v3464_v48 = vld [vmem:[%s6611_s2 + $0x70] sm:$0xff]  ;;  %v3463_v52 = vld [vmem:[%s6611_s2 + $0x68] sm:$0xff] }
 0xb41   : > { %5419 = vmatprep.subr.mxu0 %v2968_v28 }
 0xb42   : > { %5420 = vmatpush3.msra.mxu0 %v2968_v28  ;;  %5400 = vmatprep.mubr.msk.f32.mxu0 %vm1120_vm2, %v6325_v27  ;;  %v2948_v51 = vrot.slane %v6325_v27, 7  ;;  %v2951_v54 = vsel %vm1099_vm3, %v2950_v24, 0.0  ;;  %v2956_v56 = vrot.slane %v6325_v27, 1  ;;  %v2955_v57 = vsel %vm1104_vm4, %v2954_v30, 0.0  ;;  %v3465_v28 = vld [vmem:[%s6611_s2 + $0x78] sm:$0xff] }
 0xb43   : > { %5421 = vmatprep.subr.mxu0 %v2967_v49  ;;  %5401 = vmatmul.mubr.msk.f32.gmra.mxu0 %vm1120_vm2, %v6314_v46 }
 0xb44   : > { %5422 = vmatpush3.msra.mxu0 %v2967_v49  ;;  %5425 = vmatprep.mubr.msk.f32.mxu0 %vm1120_vm2, %v6314_v46  ;;  %v2949_v53 = vsel %vm1099_vm3, %v2948_v51, 0.0  ;;  %v2957_v58 = vsel %vm1104_vm4, %v2956_v56, 0.0 }
 0xb45   : > { %5423 = vmatprep.subr.mxu0 %v2966_v50  ;;  %5412 = vmatmul.mubr.msk.f32.vlgmr.msra.gmra.mxu1 %vm1120_vm2, %v2949_v53 }
 0xb46   : > { %5424 = vmatpush3.msra.mxu0 %v2966_v50  ;;  %5414 = vmatprep.mubr.msk.f32.mxu1 %vm1120_vm2, %v2951_v54  ;;  %v3457_v50 = vld [vmem:[%s6611_s2 + $0x38] sm:$0xff] }
 0xb47   : > { %5426 = vmatmul.mubr.msk.f32.vlgmr.msra.gmra.mxu0 %vm1120_vm2, %v2953_v55  ;;  %5432 = vmatpush3.msra.mxu1 %v3341_v12  ;;  %v3462_v55 = vld [vmem:[%s6611_s2 + $0x60] sm:$0xff]  ;;  %v3473_v12 = vld [vmem:[%s6611_s2 + $0xb8] sm:$0xff] }
 0xb48   : > { %5428 = vmatprep.mubr.msk.f32.mxu0 %vm1120_vm2, %v2955_v57  ;;  %5433 = vmatprep.subr.mxu1 %v3340_v13 }
 0xb49   : > { %5415 = vmatmul.mubr.msk.f32.gmra.mxu1 %vm1120_vm2, %v6311_v44  ;;  %5445 = vmatprep.subr.mxu0 %v3465_v28 }
 0xb4a   : > { %5434 = vmatpush3.msra.mxu1 %v3340_v13  ;;  %5446 = vmatpush3.msra.mxu0 %v3465_v28  ;;  %v3451_v13 = vld [vmem:[%s6611_s2 + $0x8] sm:$0xff] }
 0xb4b   : > { %5429 = vmatmul.mubr.msk.f32.gmra.mxu0 %vm1120_vm2, %v2957_v58  ;;  %5435 = vmatprep.subr.mxu1 %v3339_v45 }
 0xb4c   : > { %5436 = vmatpush3.msra.mxu1 %v3339_v45  ;;  %5447 = vmatprep.subr.mxu0 %v3464_v48 }
 0xb4d   : > { %5437 = vmatprep.subr.mxu1 %v3338_v47  ;;  %5448 = vmatpush3.msra.mxu0 %v3464_v48 }
 0xb4e   : > { %5438 = vmatpush3.msra.mxu1 %v3338_v47  ;;  %5449 = vmatprep.subr.mxu0 %v3463_v52 }
 0xb4f   : > { %5467 = vmatprep.subr.mxu1 %v3457_v50  ;;  %5450 = vmatpush3.msra.mxu0 %v3463_v52 }
 0xb50   : > { %5451 = vmatprep.subr.mxu0 %v3462_v55 }
 0xb51   : > { %5452 = vmatpush3.msra.mxu0 %v3462_v55 }
 0xbff   : > { %v5399_v59 = vpop.f32.mrf.mxu0 }
 0xc01   : > { %v3048_v60 = vpop.f32.mrf.mxu0 }
 0xc03   : > { %v5402_v61 = vpop.f32.mrf.mxu0 }
 0xc05   : > { %v3058_v62 = vpop.f32.mrf.mxu0  ;;  %v5413_v63 = vpop.f32.mrf.mxu1 }
 0xc06   : > { %v3148_v0 = vadd.f32 %v5413_v63, %v5399_v59  ;;  %v3461_v59 = vld [vmem:[%s6611_s2 + $0x58] sm:$0xff]  ;;  %v3460_v63 = vld [vmem:[%s6611_s2 + $0x50] sm:$0xff] }
 0xc07   : > { %v3142_v2 = vpop.f32.mrf.mxu1  ;;  %v5427_v3 = vpop.f32.mrf.mxu0  ;;  %5453 = vmatprep.subr.mxu0 %v3461_v59 }
 0xc08   : > { %v3143_v5 = vadd.f32 %v3142_v2, %v3048_v60  ;;  %v3256_v6 = vadd.f32 %v5427_v3, %v3148_v0  ;;  %5454 = vmatpush3.msra.mxu0 %v3461_v59 }
 0xc09   : > { %v5416_v7 = vpop.f32.mrf.mxu1  ;;  %v3236_v8 = vpop.f32.mrf.mxu0  ;;  %5455 = vmatprep.subr.mxu0 %v3460_v63 }
 0xc0a   : > { %v3267_v9 = vadd.f32 %v4844_v4, %v3256_v6  ;;  %v3158_v10 = vadd.f32 %v5416_v7, %v5402_v61  ;;  %v3255_v11 = vadd.f32 %v3236_v8, %v3143_v5  ;;  %5456 = vmatpush3.msra.mxu0 %v3460_v63  ;;  %v3456_v6 = vld [vmem:[%s6611_s2 + $0x30] sm:$0xff] }
 0xc0b   : > { %v3152_v15 = vpop.f32.mrf.mxu1  ;;  %v5430_v16 = vpop.f32.mrf.mxu0 }
 0xc0c   : > { %v3266_v17 = vadd.f32 %v4844_v4, %v3255_v11  ;;  %v3153_v18 = vadd.f32 %v3152_v15, %v3058_v62  ;;  %v3258_v19 = vadd.f32 %v5430_v16, %v3158_v10  ;;  %v3295_v21 = vsub.f32 %v3267_v9, %v6307_v41  ;;  %v3452_v11 = vld [vmem:[%s6611_s2 + $0x10] sm:$0xff]  ;;  %v3450_v15 = vld [vmem:[%s6611_s2] sm:$0xff] }
 0xc0d   : > { %v3246_v20 = vpop.f32.mrf.mxu0  ;;  %v4846_v31 = vmul.f32 -1.442695, %v3267_v9  ;;  %v3455_v9 = vld [vmem:[%s6611_s2 + $0x28] sm:$0xff] }
 0xc0e   : > { %v3269_v22 = vadd.f32 %v4844_v4, %v3258_v19  ;;  %v3257_v1 = vadd.f32 %v3246_v20, %v3153_v18  ;;  %3304 = vrot.lane.b32.xlu1 %v3295_v21, %s5822_s15  ;;  %v3294_v23 = vsub.f32 %v3266_v17, %v6311_v44  ;;  %v4845_v32 = vmul.f32 -1.442695, %v3266_v17  ;;  %v4849_v17 = vld [vmem:[%s6612_s0] ss:$0 sm:$0xff]  ;;  %s6618_s0 = sld [smem:[#allocation17_spill]] }
 0xc0f   : > { %5715 = vpow2.f32 %v4846_v31 }
 0xc10   : > { %v3268_v25 = vadd.f32 %v4844_v4, %v3257_v1  ;;  %v3297_v26 = vsub.f32 %v3269_v22, %v6314_v46  ;;  %3302 = vrot.lane.b32.xlu0 %v3294_v23, %s5822_s15  ;;  %v4848_v33 = vmul.f32 -1.442695, %v3269_v22  ;;  %5717 = vpow2.f32 %v4845_v32  ;;  %v3472_v1 = vld [vmem:[%s6611_s2 + $0xb0] sm:$0xff]  ;;  %v3470_v32 = vld [vmem:[%s6611_s2 + $0xa0] sm:$0xff] }
 0xc12   : > { %v3296_v29 = vsub.f32 %v3268_v25, %v6325_v27  ;;  %3308 = vrot.lane.b32.xlu1 %v3297_v26, %s5822_s15  ;;  %v4847_v34 = vmul.f32 -1.442695, %v3268_v25  ;;  %5719 = vpow2.f32 %v4848_v33  ;;  %v3471_v26 = vld [vmem:[%s6611_s2 + $0xa8] sm:$0xff]  ;;  %v3469_v33 = vld [vmem:[%s6611_s2 + $0x98] sm:$0xff] }
 0xc14   : > { %3306 = vrot.lane.b32.xlu0 %v3296_v29, %s5822_s15  ;;  %5721 = vpow2.f32 %v4847_v34  ;;  %v3468_v34 = vld [vmem:[%s6611_s2 + $0x90] sm:$0xff]  ;;  %s6614_s15 = sld [smem:[#allocation11_spill]] }
 0xc1c   : > { %v5716_v35 = vpop.eup %5715 }
 0xc1d   : > { %v5718_v36 = vpop.eup %5717  ;;  %v3283_v37 = vadd.f32 1.0, %v5716_v35  ;;  %v3467_v35 = vld [vmem:[%s6611_s2 + $0x88] sm:$0xff] }
 0xc1e   : > { %v3282_v39 = vadd.f32 1.0, %v5718_v36  ;;  %v3466_v36 = vld [vmem:[%s6611_s2 + $0x80] sm:$0xff] }
 0xc1f   : > { %v5720_v38 = vpop.eup %5719  ;;  %5723 = vrcp.f32 %v3283_v37 }
 0xc20   : > { %v3285_v42 = vadd.f32 1.0, %v5720_v38  ;;  %5725 = vrcp.f32 %v3282_v39 }
 0xc21   : > { %v5722_v40 = vpop.eup %5721 }
 0xc22   : > { %v3284_v43 = vadd.f32 1.0, %v5722_v40  ;;  %5727 = vrcp.f32 %v3285_v42 }
 0xc24   : > { %5729 = vrcp.f32 %v3284_v43 }
 0xc2c   : > { %v5724_v49 = vpop.eup %5723 }
 0xc2d   : > { %v5726_v30 = vpop.eup %5725 }
 0xc2f   : > { %v5728_v56 = vpop.eup %5727 }
 0xc31   : > { %v5730_v60 = vpop.eup %5729 }
 0xc80   : > { %v3305_v24 = vpop.permute.xlu1 %3304 }
 0xc81   : > { %v3315_v51 = vmul.f32 %v5724_v49, %v3305_v24  ;;  %v4866_v24 = vld [vmem:[%s6613_s11] ss:$0 sm:$0xff]  ;;  %s6619_s11 = sld [smem:[#allocation14_spill]] }
 0xc82   : > { %v3303_v53 = vpop.permute.xlu0 %3302 }
 0xc83   : > { %v3314_v54 = vmul.f32 %v5726_v30, %v3303_v53  ;;  %3324 = vrot.lane.b32.xlu1 %v3315_v51, %s5823_s16 }
 0xc84   : > { %v3309_v57 = vpop.permute.xlu1 %3308 }
 0xc85   : > { %v3317_v58 = vmul.f32 %v5728_v56, %v3309_v57  ;;  %3322 = vrot.lane.b32.xlu0 %v3314_v54, %s5823_s16  ;;  %v3850_v56 = vld [vmem:[%s6614_s15 + $0x78] sm:$0xff]  ;;  %v3849_v57 = vld [vmem:[%s6614_s15 + $0x70] sm:$0xff] }
 0xc86   : > { %v3307_v61 = vpop.permute.xlu0 %3306 }
 0xc87   : > { %v3316_v62 = vmul.f32 %v5730_v60, %v3307_v61  ;;  %3328 = vrot.lane.b32.xlu1 %v3317_v58, %s5823_s16  ;;  %v3842_v60 = vld [vmem:[%s6614_s15 + $0x38] sm:$0xff] }
 0xc89   : > { %3326 = vrot.lane.b32.xlu0 %v3316_v62, %s5823_s16  ;;  %s5824_s16 = smov 64  }
 0xcf5   : > { %v3325_v0 = vpop.permute.xlu1 %3324 }
 0xcf6   : > { %v3335_v4 = vadd.f32 %v3325_v0, %v6307_v41  ;;  %v3459_v41 = vld [vmem:[%s6611_s2 + $0x48] sm:$0xff] }
 0xcf7   : > { %v3323_v2 = vpop.permute.xlu0 %3322  ;;  %5457 = vmatprep.subr.mxu0 %v3459_v41  ;;  %v3848_v0 = vld [vmem:[%s6614_s15 + $0x68] sm:$0xff] }
 0xcf8   : > { %v3334_v3 = vadd.f32 %v3323_v2, %v6311_v44  ;;  %v3454_v44 = vld [vmem:[%s6611_s2 + $0x20] sm:$0xff]  ;;  %5458 = vmatpush3.msra.mxu0 %v3459_v41  ;;  %v3841_v2 = vld [vmem:[%s6614_s15 + $0x30] sm:$0xff] }
 0xcf9   : > { %v3329_v5 = vpop.permute.xlu1 %3328  ;;  %v3845_v41 = vld [vmem:[%s6614_s15 + $0x50] sm:$0xff] }
 0xcfa   : > { %5439 = vmatprep.mubr.msk.f32.mxu1 %vm1120_vm2, %v3334_v3  ;;  %v3337_v10 = vadd.f32 %v3329_v5, %v6314_v46  ;;  %v3453_v46 = vld [vmem:[%s6611_s2 + $0x18] sm:$0xff]  ;;  %v3847_v5 = vld [vmem:[%s6614_s15 + $0x60] sm:$0xff] }
 0xcfb   : > { %5440 = vmatmul.mubr.msk.f32.vlgmr.msra.gmra.mxu1 %vm1120_vm2, %v3335_v4  ;;  %v3327_v7 = vpop.permute.xlu0 %3326 }
 0xcfc   : > { %v3336_v8 = vadd.f32 %v3327_v7, %v6325_v27  ;;  %5468 = vmatpush3.msra.mxu1 %v3457_v50  ;;  %v3458_v27 = vld [vmem:[%s6611_s2 + $0x40] sm:$0xff] }
 0xcfd   : > { %5469 = vmatprep.subr.mxu1 %v3456_v6  ;;  %5459 = vmatprep.subr.mxu0 %v3458_v27 }
 0xcfe   : > { %5442 = vmatprep.mubr.msk.f32.mxu1 %vm1120_vm2, %v3336_v8  ;;  %5470 = vmatpush3.msra.mxu1 %v3456_v6 }
 0xcff   : > { %5443 = vmatmul.mubr.msk.f32.gmra.mxu1 %vm1120_vm2, %v3337_v10  ;;  %5471 = vmatprep.subr.mxu1 %v3455_v9 }
 0xd00   : > { %5472 = vmatpush3.msra.mxu1 %v3455_v9  ;;  %5460 = vmatpush3.msra.mxu0 %v3458_v27  ;;  %v3846_v9 = vld [vmem:[%s6614_s15 + $0x58] sm:$0xff] }
 0xd01   : > { %5473 = vmatprep.subr.mxu1 %v3454_v44  ;;  %5489 = vmatprep.subr.mxu0 %v3473_v12 }
 0xd02   : > { %5474 = vmatpush3.msra.mxu1 %v3454_v44 }
 0xd03   : > { %5475 = vmatprep.subr.mxu1 %v3453_v46 }
 0xd04   : > { %5476 = vmatpush3.msra.mxu1 %v3453_v46 }
 0xd05   : > { %5477 = vmatprep.subr.mxu1 %v3452_v11 }
 0xd06   : > { %5478 = vmatpush3.msra.mxu1 %v3452_v11 }
 0xd07   : > { %5479 = vmatprep.subr.mxu1 %v3451_v13 }
 0xd08   : > { %5480 = vmatpush3.msra.mxu1 %v3451_v13 }
 0xd09   : > { %5481 = vmatprep.subr.mxu1 %v3450_v15 }
 0xd0a   : > { %5482 = vmatpush3.msra.mxu1 %v3450_v15 }
 0xd0b   : > { %5511 = vmatprep.subr.mxu1 %v3850_v56 }
 0xdbb   : > { %v5441_v16 = vpop.f32.mrf.mxu1 }
 0xdbc   : > { %v6402_v20 = vadd.f32 %v5441_v16, %v4849_v17 }
 0xdbd   : > { %v3427_v18 = vpop.f32.mrf.mxu1 }
 0xdbe   : > { %v6400_v19 = vadd.f32 %v4849_v17, %v3427_v18 }
 0xdbf   : > { %v5444_v21 = vpop.f32.mrf.mxu1 }
 0xdc0   : > { %v6404_v22 = vadd.f32 %v5444_v21, %v4849_v17  ;;  %5461 = vmatprep.mubr.msk.f32.mxu0 %vm3474_vm9, %v6400_v19  ;;  %v3448_v37 = vrot.slane %v6400_v19, 1 }
 0xdc1   : > { %v3437_v23 = vpop.f32.mrf.mxu1  ;;  %5462 = vmatmul.mubr.msk.f32.vlgmr.msra.gmra.mxu0 %vm3474_vm9, %v6402_v20 }
 0xdc2   : > { %v6411_v25 = vadd.f32 %v4849_v17, %v3437_v23  ;;  %5490 = vmatpush3.msra.mxu0 %v3473_v12  ;;  %v3446_v29 = vrot.slane %v6404_v22, 7  ;;  %v3449_v38 = vsel %vm1104_vm4, %v3448_v37, 0.0 }
 0xdc3   : > { %5491 = vmatprep.subr.mxu0 %v3472_v1 }
 0xdc4   : > { %5492 = vmatpush3.msra.mxu0 %v3472_v1  ;;  %5464 = vmatprep.mubr.msk.f32.mxu0 %vm3474_vm9, %v6411_v25  ;;  %v3447_v31 = vsel %vm1099_vm3, %v3446_v29, 0.0  ;;  %v3840_v29 = vld [vmem:[%s6614_s15 + $0x28] sm:$0xff] }
 0xdc5   : > { %5493 = vmatprep.subr.mxu0 %v3471_v26  ;;  %5465 = vmatmul.mubr.msk.f32.gmra.mxu0 %vm3474_vm9, %v6404_v22 }
 0xdc6   : > { %5483 = vmatprep.mubr.msk.f32.mxu1 %vm3474_vm9, %v3447_v31  ;;  %5494 = vmatpush3.msra.mxu0 %v3471_v26  ;;  %v3844_v26 = vld [vmem:[%s6614_s15 + $0x48] sm:$0xff]  ;;  %v3843_v31 = vld [vmem:[%s6614_s15 + $0x40] sm:$0xff] }
 0xdc7   : > { %5484 = vmatmul.mubr.msk.f32.vlgmr.msra.gmra.mxu1 %vm3474_vm9, %v6400_v19  ;;  %5495 = vmatprep.subr.mxu0 %v3470_v32 }
 0xdc8   : > { %5505 = vmatprep.mubr.msk.f32.mxu0 %vm3474_vm9, %v6402_v20  ;;  %5486 = vmatprep.mubr.msk.f32.mxu1 %vm3474_vm9, %v6402_v20 }
 0xdc9   : > { %5496 = vmatpush3.msra.mxu0 %v3470_v32  ;;  %5512 = vmatpush3.msra.mxu1 %v3850_v56  ;;  %v3839_v32 = vld [vmem:[%s6614_s15 + $0x20] sm:$0xff] }
 0xdca   : > { %5497 = vmatprep.subr.mxu0 %v3469_v33  ;;  %5513 = vmatprep.subr.mxu1 %v3849_v57 }
 0xdcb   : > { %5498 = vmatpush3.msra.mxu0 %v3469_v33  ;;  %5487 = vmatmul.mubr.msk.f32.gmra.mxu1 %vm3474_vm9, %v6411_v25  ;;  %v3838_v33 = vld [vmem:[%s6614_s15 + $0x18] sm:$0xff] }
 0xdcc   : > { %5499 = vmatprep.subr.mxu0 %v3468_v34  ;;  %5514 = vmatpush3.msra.mxu1 %v3849_v57 }
 0xdcd   : > { %5500 = vmatpush3.msra.mxu0 %v3468_v34  ;;  %5515 = vmatprep.subr.mxu1 %v3848_v0  ;;  %v3858_v34 = vld [vmem:[%s6614_s15 + $0xb8] sm:$0xff] }
 0xdce   : > { %5501 = vmatprep.subr.mxu0 %v3467_v35  ;;  %5516 = vmatpush3.msra.mxu1 %v3848_v0 }
 0xdcf   : > { %5502 = vmatpush3.msra.mxu0 %v3467_v35  ;;  %5517 = vmatprep.subr.mxu1 %v3847_v5  ;;  %v3837_v35 = vld [vmem:[%s6614_s15 + $0x10] sm:$0xff] }
 0xdd0   : > { %5503 = vmatprep.subr.mxu0 %v3466_v36  ;;  %5518 = vmatpush3.msra.mxu1 %v3847_v5 }
 0xdd1   : > { %5504 = vmatpush3.msra.mxu0 %v3466_v36  ;;  %5519 = vmatprep.subr.mxu1 %v3846_v9  ;;  %v3836_v36 = vld [vmem:[%s6614_s15 + $0x8] sm:$0xff] }
 0xdd2   : > { %5506 = vmatmul.mubr.msk.f32.vlgmr.msra.gmra.mxu0 %vm3474_vm9, %v6411_v25  ;;  %5533 = vmatprep.subr.mxu0 %v3842_v60 }
 0xdd3   : > { %5508 = vmatprep.mubr.msk.f32.mxu0 %vm3474_vm9, %v6404_v22  ;;  %5534 = vmatpush3.msra.mxu0 %v3842_v60  ;;  %v3853_v60 = vld [vmem:[%s6614_s15 + $0x90] sm:$0xff] }
 0xdd4   : > { %5535 = vmatprep.subr.mxu0 %v3841_v2  ;;  %5520 = vmatpush3.msra.mxu1 %v3846_v9 }
 0xdd5   : > { %5536 = vmatpush3.msra.mxu0 %v3841_v2  ;;  %5521 = vmatprep.subr.mxu1 %v3845_v41 }
 0xdd6   : > { %5509 = vmatmul.mubr.msk.f32.gmra.mxu0 %vm3474_vm9, %v3449_v38  ;;  %5522 = vmatpush3.msra.mxu1 %v3845_v41  ;;  %v4883_v41 = vld [vmem:[%s6615_s22] ss:$0 sm:$0xff]  ;;  %s4914_s22 = sshll.u32 %s6622_s10, 5 }
 0xdd7   : > { %5523 = vmatprep.subr.mxu1 %v3844_v26  ;;  %5537 = vmatprep.subr.mxu0 %v3840_v29 }
 0xdd8   : > { %5524 = vmatpush3.msra.mxu1 %v3844_v26  ;;  %5538 = vmatpush3.msra.mxu0 %v3840_v29  ;;  %v4220_v26 = vld [vmem:[%s6616_s23 + $0x28] sm:$0xff] }
 0xdd9   : > { %5525 = vmatprep.subr.mxu1 %v3843_v31  ;;  %5539 = vmatprep.subr.mxu0 %v3839_v32 }
 0xdda   : > { %5526 = vmatpush3.msra.mxu1 %v3843_v31  ;;  %5540 = vmatpush3.msra.mxu0 %v3839_v32 }
 0xddb   : > { %5541 = vmatprep.subr.mxu0 %v3838_v33  ;;  %5555 = vmatprep.subr.mxu1 %v3858_v34 }
 0xddc   : > { %5542 = vmatpush3.msra.mxu0 %v3838_v33  ;;  %v4219_v33 = vld [vmem:[%s6616_s23 + $0x20] sm:$0xff] }
 0xddd   : > { %5543 = vmatprep.subr.mxu0 %v3837_v35 }
 0xdde   : > { %5544 = vmatpush3.msra.mxu0 %v3837_v35 }
 0xddf   : > { %5545 = vmatprep.subr.mxu0 %v3836_v36 }
 0xde0   : > { %5546 = vmatpush3.msra.mxu0 %v3836_v36 }
 0xe81   : > { %v5463_v39 = vpop.f32.mrf.mxu0 }
 0xe83   : > { %v3553_v42 = vpop.f32.mrf.mxu0 }
 0xe85   : > { %v5466_v45 = vpop.f32.mrf.mxu0 }
 0xe87   : > { %v5485_v40 = vpop.f32.mrf.mxu1  ;;  %v3563_v28 = vpop.f32.mrf.mxu0 }
 0xe88   : > { %v3647_v48 = vadd.f32 %v5485_v40, %v5463_v39  ;;  %v3835_v40 = vld [vmem:[%s6614_s15] sm:$0xff] }
 0xe89   : > { %v3641_v43 = vpop.f32.mrf.mxu1  ;;  %5547 = vmatprep.subr.mxu0 %v3835_v40 }
 0xe8a   : > { %v3642_v50 = vadd.f32 %v3641_v43, %v3553_v42  ;;  %5548 = vmatpush3.msra.mxu0 %v3835_v40 }
 0xe8b   : > { %v5488_v47 = vpop.f32.mrf.mxu1 }
 0xe8c   : > { %v3657_v53 = vadd.f32 %v5488_v47, %v5466_v45 }
 0xe8d   : > { %v3651_v51 = vpop.f32.mrf.mxu1 }
 0xe8e   : > { %v3652_v58 = vadd.f32 %v3651_v51, %v3563_v28 }
 0xe92   : > { %v5507_v49 = vpop.f32.mrf.mxu0 }
 0xe93   : > { %v3749_v52 = vadd.f32 %v5507_v49, %v3647_v48 }
 0xe94   : > { %v3729_v30 = vpop.f32.mrf.mxu0 }
 0xe95   : > { %v3760_v54 = vadd.f32 %v4866_v24, %v3749_v52  ;;  %v3748_v55 = vadd.f32 %v3729_v30, %v3642_v50 }
 0xe96   : > { %v5510_v59 = vpop.f32.mrf.mxu0 }
 0xe97   : > { %v3759_v61 = vadd.f32 %v4866_v24, %v3748_v55  ;;  %v3751_v62 = vadd.f32 %v5510_v59, %v3657_v53  ;;  %v3788_v63 = vsub.f32 %v3760_v54, %v6402_v20  ;;  %v4868_v27 = vmul.f32 -1.442695, %v3760_v54  ;;  %v3857_v55 = vld [vmem:[%s6614_s15 + $0xb0] sm:$0xff] }
 0xe98   : > { %v3739_v3 = vpop.f32.mrf.mxu0 }
 0xe99   : > { %v3750_v4 = vadd.f32 %v3739_v3, %v3652_v58  ;;  %3797 = vrot.lane.b32.xlu1 %v3788_v63, %s5824_s16  ;;  %v3762_v6 = vadd.f32 %v4866_v24, %v3751_v62  ;;  %v3787_v7 = vsub.f32 %v3759_v61, %v6400_v19  ;;  %v4867_v46 = vmul.f32 -1.442695, %v3759_v61  ;;  %v3852_v61 = vld [vmem:[%s6614_s15 + $0x88] sm:$0xff]  ;;  %v3851_v62 = vld [vmem:[%s6614_s15 + $0x80] sm:$0xff] }
 0xe9a   : > { %5731 = vpow2.f32 %v4868_v27 }
 0xe9b   : > { %v3761_v8 = vadd.f32 %v4866_v24, %v3750_v4  ;;  %3795 = vrot.lane.b32.xlu0 %v3787_v7, %s5824_s16  ;;  %v3790_v44 = vsub.f32 %v3762_v6, %v6404_v22  ;;  %5733 = vpow2.f32 %v4867_v46  ;;  %v4870_v12 = vmul.f32 -1.442695, %v3762_v6 }
 0xe9d   : > { %v3789_v10 = vsub.f32 %v3761_v8, %v6411_v25  ;;  %v4869_v11 = vmul.f32 -1.442695, %v3761_v8 }
 0xe9f   : > { %3799 = vrot.lane.b32.xlu1 %v3789_v10, %s5824_s16  ;;  %3801 = vrot.lane.b32.xlu0 %v3790_v44, %s5824_s16  ;;  %5735 = vpow2.f32 %v4869_v11 }
 0xea0   : > { %5737 = vpow2.f32 %v4870_v12 }
 0xea7   : > { %v5732_v13 = vpop.eup %5731 }
 0xea8   : > { %v5734_v15 = vpop.eup %5733  ;;  %v3776_v16 = vadd.f32 1.0, %v5732_v13 }
 0xea9   : > { %v3775_v18 = vadd.f32 1.0, %v5734_v15  ;;  %v4222_v15 = vld [vmem:[%s6616_s23 + $0x38] sm:$0xff] }
 0xeaa   : > { %5739 = vrcp.f32 %v3776_v16  ;;  %v4221_v16 = vld [vmem:[%s6616_s23 + $0x30] sm:$0xff]  ;;  %5577 = vmatprep.subr.mxu0 %v4222_v15 }
 0xeab   : > { %5741 = vrcp.f32 %v3775_v18 }
 0xeac   : > { %v5736_v17 = vpop.eup %5735 }
 0xead   : > { %v5738_v21 = vpop.eup %5737  ;;  %v3777_v1 = vadd.f32 1.0, %v5736_v17 }
 0xeae   : > { %v3778_v23 = vadd.f32 1.0, %v5738_v21 }
 0xeaf   : > { %5743 = vrcp.f32 %v3777_v1 }
 0xeb0   : > { %5745 = vrcp.f32 %v3778_v23 }
 0xeb7   : > { %v5740_v37 = vpop.eup %5739 }
 0xeb8   : > { %v5742_v42 = vpop.eup %5741 }
 0xebc   : > { %v5744_v47 = vpop.eup %5743 }
 0xebd   : > { %v5746_v48 = vpop.eup %5745 }
 0xf0b   : > { %v3798_v38 = vpop.permute.xlu1 %3797 }
 0xf0c   : > { %v3808_v39 = vmul.f32 %v5740_v37, %v3798_v38  ;;  %v4218_v37 = vld [vmem:[%s6616_s23 + $0x18] sm:$0xff] }
 0xf0d   : > { %v3796_v43 = vpop.permute.xlu0 %3795 }
 0xf0e   : > { %3817 = vrot.lane.b32.xlu1 %v3808_v39, %s5824_s16  ;;  %v3807_v45 = vmul.f32 %v5742_v42, %v3796_v43  ;;  %v4217_v39 = vld [vmem:[%s6616_s23 + $0x10] sm:$0xff] }
 0xf10   : > { %3815 = vrot.lane.b32.xlu0 %v3807_v45, %s5824_s16 }
 0xf11   : > { %v3800_v28 = vpop.permute.xlu1 %3799  ;;  %v3802_v49 = vpop.permute.xlu0 %3801 }
 0xf12   : > { %v3809_v24 = vmul.f32 %v5744_v47, %v3800_v28  ;;  %v3810_v50 = vmul.f32 %v5746_v48, %v3802_v49 }
 0xf14   : > { %3819 = vrot.lane.b32.xlu1 %v3809_v24, %s5824_s16  ;;  %3821 = vrot.lane.b32.xlu0 %v3810_v50, %s5824_s16 }
 0xf80   : > { %v3818_v51 = vpop.permute.xlu1 %3817 }
 0xf81   : > { %v6477_v53 = vadd.f32 %v3818_v51, %v6402_v20  ;;  %v3855_v20 = vld [vmem:[%s6614_s15 + $0xa0] sm:$0xff] }
 0xf82   : > { %v3816_v52 = vpop.permute.xlu0 %3815 }
 0xf83   : > { %v6474_v30 = vadd.f32 %v3816_v52, %v6400_v19  ;;  %v3856_v19 = vld [vmem:[%s6614_s15 + $0xa8] sm:$0xff] }
 0xf85   : > { %5527 = vmatprep.mubr.msk.f32.mxu1 %vm3474_vm9, %v6474_v30  ;;  %v3833_v63 = vrot.slane %v6474_v30, 1 }
 0xf86   : > { %v3820_v54 = vpop.permute.xlu1 %3819  ;;  %v3822_v56 = vpop.permute.xlu0 %3821  ;;  %5528 = vmatmul.mubr.msk.f32.vlgmr.msra.gmra.mxu1 %vm3474_vm9, %v6477_v53 }
 0xf87   : > { %v6485_v57 = vadd.f32 %v3820_v54, %v6411_v25  ;;  %v6488_v58 = vadd.f32 %v3822_v56, %v6404_v22  ;;  %5556 = vmatpush3.msra.mxu1 %v3858_v34  ;;  %v3854_v25 = vld [vmem:[%s6614_s15 + $0x98] sm:$0xff]  ;;  %v3834_v0 = vsel %vm1104_vm4, %v3833_v63, 0.0  ;;  %v4216_v54 = vld [vmem:[%s6616_s23 + $0x8] sm:$0xff] }
 0xf88   : > { %5557 = vmatprep.subr.mxu1 %v3857_v55 }
 0xf89   : > { %5530 = vmatprep.mubr.msk.f32.mxu1 %vm3474_vm9, %v6485_v57  ;;  %5558 = vmatpush3.msra.mxu1 %v3857_v55  ;;  %v3831_v59 = vrot.slane %v6488_v58, 7  ;;  %v4215_v55 = vld [vmem:[%s6616_s23] sm:$0xff] }
 0xf8a   : > { %5559 = vmatprep.subr.mxu1 %v3856_v19  ;;  %5531 = vmatmul.mubr.msk.f32.gmra.mxu1 %vm3474_vm9, %v6488_v58 }
 0xf8b   : > { %5560 = vmatpush3.msra.mxu1 %v3856_v19  ;;  %5571 = vmatprep.mubr.msk.f32.mxu1 %vm3474_vm9, %v6477_v53  ;;  %v3832_v22 = vsel %vm1099_vm3, %v3831_v59, 0.0 }
 0xf8c   : > { %5561 = vmatprep.subr.mxu1 %v3855_v20  ;;  %5549 = vmatprep.mubr.msk.f32.mxu0 %vm3474_vm9, %v3832_v22 }
 0xf8d   : > { %5562 = vmatpush3.msra.mxu1 %v3855_v20  ;;  %5550 = vmatmul.mubr.msk.f32.vlgmr.msra.gmra.mxu0 %vm3474_vm9, %v6474_v30  ;;  %v4328_v20 = vld [vmem:[%s6617_s28 + $0x8] sm:$0xff] }
 0xf8e   : > { %5563 = vmatprep.subr.mxu1 %v3854_v25  ;;  %5552 = vmatprep.mubr.msk.f32.mxu0 %vm3474_vm9, %v6477_v53 }
 0xf8f   : > { %5564 = vmatpush3.msra.mxu1 %v3854_v25  ;;  %5578 = vmatpush3.msra.mxu0 %v4222_v15  ;;  %v4437_v15 = vld [vmem:[%s6618_s0] sm:$0xff] }
 0xf90   : > { %5565 = vmatprep.subr.mxu1 %v3853_v60  ;;  %5579 = vmatprep.subr.mxu0 %v4221_v16 }
 0xf91   : > { %5566 = vmatpush3.msra.mxu1 %v3853_v60  ;;  %5553 = vmatmul.mubr.msk.f32.gmra.mxu0 %vm3474_vm9, %v6485_v57 }
 0xf92   : > { %5567 = vmatprep.subr.mxu1 %v3852_v61  ;;  %5580 = vmatpush3.msra.mxu0 %v4221_v16  ;;  %v4548_v16 = vld [vmem:[%s5988_s20 + $0x8] sm:$0xff] }
 0xf93   : > { %5568 = vmatpush3.msra.mxu1 %v3852_v61  ;;  %5581 = vmatprep.subr.mxu0 %v4220_v26 }
 0xf94   : > { %5569 = vmatprep.subr.mxu1 %v3851_v62  ;;  %5582 = vmatpush3.msra.mxu0 %v4220_v26 }
 0xf95   : > { %5570 = vmatpush3.msra.mxu1 %v3851_v62  ;;  %5583 = vmatprep.subr.mxu0 %v4219_v33 }
 0xf96   : > { %5572 = vmatmul.mubr.msk.f32.vlgmr.msra.gmra.mxu1 %vm3474_vm9, %v6485_v57  ;;  %5584 = vmatpush3.msra.mxu0 %v4219_v33 }
 0xf97   : > { %5574 = vmatprep.mubr.msk.f32.mxu1 %vm3474_vm9, %v6488_v58  ;;  %5585 = vmatprep.subr.mxu0 %v4218_v37 }
 0xf98   : > { %5586 = vmatpush3.msra.mxu0 %v4218_v37  ;;  %5599 = vmatprep.subr.mxu1 %v4328_v20  ;;  %v4547_v37 = vld [vmem:[%s5988_s20] sm:$0xff] }
 0xf99   : > { %5587 = vmatprep.subr.mxu0 %v4217_v39  ;;  %5600 = vmatpush3.msra.mxu1 %v4328_v20 }
 0xf9a   : > { %5575 = vmatmul.mubr.msk.f32.gmra.mxu1 %vm3474_vm9, %v3834_v0  ;;  %5588 = vmatpush3.msra.mxu0 %v4217_v39 }
 0xf9b   : > { %5589 = vmatprep.subr.mxu0 %v4216_v54 }
 0xf9c   : > { %5590 = vmatpush3.msra.mxu0 %v4216_v54 }
 0xf9d   : > { %5591 = vmatprep.subr.mxu0 %v4215_v55 }
 0xf9e   : > { %5592 = vmatpush3.msra.mxu0 %v4215_v55 }
 0xf9f   : > { %5619 = vmatprep.subr.mxu0 %v4548_v16 }
0x1046   : > { %v5529_v2 = vpop.f32.mrf.mxu1 }
0x1048   : > { %v3937_v3 = vpop.f32.mrf.mxu1 }
0x104a   : > { %v5532_v5 = vpop.f32.mrf.mxu1 }
0x104c   : > { %v3947_v7 = vpop.f32.mrf.mxu1 }
0x104d   : > { %v5551_v4 = vpop.f32.mrf.mxu0 }
0x104e   : > { %v4031_v9 = vadd.f32 %v5551_v4, %v5529_v2 }
0x104f   : > { %v4025_v6 = vpop.f32.mrf.mxu0 }
0x1050   : > { %v4026_v44 = vadd.f32 %v4025_v6, %v3937_v3 }
0x1051   : > { %v5554_v8 = vpop.f32.mrf.mxu0 }
0x1052   : > { %v4041_v11 = vadd.f32 %v5554_v8, %v5532_v5 }
0x1053   : > { %v4035_v46 = vpop.f32.mrf.mxu0 }
0x1054   : > { %v4036_v18 = vadd.f32 %v4035_v46, %v3947_v7 }
0x1056   : > { %v5573_v10 = vpop.f32.mrf.mxu1 }
0x1057   : > { %v4133_v27 = vadd.f32 %v5573_v10, %v4031_v9 }
0x1058   : > { %v4113_v14 = vpop.f32.mrf.mxu1 }
0x1059   : > { %v4144_v12 = vadd.f32 %v4883_v41, %v4133_v27  ;;  %v4132_v13 = vadd.f32 %v4113_v14, %v4026_v44  ;;  %v4327_v44 = vld [vmem:[%s6617_s28] sm:$0xff] }
0x105a   : > { %v5576_v17 = vpop.f32.mrf.mxu1  ;;  %5601 = vmatprep.subr.mxu1 %v4327_v44  ;;  %v4888_v27 = vld [vmem:[%s6619_s11] ss:$0 sm:$0xff]  ;;  %s1011_s11 = scalar_lea.vmem %s5998_s4, %s4914_s22 }
0x105b   : > { %v4143_v21 = vadd.f32 %v4883_v41, %v4132_v13  ;;  %v4135_v1 = vadd.f32 %v5576_v17, %v4041_v11  ;;  %v4172_v23 = vsub.f32 %v4144_v12, %v6477_v53  ;;  %v4885_v40 = vmul.f32 -1.442695, %v4144_v12  ;;  %5602 = vmatpush3.msra.mxu1 %v4327_v44 }
0x105c   : > { %v4123_v29 = vpop.f32.mrf.mxu1 }
0x105d   : > { %v4146_v31 = vadd.f32 %v4883_v41, %v4135_v1  ;;  %v4134_v32 = vadd.f32 %v4123_v29, %v4036_v18  ;;  %4181 = vrot.lane.b32.xlu1 %v4172_v23, %s5824_s16  ;;  %v4171_v34 = vsub.f32 %v4143_v21, %v6474_v30  ;;  %v4884_v42 = vmul.f32 -1.442695, %v4143_v21 }
0x105e   : > { %5747 = vpow2.f32 %v4885_v40 }
0x105f   : > { %v4145_v35 = vadd.f32 %v4883_v41, %v4134_v32  ;;  %v4174_v36 = vsub.f32 %v4146_v31, %v6488_v58  ;;  %4179 = vrot.lane.b32.xlu0 %v4171_v34, %s5824_s16  ;;  %v4887_v43 = vmul.f32 -1.442695, %v4146_v31  ;;  %5749 = vpow2.f32 %v4884_v42 }
0x1061   : > { %4185 = vrot.lane.b32.xlu1 %v4174_v36, %s5824_s16  ;;  %v4173_v38 = vsub.f32 %v4145_v35, %v6485_v57  ;;  %v4886_v45 = vmul.f32 -1.442695, %v4145_v35  ;;  %5751 = vpow2.f32 %v4887_v43 }
0x1063   : > { %4183 = vrot.lane.b32.xlu0 %v4173_v38, %s5824_s16  ;;  %5753 = vpow2.f32 %v4886_v45  ;;  %v4898_v38 = vld [vmem:[%s5983_s12] ss:$0 sm:$0xff] }
0x106b   : > { %v5748_v47 = vpop.eup %5747 }
0x106c   : > { %v5750_v28 = vpop.eup %5749  ;;  %v4160_v48 = vadd.f32 1.0, %v5748_v47 }
0x106d   : > { %v4159_v24 = vadd.f32 1.0, %v5750_v28 }
0x106e   : > { %v5752_v49 = vpop.eup %5751  ;;  %5755 = vrcp.f32 %v4160_v48 }
0x106f   : > { %v4162_v51 = vadd.f32 1.0, %v5752_v49  ;;  %5757 = vrcp.f32 %v4159_v24 }
0x1070   : > { %v5754_v50 = vpop.eup %5753 }
0x1071   : > { %v4161_v52 = vadd.f32 1.0, %v5754_v50  ;;  %5759 = vrcp.f32 %v4162_v51 }
0x1073   : > { %5761 = vrcp.f32 %v4161_v52  ;;  %v4903_v52 = vld [vmem:[%s5993_s27] ss:$0 sm:$0xff] }
0x107b   : > { %v5756_v56 = vpop.eup %5755 }
0x107c   : > { %v5758_v22 = vpop.eup %5757 }
0x107e   : > { %v5760_v60 = vpop.eup %5759 }
0x1080   : > { %v5762_v0 = vpop.eup %5761 }
0x10cf   : > { %v4182_v19 = vpop.permute.xlu1 %4181 }
0x10d0   : > { %v4192_v59 = vmul.f32 %v5756_v56, %v4182_v19 }
0x10d1   : > { %v4180_v25 = vpop.permute.xlu0 %4179 }
0x10d2   : > { %4201 = vrot.lane.b32.xlu1 %v4192_v59, %s5824_s16  ;;  %v4191_v61 = vmul.f32 %v5758_v22, %v4180_v25 }
0x10d3   : > { %v4186_v62 = vpop.permute.xlu1 %4185 }
0x10d4   : > { %v4194_v63 = vmul.f32 %v5760_v60, %v4186_v62  ;;  %4199 = vrot.lane.b32.xlu0 %v4191_v61, %s5824_s16 }
0x10d5   : > { %v4184_v2 = vpop.permute.xlu0 %4183 }
0x10d6   : > { %4205 = vrot.lane.b32.xlu1 %v4194_v63, %s5824_s16  ;;  %v4193_v3 = vmul.f32 %v5762_v0, %v4184_v2 }
0x10d8   : > { %4203 = vrot.lane.b32.xlu0 %v4193_v3, %s5824_s16  ;;  %s6620_s16 = sld [smem:[#allocation16_spill]] }
0x10de   : > { %v4893_v17 = vld [vmem:[%s6620_s16] ss:$0 sm:$0xff] }
0x1144   : > { %v4202_v4 = vpop.permute.xlu1 %4201 }
0x1145   : > { %v4212_v7 = vadd.f32 %v4202_v4, %v6477_v53 }
0x1146   : > { %v4200_v5 = vpop.permute.xlu0 %4199 }
0x1147   : > { %v4211_v6 = vadd.f32 %v4200_v5, %v6474_v30  ;;  %v4438_v30 = vld [vmem:[%s6618_s0 + $0x8] sm:$0xff] }
0x1148   : > { %v4206_v8 = vpop.permute.xlu1 %4205  ;;  %5609 = vmatprep.subr.mxu1 %v4438_v30 }
0x1149   : > { %5593 = vmatprep.mubr.msk.f32.mxu0 %vm3474_vm9, %v4211_v6  ;;  %v4214_v41 = vadd.f32 %v4206_v8, %v6488_v58 }
0x114a   : > { %5594 = vmatmul.mubr.msk.f32.vlgmr.msra.gmra.mxu0 %vm3474_vm9, %v4212_v7  ;;  %v4204_v9 = vpop.permute.xlu0 %4203 }
0x114b   : > { %v4213_v10 = vadd.f32 %v4204_v9, %v6485_v57  ;;  %5620 = vmatpush3.msra.mxu0 %v4548_v16 }
0x114c   : > { %5621 = vmatprep.subr.mxu0 %v4547_v37 }
0x114d   : > { %5596 = vmatprep.mubr.msk.f32.mxu0 %vm3474_vm9, %v4213_v10  ;;  %5622 = vmatpush3.msra.mxu0 %v4547_v37 }
0x114e   : > { %5597 = vmatmul.mubr.msk.f32.gmra.mxu0 %vm3474_vm9, %v4214_v41 }
0x120a   : > { %v5595_v53 = vpop.f32.mrf.mxu0 }
0x120b   : > { %v4314_v11 = vadd.f32 %v5595_v53, %v4888_v27 }
0x120c   : > { %v4308_v46 = vpop.f32.mrf.mxu0 }
0x120d   : > { %v4309_v14 = vadd.f32 %v4888_v27, %v4308_v46 }
0x120e   : > { %v5598_v57 = vpop.f32.mrf.mxu0 }
0x120f   : > { %5603 = vmatprep.mubr.msk.f32.mxu1 %vm1024_vm1, %v4309_v14  ;;  %v4324_v13 = vadd.f32 %v5598_v57, %v4888_v27 }
0x1210   : > { %v4318_v58 = vpop.f32.mrf.mxu0  ;;  %5604 = vmatmul.mubr.msk.f32.vlgmr.msra.gmra.mxu1 %vm1024_vm1, %v4314_v11 }
0x1211   : > { %v4319_v12 = vadd.f32 %v4888_v27, %v4318_v58  ;;  %5610 = vmatpush3.msra.mxu1 %v4438_v30 }
0x1212   : > { %5611 = vmatprep.subr.mxu1 %v4437_v15 }
0x1213   : > { %5606 = vmatprep.mubr.msk.f32.mxu1 %vm1024_vm1, %v4319_v12  ;;  %5612 = vmatpush3.msra.mxu1 %v4437_v15 }
0x1214   : > { %5607 = vmatmul.mubr.msk.f32.gmra.mxu1 %vm1024_vm1, %v4324_v13 }
0x12d0   : > { %v5605_v18 = vpop.f32.mrf.mxu1 }
0x12d1   : > { %v4420_v21 = vadd.f32 %v5605_v18, %v4893_v17 }
0x12d2   : > { %v4414_v1 = vpop.f32.mrf.mxu1 }
0x12d3   : > { %v4415_v23 = vadd.f32 %v4893_v17, %v4414_v1  ;;  %v4434_v31 = vmax.f32 %v4420_v21, 0.0 }
0x12d4   : > { %v5608_v26 = vpop.f32.mrf.mxu1 }
0x12d5   : > { %v4433_v29 = vmax.f32 %v4415_v23, 0.0  ;;  %v4430_v32 = vadd.f32 %v5608_v26, %v4893_v17 }
0x12d6   : > { %v4424_v33 = vpop.f32.mrf.mxu1 }
0x12d7   : > { %v4425_v34 = vadd.f32 %v4893_v17, %v4424_v33  ;;  %5613 = vmatprep.mubr.msk.f32.mxu1 %vm1024_vm1, %v4433_v29  ;;  %v4436_v36 = vmax.f32 %v4430_v32, 0.0 }
0x12d8   : > { %5614 = vmatmul.mubr.msk.f32.vlgmr.msra.gmra.mxu1 %vm1024_vm1, %v4434_v31 }
0x12d9   : > { %v4435_v35 = vmax.f32 %v4425_v34, 0.0 }
0x12db   : > { %5616 = vmatprep.mubr.msk.f32.mxu1 %vm1024_vm1, %v4435_v35 }
0x12dc   : > { %5617 = vmatmul.mubr.msk.f32.gmra.mxu1 %vm1024_vm1, %v4436_v36 }
0x1398   : > { %v5615_v39 = vpop.f32.mrf.mxu1 }
0x1399   : > { %v4530_v40 = vadd.f32 %v5615_v39, %v4898_v38 }
0x139a   : > { %v4524_v42 = vpop.f32.mrf.mxu1 }
0x139b   : > { %v4525_v43 = vadd.f32 %v4898_v38, %v4524_v42  ;;  %v4544_v28 = vmax.f32 %v4530_v40, 0.0 }
0x139c   : > { %v5618_v45 = vpop.f32.mrf.mxu1 }
0x139d   : > { %v4543_v47 = vmax.f32 %v4525_v43, 0.0  ;;  %v4540_v48 = vadd.f32 %v5618_v45, %v4898_v38 }
0x139e   : > { %v4534_v49 = vpop.f32.mrf.mxu1 }
0x139f   : > { %v4535_v24 = vadd.f32 %v4898_v38, %v4534_v49  ;;  %5623 = vmatprep.mubr.msk.f32.mxu0 %vm1024_vm1, %v4543_v47  ;;  %v4546_v51 = vmax.f32 %v4540_v48, 0.0 }
0x13a0   : > { %5624 = vmatmul.mubr.msk.f32.vlgmr.msra.gmra.mxu0 %vm1024_vm1, %v4544_v28 }
0x13a1   : > { %v4545_v50 = vmax.f32 %v4535_v24, 0.0 }
0x13a3   : > { %5626 = vmatprep.mubr.msk.f32.mxu0 %vm1024_vm1, %v4545_v50 }
0x13a4   : > { %5627 = vmatmul.mubr.msk.f32.gmra.mxu0 %vm1024_vm1, %v4546_v51 }
0x1460   : > { %v5625_v54 = vpop.f32.mrf.mxu0 }
0x1461   : > { %v4640_v55 = vadd.f32 %v5625_v54, %v4903_v52 }
0x1462   : > { %v4634_v56 = vpop.f32.mrf.mxu0 }
0x1463   : > { %v4909_v19 = vmul.f32 -1.442695, %v4640_v55  ;;  %v4635_v20 = vadd.f32 %v4903_v52, %v4634_v56 }
0x1464   : > { %v5628_v59 = vpop.f32.mrf.mxu0 }
0x1465   : > { %5763 = vpow2.f32 %v4909_v19  ;;  %v4908_v22 = vmul.f32 -1.442695, %v4635_v20  ;;  %v4650_v25 = vadd.f32 %v5628_v59, %v4903_v52 }
0x1466   : > { %v4644_v60 = vpop.f32.mrf.mxu0 }
0x1467   : > { %5765 = vpow2.f32 %v4908_v22  ;;  %v4911_v61 = vmul.f32 -1.442695, %v4650_v25  ;;  %v4645_v62 = vadd.f32 %v4903_v52, %v4644_v60 }
0x1469   : > { %5767 = vpow2.f32 %v4911_v61  ;;  %v4910_v63 = vmul.f32 -1.442695, %v4645_v62 }
0x146b   : > { %5769 = vpow2.f32 %v4910_v63 }
0x1472   : > { %v5764_v0 = vpop.eup %5763 }
0x1473   : > { %v4666_v2 = vadd.f32 1.0, %v5764_v0 }
0x1474   : > { %v5766_v3 = vpop.eup %5765 }
0x1475   : > { %5771 = vrcp.f32 %v4666_v2  ;;  %v4665_v4 = vadd.f32 1.0, %v5766_v3 }
0x1476   : > { %v5768_v5 = vpop.eup %5767 }
0x1477   : > { %5773 = vrcp.f32 %v4665_v4  ;;  %v4668_v6 = vadd.f32 1.0, %v5768_v5 }
0x1478   : > { %v5770_v7 = vpop.eup %5769 }
0x1479   : > { %5775 = vrcp.f32 %v4668_v6  ;;  %v4667_v8 = vadd.f32 1.0, %v5770_v7 }
0x147b   : > { %5777 = vrcp.f32 %v4667_v8 }
0x1482   : > { %v5772_v9 = vpop.eup %5771 }
0x1483   : > { %4678 = vst.msk [vmem:[%s1011_s11 + $0x8] sm:$0xff] %vm1024_vm1, %v5772_v9 }
0x1484   : > { %v5774_v10 = vpop.eup %5773 }
0x1485   : > { %4677 = vst.msk [vmem:[%s1011_s11] sm:$0xff] %vm1024_vm1, %v5774_v10 }
0x1486   : > { %v5776_v41 = vpop.eup %5775 }
0x1487   : > { %4680 = vst.msk [vmem:[%s1011_s11 + $0x18] sm:$0xff] %vm1024_vm1, %v5776_v41 }
0x1488   : > { %v5778_v44 = vpop.eup %5777 }
0x1489   : > { %4679 = vst.msk [vmem:[%s1011_s11 + $0x10] sm:$0xff] %vm1024_vm1, %v5778_v44 }
0x148a PF: > { %s77_s7 = sadd.s32 1, %s5785_s7  }
0x148b   : > { %p74_p4 = scmp.ge.s32.totalorder %s77_s7, 4  }
0x148d   :  { %76 = sbr.rel (!%p74_p4) target bundleno = 59 (0x3b), region = 215 }

</bundles_post_ra>
